<compile_context>
chip_gen: v5e
topology: v5e:2x2
jax: 0.10.0
libtpu: 0.0.40
codegen_flags: <defaults>
</compile_context>

<pallas_src>
import functools
import math

import jax
import jax.numpy as jnp
from jax.experimental import pallas as pl
from jax.experimental.pallas import tpu as pltpu

EPS = 1e-5


def _default_vmem_limit():
    # ~96 MiB on 128 MiB parts (v5e/v6e), ~48 MiB on 64 MiB parts (v7x).
    try:
        cap = pltpu.get_tpu_info().vmem_capacity_bytes
    except Exception:
        return 48 * 1024 * 1024
    return max(32 * 1024 * 1024, min(96 * 1024 * 1024, (cap * 3) // 4))


_VMEM_LIMIT = _default_vmem_limit()


# ---------------------------------------------------------------------------
# Kernel 1: 3x3 conv (+ optional fused input BN+ReLU, + optional fused 1x1
#           projection shortcut) emitting raw conv output(s) in the compute
#           dtype plus per-channel (sum, sum-of-squares) BN partials in f32.
# ---------------------------------------------------------------------------
def _conv3x3_kernel(*refs, stride, ho, wo, apply_affine, has_proj):
    idx = 0
    x_ref = refs[idx]; idx += 1
    if apply_affine:
        sc_ref, sh_ref = refs[idx], refs[idx + 1]; idx += 2
    w_ref = refs[idx]; idx += 1
    if has_proj:
        ws_ref = refs[idx]; idx += 1
    y_ref, st_ref = refs[idx], refs[idx + 1]; idx += 2
    if has_proj:
        ys_ref, sts_ref = refs[idx], refs[idx + 1]; idx += 2
    if stride == 1:
        pad_ref = refs[idx]; idx += 1
    col_ref = refs[idx]; idx += 1

    cin = x_ref.shape[-1]
    cdt = col_ref.dtype
    m = ho * wo

    if stride == 1:
        # Stage the (optionally BN+ReLU'd) input into a zero-padded VMEM
        # scratch: the halo never round-trips through HBM and every tap is a
        # unit-stride static window of the scratch.
        xin = x_ref[0].astype(jnp.float32)                   # (ho, wo, cin)
        if apply_affine:
            sc = sc_ref[...].reshape(1, 1, cin)
            sh = sh_ref[...].reshape(1, 1, cin)
            xin = jnp.maximum(xin * sc + sh, 0.0)
        pad_ref[...] = jnp.zeros_like(pad_ref)
        pad_ref[1:1 + ho, 1:1 + wo, :] = xin.astype(cdt)

        def tap(kh, kw):
            return pad_ref[kh:kh + ho, kw:kw + wo, :]
    else:
        # Phase-split input: tap (kh, kw) is a unit-stride window of phase
        # (kh % s, kw % s) at offset (kh // s, kw // s).
        def tap(kh, kw):
            p = (kh % stride) * stride + (kw % stride)
            return x_ref[p, kh // stride:kh // stride + ho,
                         kw // stride:kw // stride + wo, :]

    # im2col into one [M, 9*Cin] VMEM operand -> a single full-depth MXU
    # matmul instead of 9 tiny-K matmuls combined with VPU adds.
    for kh in range(3):
        for kw in range(3):
            k = kh * 3 + kw
            col_ref[:, k * cin:(k + 1) * cin] = (
                tap(kh, kw).astype(cdt).reshape(m, cin))

    acc = jnp.dot(col_ref[...], w_ref[...], preferred_element_type=jnp.float32)
    y_ref[0] = acc.astype(y_ref.dtype)
    # One-pass BN partials: per-channel sum and sum of squares (f32).
    st_ref[0, 0:1, :] = jnp.sum(acc, axis=0, keepdims=True)
    st_ref[0, 1:2, :] = jnp.sum(acc * acc, axis=0, keepdims=True)

    if has_proj:
        # Fused 1x1(/stride) projection shortcut: its single tap is already
        # resident in VMEM (interior of the padded scratch for stride 1,
        # phase (1,1) for stride 2).
        if stride == 1:
            t = pad_ref[1:1 + ho, 1:1 + wo, :]
        else:
            pr = 1 % stride
            off = 1 // stride
            t = x_ref[pr * stride + pr, off:off + ho, off:off + wo, :]
        accs = jnp.dot(t.astype(cdt).reshape(m, cin), ws_ref[...],
                       preferred_element_type=jnp.float32)
        ys_ref[0] = accs.astype(ys_ref.dtype)
        sts_ref[0, 0:1, :] = jnp.sum(accs, axis=0, keepdims=True)
        sts_ref[0, 1:2, :] = jnp.sum(accs * accs, axis=0, keepdims=True)


def conv_bn_stats(x, w, *, stride, ho, wo, in_scale=None, in_shift=None,
                  ws=None, compute_dtype=jnp.bfloat16):
    """3x3 conv with fused goodies.

    x: stride==1 -> raw [N, Ho, Wo, Cin] activation (padding done in VMEM);
       stride>1  -> phase-split [N*stride^2, Hh, Wh, Cin].
    w: [9*Cin, Cout].  in_scale/in_shift: fused BN+ReLU applied to the input
    block in-kernel (conv2 path).  ws: [Cin, Cout] fused 1x1 projection.
    Returns (y_raw [N, Ho*Wo, Cout] cdt, stats [N, 2, Cout] f32) and, if `ws`
    is given, the same pair for the projection shortcut.
    """
    apply_affine = in_scale is not None
    has_proj = ws is not None
    assert not (apply_affine and has_proj)
    assert not (apply_affine and stride != 1)
    cin = x.shape[-1]
    cout = w.shape[-1]
    assert w.shape[0] == 9 * cin
    cdt = jnp.dtype(compute_dtype)
    m = ho * wo

    if stride == 1:
        n = x.shape[0]
        assert x.shape[1:3] == (ho, wo)
        in_block = (1, ho, wo, cin)
    else:
        nphase = stride * stride
        n = x.shape[0] // nphase
        hh, wh = x.shape[1], x.shape[2]
        in_block = (nphase, hh, wh, cin)

    kernel = functools.partial(_conv3x3_kernel, stride=stride, ho=ho, wo=wo,
                               apply_affine=apply_affine, has_proj=has_proj)

    in_specs = [pl.BlockSpec(in_block, lambda i: (i, 0, 0, 0))]
    args = [x]
    if apply_affine:
        in_specs += [pl.BlockSpec((1, cin), lambda i: (0, 0)),
                     pl.BlockSpec((1, cin), lambda i: (0, 0))]
        args += [in_scale.astype(jnp.float32), in_shift.astype(jnp.float32)]
    in_specs.append(pl.BlockSpec((9 * cin, cout), lambda i: (0, 0)))
    args.append(w)
    if has_proj:
        in_specs.append(pl.BlockSpec((cin, cout), lambda i: (0, 0)))
        args.append(ws)

    out_shape = [jax.ShapeDtypeStruct((n, m, cout), cdt),
                 jax.ShapeDtypeStruct((n, 2, cout), jnp.float32)]
    out_specs = [pl.BlockSpec((1, m, cout), lambda i: (i, 0, 0)),
                 pl.BlockSpec((1, 2, cout), lambda i: (i, 0, 0))]
    if has_proj:
        out_shape += [jax.ShapeDtypeStruct((n, m, cout), cdt),
                      jax.ShapeDtypeStruct((n, 2, cout), jnp.float32)]
        out_specs += [pl.BlockSpec((1, m, cout), lambda i: (i, 0, 0)),
                      pl.BlockSpec((1, 2, cout), lambda i: (i, 0, 0))]

    scratch_shapes = []
    if stride == 1:
        scratch_shapes.append(pltpu.VMEM((ho + 2, wo + 2, cin), cdt))
    scratch_shapes.append(pltpu.VMEM((m, 9 * cin), cdt))

    in_bytes = sum(a.size * a.dtype.itemsize for a in args)
    out_bytes = sum(math.prod(s.shape) * jnp.dtype(s.dtype).itemsize
                    for s in out_shape)
    flops = 2 * n * m * cout * cin * (9 + (1 if has_proj else 0))

    return pl.pallas_call(
        kernel,
        grid=(n,),
        in_specs=in_specs,
        out_specs=out_specs,
        out_shape=out_shape,
        scratch_shapes=scratch_shapes,
        compiler_params=pltpu.CompilerParams(
            dimension_semantics=("parallel",),
            vmem_limit_bytes=_VMEM_LIMIT),
        cost_estimate=pl.CostEstimate(flops=int(flops), transcendentals=0,
                                      bytes_accessed=int(in_bytes + out_bytes)),
    )(*args)


# ---------------------------------------------------------------------------
# Kernel 2: lane-dense tiled elementwise epilogue
#           out = relu?( y*scale + shift [ + residual [*rscale + rshift] ] )
# Operates on (rows, Wo*C) views so loads/stores are lane-dense; math in f32.
# ---------------------------------------------------------------------------
def _affine_kernel(*refs, relu, res_mode):
    # res_mode: 0 = no residual, 1 = identity residual, 2 = BN-affine residual.
    if res_mode == 0:
        y_ref, sc_ref, sh_ref, o_ref = refs
    elif res_mode == 1:
        y_ref, sc_ref, sh_ref, r_ref, o_ref = refs
    else:
        y_ref, sc_ref, sh_ref, r_ref, rsc_ref, rsh_ref, o_ref = refs

    y = y_ref[...].astype(jnp.float32) * sc_ref[...] + sh_ref[...]
    if res_mode == 1:
        y = y + r_ref[...].astype(jnp.float32)
    elif res_mode == 2:
        y = y + (r_ref[...].astype(jnp.float32) * rsc_ref[...] + rsh_ref[...])
    if relu:
        y = jnp.maximum(y, 0.0)
    o_ref[...] = y.astype(o_ref.dtype)


def _pick_row_block(rows, max_rows):
    # Row block must be a multiple of 8 (sublane tiling) or the full dim.
    if rows <= max_rows:
        return rows
    for t in range(max_rows, 7, -1):
        if rows % t == 0 and t % 8 == 0:
            return t
    # TODO(synk): ragged last tile (pl.cdiv grid + in-kernel row guard) would
    # keep pipelining for awkward row counts; fall back to a single step.
    return rows


def bn_apply(y2d, scale_row, shift_row, *, relu, residual=None, res_scale=None,
             res_shift=None, out_dtype=jnp.float32, row_block=512):
    rows, cols = y2d.shape
    tr = _pick_row_block(rows, row_block)
    res_mode = 0 if residual is None else (1 if res_scale is None else 2)

    row_spec = pl.BlockSpec((tr, cols), lambda i: (i, 0))
    bcast_spec = pl.BlockSpec((1, cols), lambda i: (0, 0))

    in_specs = [row_spec, bcast_spec, bcast_spec]
    args = [y2d, scale_row, shift_row]
    if res_mode:
        in_specs.append(pl.BlockSpec((tr, cols), lambda i: (i, 0)))
        args.append(residual)
    if res_mode == 2:
        in_specs += [bcast_spec, bcast_spec]
        args += [res_scale, res_shift]

    kernel = functools.partial(_affine_kernel, relu=relu, res_mode=res_mode)
    return pl.pallas_call(
        kernel,
        grid=(rows // tr,),
        in_specs=in_specs,
        out_specs=pl.BlockSpec((tr, cols), lambda i: (i, 0)),
        out_shape=jax.ShapeDtypeStruct((rows, cols), out_dtype),
        compiler_params=pltpu.CompilerParams(
            dimension_semantics=("parallel",),
            vmem_limit_bytes=_VMEM_LIMIT),
    )(*args)


# ---------------------------------------------------------------------------
# JAX glue: phase split (stride>1 only), per-channel BN finalization.
# ---------------------------------------------------------------------------
def _make_phases(x_pad, stride, ho, wo, ksize=3):
    """[N, Hp, Wp, C] -> [N*stride^2, Hh, Wh, C] (pure data movement).

    Phase (ph, pw) holds x_pad[:, ph::stride, pw::stride, :]; a conv tap
    (kh, kw) with stride `stride` is then a unit-stride static window of
    phase (kh % stride, kw % stride) at offset (kh//stride, kw//stride).
    """
    n, hp, wp, c = x_pad.shape
    off = (ksize - 1) // stride
    hh, wh = ho + off, wo + off
    phases = []
    for ph in range(stride):
        for pw in range(stride):
            t = x_pad[:, ph::stride, pw::stride, :][:, :hh, :wh, :]
            dh, dw = hh - t.shape[1], wh - t.shape[2]
            if dh or dw:
                t = jnp.pad(t, ((0, 0), (0, dh), (0, dw), (0, 0)))
            phases.append(t)
    return jnp.stack(phases, axis=1).reshape(n * stride * stride, hh, wh, c)


def _bn_scale_shift(stats, gamma, beta, m, eps=EPS):
    """stats: [N, 2, C] partial (sum, sum_sq) -> per-channel (scale, shift)."""
    s = jnp.sum(stats[:, 0, :], axis=0)
    sq = jnp.sum(stats[:, 1, :], axis=0)
    mean = s / m
    # One-pass variance (clamped); fine for activation-scale data.
    var = jnp.maximum(sq / m - mean * mean, 0.0)
    scale = gamma.astype(jnp.float32) * jax.lax.rsqrt(var + eps)
    shift = beta.astype(jnp.float32) - mean * scale
    return scale, shift


def _tile_cols(v, wo):
    """Per-channel [C] vector -> lane-dense [1, Wo*C] row."""
    return jnp.tile(v, wo).reshape(1, -1)


def basic_block_forward(x, params, stride, *, compute_dtype=jnp.bfloat16,
                        row_block=512, eps=EPS):
    """x: [N, H, W, Cin] (NHWC, f32) -> [N, Ho, Wo, planes] (f32)."""
    n, h, w, cin = x.shape
    planes = params["w1"].shape[-1]
    ho = (h - 1) // stride + 1
    wo = (w - 1) // stride + 1
    m = n * ho * wo
    cd = compute_dtype
    has_proj = "ws" in params
    if not has_proj:
        assert stride == 1 and cin == planes, "identity shortcut needs matching shapes"

    w1 = params["w1"].reshape(9 * cin, planes).astype(cd)
    ws = params["ws"].reshape(cin, planes).astype(cd) if has_proj else None

    # --- conv1 (3x3, stride, pad=1) [+ fused 1x1 projection]: raw + stats
    if stride == 1:
        x1_in = x  # padding + dtype cast happen in VMEM inside the kernel
    else:
        xp = jnp.pad(x.astype(cd), ((0, 0), (1, 1), (1, 1), (0, 0)))
        x1_in = _make_phases(xp, stride, ho, wo)
    outs = conv_bn_stats(x1_in, w1, stride=stride, ho=ho, wo=wo, ws=ws,
                         compute_dtype=cd)
    if has_proj:
        y1, st1, ysc, stsc = outs
    else:
        y1, st1 = outs

    # --- conv2 (3x3, stride 1, pad=1) with BN1+ReLU fused onto its input
    sc1, sh1 = _bn_scale_shift(st1, params["g1"], params["b1"], m, eps)
    w2 = params["w2"].reshape(9 * planes, planes).astype(cd)
    y2, st2 = conv_bn_stats(y1.reshape(n, ho, wo, planes), w2, stride=1,
                            ho=ho, wo=wo,
                            in_scale=sc1.reshape(1, planes),
                            in_shift=sh1.reshape(1, planes),
                            compute_dtype=cd)
    sc2, sh2 = _bn_scale_shift(st2, params["g2"], params["b2"], m, eps)

    # --- epilogue: relu( BN2(conv2) + shortcut ), lane-dense row tiles
    y2_2d = y2.reshape(n * ho, wo * planes)
    if has_proj:
        scs, shs = _bn_scale_shift(stsc, params["gs"], params["bs"], m, eps)
        out2d = bn_apply(y2_2d, _tile_cols(sc2, wo), _tile_cols(sh2, wo),
                         relu=True,
                         residual=ysc.reshape(n * ho, wo * planes),
                         res_scale=_tile_cols(scs, wo),
                         res_shift=_tile_cols(shs, wo),
                         out_dtype=jnp.float32, row_block=row_block)
    else:
        out2d = bn_apply(y2_2d, _tile_cols(sc2, wo), _tile_cols(sh2, wo),
                         relu=True,
                         residual=x.reshape(n * ho, wo * planes),
                         out_dtype=jnp.float32, row_block=row_block)
    return out2d.reshape(n, ho, wo, planes)


# ---------------------------------------------------------------------------
# Pure-JAX reference (for correctness checks)
# ---------------------------------------------------------------------------
def ref_basic_block(x, params, stride, compute_dtype=jnp.float32, eps=EPS):
    cd = compute_dtype

    def conv(v, wk, s, p):
        return jax.lax.conv_general_dilated(
            v.astype(cd), wk.astype(cd), window_strides=(s, s),
            padding=[(p, p), (p, p)],
            dimension_numbers=("NHWC", "HWIO", "NHWC"),
            preferred_element_type=jnp.float32,
            precision=jax.lax.Precision.HIGHEST)

    def bn(y, g, b):
        mean = y.mean(axis=(0, 1, 2), keepdims=True)
        var = jnp.square(y - mean).mean(axis=(0, 1, 2), keepdims=True)
        return (y - mean) * jax.lax.rsqrt(var + eps) * g + b

    o = jax.nn.relu(bn(conv(x, params["w1"], stride, 1),
                       params["g1"], params["b1"]))
    o = bn(conv(o, params["w2"], 1, 1), params["g2"], params["b2"])
    if "ws" in params:
        s = bn(conv(x, params["ws"], stride, 0), params["gs"], params["bs"])
    else:
        s = x
    return jax.nn.relu(o + s)


# ---------------------------------------------------------------------------
# Deterministic parameter construction (shapes follow BasicBlock.__init__)
# ---------------------------------------------------------------------------
def make_params(key, in_planes, planes, stride):
    ks = jax.random.split(key, 9)
    p = {
        "w1": 0.1 * jax.random.normal(ks[0], (3, 3, in_planes, planes), jnp.float32),
        "g1": 1.0 + 0.1 * jax.random.normal(ks[1], (planes,), jnp.float32),
        "b1": 0.1 * jax.random.normal(ks[2], (planes,), jnp.float32),
        "w2": 0.1 * jax.random.normal(ks[3], (3, 3, planes, planes), jnp.float32),
        "g2": 1.0 + 0.1 * jax.random.normal(ks[4], (planes,), jnp.float32),
        "b2": 0.1 * jax.random.normal(ks[5], (planes,), jnp.float32),
    }
    if stride != 1 or in_planes != planes:
        p["ws"] = 0.1 * jax.random.normal(ks[6], (1, 1, in_planes, planes), jnp.float32)
        p["gs"] = 1.0 + 0.1 * jax.random.normal(ks[7], (planes,), jnp.float32)
        p["bs"] = 0.1 * jax.random.normal(ks[8], (planes,), jnp.float32)
    return p


def _check(x, params, stride, out_shape, compute_dtype, tol):
    fwd = jax.jit(functools.partial(basic_block_forward, stride=stride,
                                    compute_dtype=compute_dtype, row_block=8))
    out = jax.block_until_ready(fwd(x, params))
    ref = ref_basic_block(x, params, stride, compute_dtype=compute_dtype)
    assert out.shape == out_shape, out.shape
    err = float(jnp.max(jnp.abs(out - ref)))
    assert jnp.allclose(out, ref, atol=tol, rtol=tol), err
    return err


if __name__ == "__main__":
    key = jax.random.PRNGKey(0)
    kx, kp, kx2, kp2 = jax.random.split(key, 4)

    # Case 1: projection shortcut (stride=2, in_planes != planes).
    in_planes, planes, stride = 4, 8, 2
    x = jax.random.normal(kx, (2, 16, 16, in_planes), jnp.float32)
    params = make_params(kp, in_planes, planes, stride)
    _check(x, params, stride, (2, 8, 8, planes), jnp.bfloat16, 6e-2)  # perf dtype
    _check(x, params, stride, (2, 8, 8, planes), jnp.float32, 1e-2)   # exact semantics

    # Case 2: identity shortcut (stride=1, in_planes == planes).
    in_planes2, planes2, stride2 = 8, 8, 1
    x2 = jax.random.normal(kx2, (2, 16, 16, in_planes2), jnp.float32)
    params2 = make_params(kp2, in_planes2, planes2, stride2)
    _check(x2, params2, stride2, (2, 16, 16, planes2), jnp.bfloat16, 6e-2)
    _check(x2, params2, stride2, (2, 16, 16, planes2), jnp.float32, 1e-2)

    print("KERNEL_OK")
</pallas_src>

<mosaic_0001>
module attributes {stable_mosaic.version = 11 : i64} {
  func.func @_conv3x3_kernel(%arg0: i32, %arg1: memref<4x9x9x4xbf16, #tpu.memory_space<vmem>>, %arg2: memref<36x8xbf16, #tpu.memory_space<vmem>>, %arg3: memref<4x8xbf16, #tpu.memory_space<vmem>>, %arg4: memref<1x64x8xbf16, #tpu.memory_space<vmem>>, %arg5: memref<1x2x8xf32, #tpu.memory_space<vmem>>, %arg6: memref<1x64x8xbf16, #tpu.memory_space<vmem>>, %arg7: memref<1x2x8xf32, #tpu.memory_space<vmem>>, %arg8: memref<64x36xbf16, #tpu.memory_space<vmem>>) attributes {dimension_semantics = [#tpu.dimension_semantics<parallel>], iteration_bounds = array<i64: 2>, scalar_prefetch = 0 : i64, scratch_operands = 1 : i64, tpu.core_type = #tpu.core_type<tc>, window_params = [{transform_indices = @transform_0, window_bounds = array<i64: 4, 9, 9, 4>}, {pipeline_mode = #tpu.pipeline_mode<synchronous>, transform_indices = @transform_1, window_bounds = array<i64: 36, 8>}, {pipeline_mode = #tpu.pipeline_mode<synchronous>, transform_indices = @transform_2, window_bounds = array<i64: 4, 8>}, {transform_indices = @transform_3, window_bounds = array<i64: 1, 64, 8>}, {transform_indices = @transform_4, window_bounds = array<i64: 1, 2, 8>}, {transform_indices = @transform_5, window_bounds = array<i64: 1, 64, 8>}, {transform_indices = @transform_6, window_bounds = array<i64: 1, 2, 8>}]} {
    %c0 = arith.constant 0 : index
    %c0_0 = arith.constant 0 : index
    %c0_1 = arith.constant 0 : index
    %c0_2 = arith.constant 0 : index
    %0 = vector.load %arg1[%c0, %c0_0, %c0_1, %c0_2] : memref<4x9x9x4xbf16, #tpu.memory_space<vmem>>, vector<1x8x8x4xbf16>
    %1 = vector.shape_cast %0 : vector<1x8x8x4xbf16> to vector<8x8x4xbf16>
    %2 = vector.shape_cast %1 : vector<8x8x4xbf16> to vector<64x4xbf16>
    %c0_3 = arith.constant 0 : index
    %c0_4 = arith.constant 0 : index
    %3 = vector.load %arg8[%c0_3, %c0_4] : memref<64x36xbf16, #tpu.memory_space<vmem>>, vector<64x4xbf16>
    tpu.vector_store %arg8[%c0_3, %c0_4], %2 {strides = array<i32>} : memref<64x36xbf16, #tpu.memory_space<vmem>>, vector<64x4xbf16>,
    %c1 = arith.constant 1 : index
    %c0_5 = arith.constant 0 : index
    %c0_6 = arith.constant 0 : index
    %c0_7 = arith.constant 0 : index
    %4 = vector.load %arg1[%c1, %c0_5, %c0_6, %c0_7] : memref<4x9x9x4xbf16, #tpu.memory_space<vmem>>, vector<1x8x8x4xbf16>
    %5 = vector.shape_cast %4 : vector<1x8x8x4xbf16> to vector<8x8x4xbf16>
    %6 = vector.shape_cast %5 : vector<8x8x4xbf16> to vector<64x4xbf16>
    %c0_8 = arith.constant 0 : index
    %c4 = arith.constant 4 : index
    %7 = vector.load %arg8[%c0_8, %c4] : memref<64x36xbf16, #tpu.memory_space<vmem>>, vector<64x4xbf16>
    tpu.vector_store %arg8[%c0_8, %c4], %6 {strides = array<i32>} : memref<64x36xbf16, #tpu.memory_space<vmem>>, vector<64x4xbf16>,
    %c0_9 = arith.constant 0 : index
    %c0_10 = arith.constant 0 : index
    %c1_11 = arith.constant 1 : index
    %c0_12 = arith.constant 0 : index
    %8 = vector.load %arg1[%c0_9, %c0_10, %c1_11, %c0_12] : memref<4x9x9x4xbf16, #tpu.memory_space<vmem>>, vector<1x8x8x4xbf16>
    %9 = vector.shape_cast %8 : vector<1x8x8x4xbf16> to vector<8x8x4xbf16>
    %10 = vector.shape_cast %9 : vector<8x8x4xbf16> to vector<64x4xbf16>
    %c0_13 = arith.constant 0 : index
    %c8 = arith.constant 8 : index
    %11 = vector.load %arg8[%c0_13, %c8] : memref<64x36xbf16, #tpu.memory_space<vmem>>, vector<64x4xbf16>
    tpu.vector_store %arg8[%c0_13, %c8], %10 {strides = array<i32>} : memref<64x36xbf16, #tpu.memory_space<vmem>>, vector<64x4xbf16>,
    %c2 = arith.constant 2 : index
    %c0_14 = arith.constant 0 : index
    %c0_15 = arith.constant 0 : index
    %c0_16 = arith.constant 0 : index
    %12 = vector.load %arg1[%c2, %c0_14, %c0_15, %c0_16] : memref<4x9x9x4xbf16, #tpu.memory_space<vmem>>, vector<1x8x8x4xbf16>
    %13 = vector.shape_cast %12 : vector<1x8x8x4xbf16> to vector<8x8x4xbf16>
    %14 = vector.shape_cast %13 : vector<8x8x4xbf16> to vector<64x4xbf16>
    %c0_17 = arith.constant 0 : index
    %c12 = arith.constant 12 : index
    %15 = vector.load %arg8[%c0_17, %c12] : memref<64x36xbf16, #tpu.memory_space<vmem>>, vector<64x4xbf16>
    tpu.vector_store %arg8[%c0_17, %c12], %14 {strides = array<i32>} : memref<64x36xbf16, #tpu.memory_space<vmem>>, vector<64x4xbf16>,
    %c3 = arith.constant 3 : index
    %c0_18 = arith.constant 0 : index
    %c0_19 = arith.constant 0 : index
    %c0_20 = arith.constant 0 : index
    %16 = vector.load %arg1[%c3, %c0_18, %c0_19, %c0_20] : memref<4x9x9x4xbf16, #tpu.memory_space<vmem>>, vector<1x8x8x4xbf16>
    %17 = vector.shape_cast %16 : vector<1x8x8x4xbf16> to vector<8x8x4xbf16>
    %18 = vector.shape_cast %17 : vector<8x8x4xbf16> to vector<64x4xbf16>
    %c0_21 = arith.constant 0 : index
    %c16 = arith.constant 16 : index
    %19 = vector.load %arg8[%c0_21, %c16] : memref<64x36xbf16, #tpu.memory_space<vmem>>, vector<64x4xbf16>
    tpu.vector_store %arg8[%c0_21, %c16], %18 {strides = array<i32>} : memref<64x36xbf16, #tpu.memory_space<vmem>>, vector<64x4xbf16>,
    %c2_22 = arith.constant 2 : index
    %c0_23 = arith.constant 0 : index
    %c1_24 = arith.constant 1 : index
    %c0_25 = arith.constant 0 : index
    %20 = vector.load %arg1[%c2_22, %c0_23, %c1_24, %c0_25] : memref<4x9x9x4xbf16, #tpu.memory_space<vmem>>, vector<1x8x8x4xbf16>
    %21 = vector.shape_cast %20 : vector<1x8x8x4xbf16> to vector<8x8x4xbf16>
    %22 = vector.shape_cast %21 : vector<8x8x4xbf16> to vector<64x4xbf16>
    %c0_26 = arith.constant 0 : index
    %c20 = arith.constant 20 : index
    %23 = vector.load %arg8[%c0_26, %c20] : memref<64x36xbf16, #tpu.memory_space<vmem>>, vector<64x4xbf16>
    tpu.vector_store %arg8[%c0_26, %c20], %22 {strides = array<i32>} : memref<64x36xbf16, #tpu.memory_space<vmem>>, vector<64x4xbf16>,
    %c0_27 = arith.constant 0 : index
    %c1_28 = arith.constant 1 : index
    %c0_29 = arith.constant 0 : index
    %c0_30 = arith.constant 0 : index
    %24 = vector.load %arg1[%c0_27, %c1_28, %c0_29, %c0_30] : memref<4x9x9x4xbf16, #tpu.memory_space<vmem>>, vector<1x8x8x4xbf16>
    %25 = vector.shape_cast %24 : vector<1x8x8x4xbf16> to vector<8x8x4xbf16>
    %26 = vector.shape_cast %25 : vector<8x8x4xbf16> to vector<64x4xbf16>
    %c0_31 = arith.constant 0 : index
    %c24 = arith.constant 24 : index
    %27 = vector.load %arg8[%c0_31, %c24] : memref<64x36xbf16, #tpu.memory_space<vmem>>, vector<64x4xbf16>
    tpu.vector_store %arg8[%c0_31, %c24], %26 {strides = array<i32>} : memref<64x36xbf16, #tpu.memory_space<vmem>>, vector<64x4xbf16>,
    %c1_32 = arith.constant 1 : index
    %c1_33 = arith.constant 1 : index
    %c0_34 = arith.constant 0 : index
    %c0_35 = arith.constant 0 : index
    %28 = vector.load %arg1[%c1_32, %c1_33, %c0_34, %c0_35] : memref<4x9x9x4xbf16, #tpu.memory_space<vmem>>, vector<1x8x8x4xbf16>
    %29 = vector.shape_cast %28 : vector<1x8x8x4xbf16> to vector<8x8x4xbf16>
    %30 = vector.shape_cast %29 : vector<8x8x4xbf16> to vector<64x4xbf16>
    %c0_36 = arith.constant 0 : index
    %c28 = arith.constant 28 : index
    %31 = vector.load %arg8[%c0_36, %c28] : memref<64x36xbf16, #tpu.memory_space<vmem>>, vector<64x4xbf16>
    tpu.vector_store %arg8[%c0_36, %c28], %30 {strides = array<i32>} : memref<64x36xbf16, #tpu.memory_space<vmem>>, vector<64x4xbf16>,
    %c0_37 = arith.constant 0 : index
    %c1_38 = arith.constant 1 : index
    %c1_39 = arith.constant 1 : index
    %c0_40 = arith.constant 0 : index
    %32 = vector.load %arg1[%c0_37, %c1_38, %c1_39, %c0_40] : memref<4x9x9x4xbf16, #tpu.memory_space<vmem>>, vector<1x8x8x4xbf16>
    %33 = vector.shape_cast %32 : vector<1x8x8x4xbf16> to vector<8x8x4xbf16>
    %34 = vector.shape_cast %33 : vector<8x8x4xbf16> to vector<64x4xbf16>
    %c0_41 = arith.constant 0 : index
    %c32 = arith.constant 32 : index
    %35 = vector.load %arg8[%c0_41, %c32] : memref<64x36xbf16, #tpu.memory_space<vmem>>, vector<64x4xbf16>
    tpu.vector_store %arg8[%c0_41, %c32], %34 {strides = array<i32>} : memref<64x36xbf16, #tpu.memory_space<vmem>>, vector<64x4xbf16>,
    %c0_42 = arith.constant 0 : index
    %c0_43 = arith.constant 0 : index
    %36 = vector.load %arg8[%c0_42, %c0_43] : memref<64x36xbf16, #tpu.memory_space<vmem>>, vector<64x36xbf16>
    %c0_44 = arith.constant 0 : index
    %c0_45 = arith.constant 0 : index
    %37 = vector.load %arg2[%c0_44, %c0_45] : memref<36x8xbf16, #tpu.memory_space<vmem>>, vector<36x8xbf16>
    %cst = arith.constant dense<0.000000e+00> : vector<64x8xf32>
    %38 = tpu.matmul %36, %37, %cst {dimension_numbers = #tpu.dot_dimension_numbers<[1], [0], [0], [1], [0, 0, 1, 1], [], []>} : vector<64x36xbf16>, vector<36x8xbf16>, vector<64x8xf32> -> vector<64x8xf32>
    %39 = arith.truncf %38 : vector<64x8xf32> to vector<64x8xbf16>
    %c0_46 = arith.constant 0 : index
    %c0_47 = arith.constant 0 : index
    %c0_48 = arith.constant 0 : index
    %40 = vector.load %arg4[%c0_46, %c0_47, %c0_48] : memref<1x64x8xbf16, #tpu.memory_space<vmem>>, vector<1x64x8xbf16>
    %41 = vector.shape_cast %40 : vector<1x64x8xbf16> to vector<64x8xbf16>
    %42 = vector.shape_cast %39 : vector<64x8xbf16> to vector<1x64x8xbf16>
    tpu.vector_store %arg4[%c0_46, %c0_47, %c0_48], %42 {strides = array<i32>} : memref<1x64x8xbf16, #tpu.memory_space<vmem>>, vector<1x64x8xbf16>,
    %cst_49 = arith.constant dense<0.000000e+00> : vector<8xf32>
    %43 = vector.multi_reduction <add>, %38, %cst_49 [0] : vector<64x8xf32> to vector<8xf32>
    %44 = vector.shape_cast %43 : vector<8xf32> to vector<1x8xf32>
    %c0_50 = arith.constant 0 : index
    %c0_51 = arith.constant 0 : index
    %c0_52 = arith.constant 0 : index
    %45 = vector.load %arg5[%c0_50, %c0_51, %c0_52] : memref<1x2x8xf32, #tpu.memory_space<vmem>>, vector<1x1x8xf32>
    %46 = vector.shape_cast %45 : vector<1x1x8xf32> to vector<1x8xf32>
    %47 = vector.shape_cast %44 : vector<1x8xf32> to vector<1x1x8xf32>
    tpu.vector_store %arg5[%c0_50, %c0_51, %c0_52], %47 {strides = array<i32>} : memref<1x2x8xf32, #tpu.memory_space<vmem>>, vector<1x1x8xf32>,
    %48 = arith.mulf %38, %38 : vector<64x8xf32>
    %cst_53 = arith.constant dense<0.000000e+00> : vector<8xf32>
    %49 = vector.multi_reduction <add>, %48, %cst_53 [0] : vector<64x8xf32> to vector<8xf32>
    %50 = vector.shape_cast %49 : vector<8xf32> to vector<1x8xf32>
    %c0_54 = arith.constant 0 : index
    %c1_55 = arith.constant 1 : index
    %c0_56 = arith.constant 0 : index
    %51 = vector.load %arg5[%c0_54, %c1_55, %c0_56] : memref<1x2x8xf32, #tpu.memory_space<vmem>>, vector<1x1x8xf32>
    %52 = vector.shape_cast %51 : vector<1x1x8xf32> to vector<1x8xf32>
    %53 = vector.shape_cast %50 : vector<1x8xf32> to vector<1x1x8xf32>
    tpu.vector_store %arg5[%c0_54, %c1_55, %c0_56], %53 {strides = array<i32>} : memref<1x2x8xf32, #tpu.memory_space<vmem>>, vector<1x1x8xf32>,
    %c3_57 = arith.constant 3 : index
    %c0_58 = arith.constant 0 : index
    %c0_59 = arith.constant 0 : index
    %c0_60 = arith.constant 0 : index
    %54 = vector.load %arg1[%c3_57, %c0_58, %c0_59, %c0_60] : memref<4x9x9x4xbf16, #tpu.memory_space<vmem>>, vector<1x8x8x4xbf16>
    %55 = vector.shape_cast %54 : vector<1x8x8x4xbf16> to vector<8x8x4xbf16>
    %56 = vector.shape_cast %55 : vector<8x8x4xbf16> to vector<64x4xbf16>
    %c0_61 = arith.constant 0 : index
    %c0_62 = arith.constant 0 : index
    %57 = vector.load %arg3[%c0_61, %c0_62] : memref<4x8xbf16, #tpu.memory_space<vmem>>, vector<4x8xbf16>
    %cst_63 = arith.constant dense<0.000000e+00> : vector<64x8xf32>
    %58 = tpu.matmul %56, %57, %cst_63 {dimension_numbers = #tpu.dot_dimension_numbers<[1], [0], [0], [1], [0, 0, 1, 1], [], []>} : vector<64x4xbf16>, vector<4x8xbf16>, vector<64x8xf32> -> vector<64x8xf32>
    %59 = arith.truncf %58 : vector<64x8xf32> to vector<64x8xbf16>
    %c0_64 = arith.constant 0 : index
    %c0_65 = arith.constant 0 : index
    %c0_66 = arith.constant 0 : index
    %60 = vector.load %arg6[%c0_64, %c0_65, %c0_66] : memref<1x64x8xbf16, #tpu.memory_space<vmem>>, vector<1x64x8xbf16>
    %61 = vector.shape_cast %60 : vector<1x64x8xbf16> to vector<64x8xbf16>
    %62 = vector.shape_cast %59 : vector<64x8xbf16> to vector<1x64x8xbf16>
    tpu.vector_store %arg6[%c0_64, %c0_65, %c0_66], %62 {strides = array<i32>} : memref<1x64x8xbf16, #tpu.memory_space<vmem>>, vector<1x64x8xbf16>,
    %cst_67 = arith.constant dense<0.000000e+00> : vector<8xf32>
    %63 = vector.multi_reduction <add>, %58, %cst_67 [0] : vector<64x8xf32> to vector<8xf32>
    %64 = vector.shape_cast %63 : vector<8xf32> to vector<1x8xf32>
    %c0_68 = arith.constant 0 : index
    %c0_69 = arith.constant 0 : index
    %c0_70 = arith.constant 0 : index
    %65 = vector.load %arg7[%c0_68, %c0_69, %c0_70] : memref<1x2x8xf32, #tpu.memory_space<vmem>>, vector<1x1x8xf32>
    %66 = vector.shape_cast %65 : vector<1x1x8xf32> to vector<1x8xf32>
    %67 = vector.shape_cast %64 : vector<1x8xf32> to vector<1x1x8xf32>
    tpu.vector_store %arg7[%c0_68, %c0_69, %c0_70], %67 {strides = array<i32>} : memref<1x2x8xf32, #tpu.memory_space<vmem>>, vector<1x1x8xf32>,
    %68 = arith.mulf %58, %58 : vector<64x8xf32>
    %cst_71 = arith.constant dense<0.000000e+00> : vector<8xf32>
    %69 = vector.multi_reduction <add>, %68, %cst_71 [0] : vector<64x8xf32> to vector<8xf32>
    %70 = vector.shape_cast %69 : vector<8xf32> to vector<1x8xf32>
    %c0_72 = arith.constant 0 : index
    %c1_73 = arith.constant 1 : index
    %c0_74 = arith.constant 0 : index
    %71 = vector.load %arg7[%c0_72, %c1_73, %c0_74] : memref<1x2x8xf32, #tpu.memory_space<vmem>>, vector<1x1x8xf32>
    %72 = vector.shape_cast %71 : vector<1x1x8xf32> to vector<1x8xf32>
    %73 = vector.shape_cast %70 : vector<1x8xf32> to vector<1x1x8xf32>
    tpu.vector_store %arg7[%c0_72, %c1_73, %c0_74], %73 {strides = array<i32>} : memref<1x2x8xf32, #tpu.memory_space<vmem>>, vector<1x1x8xf32>,
    return
  }
  func.func @transform_0(%arg0: i32) -> (i32, i32, i32, i32) {
    %c0_i32 = arith.constant 0 : i32
    %c0_i32_0 = arith.constant 0 : i32
    %c0_i32_1 = arith.constant 0 : i32
    %c0_i32_2 = arith.constant 0 : i32
    return %arg0, %c0_i32, %c0_i32_0, %c0_i32_1 : i32, i32, i32, i32
  }
  func.func @transform_1(%arg0: i32) -> (i32, i32) {
    %c0_i32 = arith.constant 0 : i32
    %c0_i32_0 = arith.constant 0 : i32
    %c0_i32_1 = arith.constant 0 : i32
    return %c0_i32, %c0_i32_0 : i32, i32
  }
  func.func @transform_2(%arg0: i32) -> (i32, i32) {
    %c0_i32 = arith.constant 0 : i32
    %c0_i32_0 = arith.constant 0 : i32
    %c0_i32_1 = arith.constant 0 : i32
    return %c0_i32, %c0_i32_0 : i32, i32
  }
  func.func @transform_3(%arg0: i32) -> (i32, i32, i32) {
    %c0_i32 = arith.constant 0 : i32
    %c0_i32_0 = arith.constant 0 : i32
    %c0_i32_1 = arith.constant 0 : i32
    return %arg0, %c0_i32, %c0_i32_0 : i32, i32, i32
  }
  func.func @transform_4(%arg0: i32) -> (i32, i32, i32) {
    %c0_i32 = arith.constant 0 : i32
    %c0_i32_0 = arith.constant 0 : i32
    %c0_i32_1 = arith.constant 0 : i32
    return %arg0, %c0_i32, %c0_i32_0 : i32, i32, i32
  }
  func.func @transform_5(%arg0: i32) -> (i32, i32, i32) {
    %c0_i32 = arith.constant 0 : i32
    %c0_i32_0 = arith.constant 0 : i32
    %c0_i32_1 = arith.constant 0 : i32
    return %arg0, %c0_i32, %c0_i32_0 : i32, i32, i32
  }
  func.func @transform_6(%arg0: i32) -> (i32, i32, i32) {
    %c0_i32 = arith.constant 0 : i32
    %c0_i32_0 = arith.constant 0 : i32
    %c0_i32_1 = arith.constant 0 : i32
    return %arg0, %c0_i32, %c0_i32_0 : i32, i32, i32
  }
}

module attributes {stable_mosaic.version = 11 : i64} {
  func.func @_conv3x3_kernel(%arg0: i32, %arg1: memref<1x8x8x8xbf16, #tpu.memory_space<vmem>>, %arg2: memref<1x8xf32, #tpu.memory_space<vmem>>, %arg3: memref<1x8xf32, #tpu.memory_space<vmem>>, %arg4: memref<72x8xbf16, #tpu.memory_space<vmem>>, %arg5: memref<1x64x8xbf16, #tpu.memory_space<vmem>>, %arg6: memref<1x2x8xf32, #tpu.memory_space<vmem>>, %arg7: memref<10x10x8xbf16, #tpu.memory_space<vmem>>, %arg8: memref<64x72xbf16, #tpu.memory_space<vmem>>) attributes {dimension_semantics = [#tpu.dimension_semantics<parallel>], iteration_bounds = array<i64: 2>, scalar_prefetch = 0 : i64, scratch_operands = 2 : i64, tpu.core_type = #tpu.core_type<tc>, window_params = [{transform_indices = @transform_0, window_bounds = array<i64: 1, 8, 8, 8>}, {pipeline_mode = #tpu.pipeline_mode<synchronous>, transform_indices = @transform_1, window_bounds = array<i64: 1, 8>}, {pipeline_mode = #tpu.pipeline_mode<synchronous>, transform_indices = @transform_2, window_bounds = array<i64: 1, 8>}, {pipeline_mode = #tpu.pipeline_mode<synchronous>, transform_indices = @transform_3, window_bounds = array<i64: 72, 8>}, {transform_indices = @transform_4, window_bounds = array<i64: 1, 64, 8>}, {transform_indices = @transform_5, window_bounds = array<i64: 1, 2, 8>}]} {
    %c0 = arith.constant 0 : index
    %c0_0 = arith.constant 0 : index
    %c0_1 = arith.constant 0 : index
    %c0_2 = arith.constant 0 : index
    %0 = vector.load %arg1[%c0, %c0_0, %c0_1, %c0_2] : memref<1x8x8x8xbf16, #tpu.memory_space<vmem>>, vector<1x8x8x8xbf16>
    %1 = vector.shape_cast %0 : vector<1x8x8x8xbf16> to vector<8x8x8xbf16>
    %2 = arith.extf %1 : vector<8x8x8xbf16> to vector<8x8x8xf32>
    %c0_3 = arith.constant 0 : index
    %c0_4 = arith.constant 0 : index
    %3 = vector.load %arg2[%c0_3, %c0_4] : memref<1x8xf32, #tpu.memory_space<vmem>>, vector<1x8xf32>
    %4 = vector.shape_cast %3 : vector<1x8xf32> to vector<1x1x8xf32>
    %c0_5 = arith.constant 0 : index
    %c0_6 = arith.constant 0 : index
    %5 = vector.load %arg3[%c0_5, %c0_6] : memref<1x8xf32, #tpu.memory_space<vmem>>, vector<1x8xf32>
    %6 = vector.shape_cast %5 : vector<1x8xf32> to vector<1x1x8xf32>
    %7 = vector.broadcast %4 : vector<1x1x8xf32> to vector<8x8x8xf32>
    %8 = arith.mulf %2, %7 : vector<8x8x8xf32>
    %9 = vector.broadcast %6 : vector<1x1x8xf32> to vector<8x8x8xf32>
    %10 = arith.addf %8, %9 : vector<8x8x8xf32>
    %cst = arith.constant 0.000000e+00 : f32
    %11 = vector.broadcast %cst : f32 to vector<8x8x8xf32>
    %12 = arith.maximumf %10, %11 : vector<8x8x8xf32>
    %cst_7 = arith.constant 0.000000e+00 : bf16
    %13 = vector.broadcast %cst_7 : bf16 to vector<10x10x8xbf16>
    %c0_8 = arith.constant 0 : index
    %c0_9 = arith.constant 0 : index
    %c0_10 = arith.constant 0 : index
    %14 = vector.load %arg7[%c0_8, %c0_9, %c0_10] : memref<10x10x8xbf16, #tpu.memory_space<vmem>>, vector<10x10x8xbf16>
    tpu.vector_store %arg7[%c0_8, %c0_9, %c0_10], %13 {strides = array<i32>} : memref<10x10x8xbf16, #tpu.memory_space<vmem>>, vector<10x10x8xbf16>,
    %15 = arith.truncf %12 : vector<8x8x8xf32> to vector<8x8x8xbf16>
    %c1 = arith.constant 1 : index
    %c1_11 = arith.constant 1 : index
    %c0_12 = arith.constant 0 : index
    %16 = vector.load %arg7[%c1, %c1_11, %c0_12] : memref<10x10x8xbf16, #tpu.memory_space<vmem>>, vector<8x8x8xbf16>
    tpu.vector_store %arg7[%c1, %c1_11, %c0_12], %15 {strides = array<i32>} : memref<10x10x8xbf16, #tpu.memory_space<vmem>>, vector<8x8x8xbf16>,
    %c0_13 = arith.constant 0 : index
    %c0_14 = arith.constant 0 : index
    %c0_15 = arith.constant 0 : index
    %17 = vector.load %arg7[%c0_13, %c0_14, %c0_15] : memref<10x10x8xbf16, #tpu.memory_space<vmem>>, vector<8x8x8xbf16>
    %18 = vector.shape_cast %17 : vector<8x8x8xbf16> to vector<64x8xbf16>
    %c0_16 = arith.constant 0 : index
    %c0_17 = arith.constant 0 : index
    %19 = vector.load %arg8[%c0_16, %c0_17] : memref<64x72xbf16, #tpu.memory_space<vmem>>, vector<64x8xbf16>
    tpu.vector_store %arg8[%c0_16, %c0_17], %18 {strides = array<i32>} : memref<64x72xbf16, #tpu.memory_space<vmem>>, vector<64x8xbf16>,
    %c0_18 = arith.constant 0 : index
    %c1_19 = arith.constant 1 : index
    %c0_20 = arith.constant 0 : index
    %20 = vector.load %arg7[%c0_18, %c1_19, %c0_20] : memref<10x10x8xbf16, #tpu.memory_space<vmem>>, vector<8x8x8xbf16>
    %21 = vector.shape_cast %20 : vector<8x8x8xbf16> to vector<64x8xbf16>
    %c0_21 = arith.constant 0 : index
    %c8 = arith.constant 8 : index
    %22 = vector.load %arg8[%c0_21, %c8] : memref<64x72xbf16, #tpu.memory_space<vmem>>, vector<64x8xbf16>
    tpu.vector_store %arg8[%c0_21, %c8], %21 {strides = array<i32>} : memref<64x72xbf16, #tpu.memory_space<vmem>>, vector<64x8xbf16>,
    %c0_22 = arith.constant 0 : index
    %c2 = arith.constant 2 : index
    %c0_23 = arith.constant 0 : index
    %23 = vector.load %arg7[%c0_22, %c2, %c0_23] : memref<10x10x8xbf16, #tpu.memory_space<vmem>>, vector<8x8x8xbf16>
    %24 = vector.shape_cast %23 : vector<8x8x8xbf16> to vector<64x8xbf16>
    %c0_24 = arith.constant 0 : index
    %c16 = arith.constant 16 : index
    %25 = vector.load %arg8[%c0_24, %c16] : memref<64x72xbf16, #tpu.memory_space<vmem>>, vector<64x8xbf16>
    tpu.vector_store %arg8[%c0_24, %c16], %24 {strides = array<i32>} : memref<64x72xbf16, #tpu.memory_space<vmem>>, vector<64x8xbf16>,
    %c1_25 = arith.constant 1 : index
    %c0_26 = arith.constant 0 : index
    %c0_27 = arith.constant 0 : index
    %26 = vector.load %arg7[%c1_25, %c0_26, %c0_27] : memref<10x10x8xbf16, #tpu.memory_space<vmem>>, vector<8x8x8xbf16>
    %27 = vector.shape_cast %26 : vector<8x8x8xbf16> to vector<64x8xbf16>
    %c0_28 = arith.constant 0 : index
    %c24 = arith.constant 24 : index
    %28 = vector.load %arg8[%c0_28, %c24] : memref<64x72xbf16, #tpu.memory_space<vmem>>, vector<64x8xbf16>
    tpu.vector_store %arg8[%c0_28, %c24], %27 {strides = array<i32>} : memref<64x72xbf16, #tpu.memory_space<vmem>>, vector<64x8xbf16>,
    %c1_29 = arith.constant 1 : index
    %c1_30 = arith.constant 1 : index
    %c0_31 = arith.constant 0 : index
    %29 = vector.load %arg7[%c1_29, %c1_30, %c0_31] : memref<10x10x8xbf16, #tpu.memory_space<vmem>>, vector<8x8x8xbf16>
    %30 = vector.shape_cast %29 : vector<8x8x8xbf16> to vector<64x8xbf16>
    %c0_32 = arith.constant 0 : index
    %c32 = arith.constant 32 : index
    %31 = vector.load %arg8[%c0_32, %c32] : memref<64x72xbf16, #tpu.memory_space<vmem>>, vector<64x8xbf16>
    tpu.vector_store %arg8[%c0_32, %c32], %30 {strides = array<i32>} : memref<64x72xbf16, #tpu.memory_space<vmem>>, vector<64x8xbf16>,
    %c1_33 = arith.constant 1 : index
    %c2_34 = arith.constant 2 : index
    %c0_35 = arith.constant 0 : index
    %32 = vector.load %arg7[%c1_33, %c2_34, %c0_35] : memref<10x10x8xbf16, #tpu.memory_space<vmem>>, vector<8x8x8xbf16>
    %33 = vector.shape_cast %32 : vector<8x8x8xbf16> to vector<64x8xbf16>
    %c0_36 = arith.constant 0 : index
    %c40 = arith.constant 40 : index
    %34 = vector.load %arg8[%c0_36, %c40] : memref<64x72xbf16, #tpu.memory_space<vmem>>, vector<64x8xbf16>
    tpu.vector_store %arg8[%c0_36, %c40], %33 {strides = array<i32>} : memref<64x72xbf16, #tpu.memory_space<vmem>>, vector<64x8xbf16>,
    %c2_37 = arith.constant 2 : index
    %c0_38 = arith.constant 0 : index
    %c0_39 = arith.constant 0 : index
    %35 = vector.load %arg7[%c2_37, %c0_38, %c0_39] : memref<10x10x8xbf16, #tpu.memory_space<vmem>>, vector<8x8x8xbf16>
    %36 = vector.shape_cast %35 : vector<8x8x8xbf16> to vector<64x8xbf16>
    %c0_40 = arith.constant 0 : index
    %c48 = arith.constant 48 : index
    %37 = vector.load %arg8[%c0_40, %c48] : memref<64x72xbf16, #tpu.memory_space<vmem>>, vector<64x8xbf16>
    tpu.vector_store %arg8[%c0_40, %c48], %36 {strides = array<i32>} : memref<64x72xbf16, #tpu.memory_space<vmem>>, vector<64x8xbf16>,
    %c2_41 = arith.constant 2 : index
    %c1_42 = arith.constant 1 : index
    %c0_43 = arith.constant 0 : index
    %38 = vector.load %arg7[%c2_41, %c1_42, %c0_43] : memref<10x10x8xbf16, #tpu.memory_space<vmem>>, vector<8x8x8xbf16>
    %39 = vector.shape_cast %38 : vector<8x8x8xbf16> to vector<64x8xbf16>
    %c0_44 = arith.constant 0 : index
    %c56 = arith.constant 56 : index
    %40 = vector.load %arg8[%c0_44, %c56] : memref<64x72xbf16, #tpu.memory_space<vmem>>, vector<64x8xbf16>
    tpu.vector_store %arg8[%c0_44, %c56], %39 {strides = array<i32>} : memref<64x72xbf16, #tpu.memory_space<vmem>>, vector<64x8xbf16>,
    %c2_45 = arith.constant 2 : index
    %c2_46 = arith.constant 2 : index
    %c0_47 = arith.constant 0 : index
    %41 = vector.load %arg7[%c2_45, %c2_46, %c0_47] : memref<10x10x8xbf16, #tpu.memory_space<vmem>>, vector<8x8x8xbf16>
    %42 = vector.shape_cast %41 : vector<8x8x8xbf16> to vector<64x8xbf16>
    %c0_48 = arith.constant 0 : index
    %c64 = arith.constant 64 : index
    %43 = vector.load %arg8[%c0_48, %c64] : memref<64x72xbf16, #tpu.memory_space<vmem>>, vector<64x8xbf16>
    tpu.vector_store %arg8[%c0_48, %c64], %42 {strides = array<i32>} : memref<64x72xbf16, #tpu.memory_space<vmem>>, vector<64x8xbf16>,
    %c0_49 = arith.constant 0 : index
    %c0_50 = arith.constant 0 : index
    %44 = vector.load %arg8[%c0_49, %c0_50] : memref<64x72xbf16, #tpu.memory_space<vmem>>, vector<64x72xbf16>
    %c0_51 = arith.constant 0 : index
    %c0_52 = arith.constant 0 : index
    %45 = vector.load %arg4[%c0_51, %c0_52] : memref<72x8xbf16, #tpu.memory_space<vmem>>, vector<72x8xbf16>
    %cst_53 = arith.constant dense<0.000000e+00> : vector<64x8xf32>
    %46 = tpu.matmul %44, %45, %cst_53 {dimension_numbers = #tpu.dot_dimension_numbers<[1], [0], [0], [1], [0, 0, 1, 1], [], []>} : vector<64x72xbf16>, vector<72x8xbf16>, vector<64x8xf32> -> vector<64x8xf32>
    %47 = arith.truncf %46 : vector<64x8xf32> to vector<64x8xbf16>
    %c0_54 = arith.constant 0 : index
    %c0_55 = arith.constant 0 : index
    %c0_56 = arith.constant 0 : index
    %48 = vector.load %arg5[%c0_54, %c0_55, %c0_56] : memref<1x64x8xbf16, #tpu.memory_space<vmem>>, vector<1x64x8xbf16>
    %49 = vector.shape_cast %48 : vector<1x64x8xbf16> to vector<64x8xbf16>
    %50 = vector.shape_cast %47 : vector<64x8xbf16> to vector<1x64x8xbf16>
    tpu.vector_store %arg5[%c0_54, %c0_55, %c0_56], %50 {strides = array<i32>} : memref<1x64x8xbf16, #tpu.memory_space<vmem>>, vector<1x64x8xbf16>,
    %cst_57 = arith.constant dense<0.000000e+00> : vector<8xf32>
    %51 = vector.multi_reduction <add>, %46, %cst_57 [0] : vector<64x8xf32> to vector<8xf32>
    %52 = vector.shape_cast %51 : vector<8xf32> to vector<1x8xf32>
    %c0_58 = arith.constant 0 : index
    %c0_59 = arith.constant 0 : index
    %c0_60 = arith.constant 0 : index
    %53 = vector.load %arg6[%c0_58, %c0_59, %c0_60] : memref<1x2x8xf32, #tpu.memory_space<vmem>>, vector<1x1x8xf32>
    %54 = vector.shape_cast %53 : vector<1x1x8xf32> to vector<1x8xf32>
    %55 = vector.shape_cast %52 : vector<1x8xf32> to vector<1x1x8xf32>
    tpu.vector_store %arg6[%c0_58, %c0_59, %c0_60], %55 {strides = array<i32>} : memref<1x2x8xf32, #tpu.memory_space<vmem>>, vector<1x1x8xf32>,
    %56 = arith.mulf %46, %46 : vector<64x8xf32>
    %cst_61 = arith.constant dense<0.000000e+00> : vector<8xf32>
    %57 = vector.multi_reduction <add>, %56, %cst_61 [0] : vector<64x8xf32> to vector<8xf32>
    %58 = vector.shape_cast %57 : vector<8xf32> to vector<1x8xf32>
    %c0_62 = arith.constant 0 : index
    %c1_63 = arith.constant 1 : index
    %c0_64 = arith.constant 0 : index
    %59 = vector.load %arg6[%c0_62, %c1_63, %c0_64] : memref<1x2x8xf32, #tpu.memory_space<vmem>>, vector<1x1x8xf32>
    %60 = vector.shape_cast %59 : vector<1x1x8xf32> to vector<1x8xf32>
    %61 = vector.shape_cast %58 : vector<1x8xf32> to vector<1x1x8xf32>
    tpu.vector_store %arg6[%c0_62, %c1_63, %c0_64], %61 {strides = array<i32>} : memref<1x2x8xf32, #tpu.memory_space<vmem>>, vector<1x1x8xf32>,
    return
  }
  func.func @transform_0(%arg0: i32) -> (i32, i32, i32, i32) {
    %c0_i32 = arith.constant 0 : i32
    %c0_i32_0 = arith.constant 0 : i32
    %c0_i32_1 = arith.constant 0 : i32
    %c0_i32_2 = arith.constant 0 : i32
    return %arg0, %c0_i32, %c0_i32_0, %c0_i32_1 : i32, i32, i32, i32
  }
  func.func @transform_1(%arg0: i32) -> (i32, i32) {
    %c0_i32 = arith.constant 0 : i32
    %c0_i32_0 = arith.constant 0 : i32
    %c0_i32_1 = arith.constant 0 : i32
    return %c0_i32, %c0_i32_0 : i32, i32
  }
  func.func @transform_2(%arg0: i32) -> (i32, i32) {
    %c0_i32 = arith.constant 0 : i32
    %c0_i32_0 = arith.constant 0 : i32
    %c0_i32_1 = arith.constant 0 : i32
    return %c0_i32, %c0_i32_0 : i32, i32
  }
  func.func @transform_3(%arg0: i32) -> (i32, i32) {
    %c0_i32 = arith.constant 0 : i32
    %c0_i32_0 = arith.constant 0 : i32
    %c0_i32_1 = arith.constant 0 : i32
    return %c0_i32, %c0_i32_0 : i32, i32
  }
  func.func @transform_4(%arg0: i32) -> (i32, i32, i32) {
    %c0_i32 = arith.constant 0 : i32
    %c0_i32_0 = arith.constant 0 : i32
    %c0_i32_1 = arith.constant 0 : i32
    return %arg0, %c0_i32, %c0_i32_0 : i32, i32, i32
  }
  func.func @transform_5(%arg0: i32) -> (i32, i32, i32) {
    %c0_i32 = arith.constant 0 : i32
    %c0_i32_0 = arith.constant 0 : i32
    %c0_i32_1 = arith.constant 0 : i32
    return %arg0, %c0_i32, %c0_i32_0 : i32, i32, i32
  }
}

module attributes {stable_mosaic.version = 11 : i64} {
  func.func @_affine_kernel(%arg0: i32, %arg1: memref<8x64xbf16, #tpu.memory_space<vmem>>, %arg2: memref<1x64xf32, #tpu.memory_space<vmem>>, %arg3: memref<1x64xf32, #tpu.memory_space<vmem>>, %arg4: memref<8x64xbf16, #tpu.memory_space<vmem>>, %arg5: memref<1x64xf32, #tpu.memory_space<vmem>>, %arg6: memref<1x64xf32, #tpu.memory_space<vmem>>, %arg7: memref<8x64xf32, #tpu.memory_space<vmem>>) attributes {dimension_semantics = [#tpu.dimension_semantics<parallel>], iteration_bounds = array<i64: 2>, scalar_prefetch = 0 : i64, scratch_operands = 0 : i64, tpu.core_type = #tpu.core_type<tc>, window_params = [{transform_indices = @transform_0, window_bounds = array<i64: 8, 64>}, {pipeline_mode = #tpu.pipeline_mode<synchronous>, transform_indices = @transform_1, window_bounds = array<i64: 1, 64>}, {pipeline_mode = #tpu.pipeline_mode<synchronous>, transform_indices = @transform_2, window_bounds = array<i64: 1, 64>}, {transform_indices = @transform_3, window_bounds = array<i64: 8, 64>}, {pipeline_mode = #tpu.pipeline_mode<synchronous>, transform_indices = @transform_4, window_bounds = array<i64: 1, 64>}, {pipeline_mode = #tpu.pipeline_mode<synchronous>, transform_indices = @transform_5, window_bounds = array<i64: 1, 64>}, {transform_indices = @transform_6, window_bounds = array<i64: 8, 64>}]} {
    %c0 = arith.constant 0 : index
    %c0_0 = arith.constant 0 : index
    %0 = vector.load %arg1[%c0, %c0_0] : memref<8x64xbf16, #tpu.memory_space<vmem>>, vector<8x64xbf16>
    %1 = arith.extf %0 : vector<8x64xbf16> to vector<8x64xf32>
    %c0_1 = arith.constant 0 : index
    %c0_2 = arith.constant 0 : index
    %2 = vector.load %arg2[%c0_1, %c0_2] : memref<1x64xf32, #tpu.memory_space<vmem>>, vector<1x64xf32>
    %3 = vector.broadcast %2 : vector<1x64xf32> to vector<8x64xf32>
    %4 = arith.mulf %1, %3 : vector<8x64xf32>
    %c0_3 = arith.constant 0 : index
    %c0_4 = arith.constant 0 : index
    %5 = vector.load %arg3[%c0_3, %c0_4] : memref<1x64xf32, #tpu.memory_space<vmem>>, vector<1x64xf32>
    %6 = vector.broadcast %5 : vector<1x64xf32> to vector<8x64xf32>
    %7 = arith.addf %4, %6 : vector<8x64xf32>
    %c0_5 = arith.constant 0 : index
    %c0_6 = arith.constant 0 : index
    %8 = vector.load %arg4[%c0_5, %c0_6] : memref<8x64xbf16, #tpu.memory_space<vmem>>, vector<8x64xbf16>
    %9 = arith.extf %8 : vector<8x64xbf16> to vector<8x64xf32>
    %c0_7 = arith.constant 0 : index
    %c0_8 = arith.constant 0 : index
    %10 = vector.load %arg5[%c0_7, %c0_8] : memref<1x64xf32, #tpu.memory_space<vmem>>, vector<1x64xf32>
    %11 = vector.broadcast %10 : vector<1x64xf32> to vector<8x64xf32>
    %12 = arith.mulf %9, %11 : vector<8x64xf32>
    %c0_9 = arith.constant 0 : index
    %c0_10 = arith.constant 0 : index
    %13 = vector.load %arg6[%c0_9, %c0_10] : memref<1x64xf32, #tpu.memory_space<vmem>>, vector<1x64xf32>
    %14 = vector.broadcast %13 : vector<1x64xf32> to vector<8x64xf32>
    %15 = arith.addf %12, %14 : vector<8x64xf32>
    %16 = arith.addf %7, %15 : vector<8x64xf32>
    %cst = arith.constant 0.000000e+00 : f32
    %17 = vector.broadcast %cst : f32 to vector<8x64xf32>
    %18 = arith.maximumf %16, %17 : vector<8x64xf32>
    %c0_11 = arith.constant 0 : index
    %c0_12 = arith.constant 0 : index
    %19 = vector.load %arg7[%c0_11, %c0_12] : memref<8x64xf32, #tpu.memory_space<vmem>>, vector<8x64xf32>
    tpu.vector_store %arg7[%c0_11, %c0_12], %18 {strides = array<i32>} : memref<8x64xf32, #tpu.memory_space<vmem>>, vector<8x64xf32>,
    return
  }
  func.func @transform_0(%arg0: i32) -> (i32, i32) {
    %c0_i32 = arith.constant 0 : i32
    %c0_i32_0 = arith.constant 0 : i32
    return %arg0, %c0_i32 : i32, i32
  }
  func.func @transform_1(%arg0: i32) -> (i32, i32) {
    %c0_i32 = arith.constant 0 : i32
    %c0_i32_0 = arith.constant 0 : i32
    %c0_i32_1 = arith.constant 0 : i32
    return %c0_i32, %c0_i32_0 : i32, i32
  }
  func.func @transform_2(%arg0: i32) -> (i32, i32) {
    %c0_i32 = arith.constant 0 : i32
    %c0_i32_0 = arith.constant 0 : i32
    %c0_i32_1 = arith.constant 0 : i32
    return %c0_i32, %c0_i32_0 : i32, i32
  }
  func.func @transform_3(%arg0: i32) -> (i32, i32) {
    %c0_i32 = arith.constant 0 : i32
    %c0_i32_0 = arith.constant 0 : i32
    return %arg0, %c0_i32 : i32, i32
  }
  func.func @transform_4(%arg0: i32) -> (i32, i32) {
    %c0_i32 = arith.constant 0 : i32
    %c0_i32_0 = arith.constant 0 : i32
    %c0_i32_1 = arith.constant 0 : i32
    return %c0_i32, %c0_i32_0 : i32, i32
  }
  func.func @transform_5(%arg0: i32) -> (i32, i32) {
    %c0_i32 = arith.constant 0 : i32
    %c0_i32_0 = arith.constant 0 : i32
    %c0_i32_1 = arith.constant 0 : i32
    return %c0_i32, %c0_i32_0 : i32, i32
  }
  func.func @transform_6(%arg0: i32) -> (i32, i32) {
    %c0_i32 = arith.constant 0 : i32
    %c0_i32_0 = arith.constant 0 : i32
    return %arg0, %c0_i32 : i32, i32
  }
}

</mosaic_0001>

<bundles_post_ra>
// kernel: tile.23
= control target key start
LH: loop header
LB: loop body
LE: loop exit
PB: predicated region body
PF: predicated region fallthrough
CT: control target
= control target key end

     0   :  { %s22_s0 = inlined_call_operand.vmem [shape: f32[8], index: 0, kind: input, shape index: {}]   ;;  %s23_s1 = inlined_call_operand.vmem [shape: f32[8,8], index: 1, kind: output, shape index: {}]  }
   0x1   :  { %v4_v0 = vld [vmem:[%s22_s0] ss:$0 sm:$0xff] }
   0x2   :  { %5 = vst [vmem:[%s23_s1] sm:$0xff] %v4_v0 }

// kernel: tile.24
= control target key start
LH: loop header
LB: loop body
LE: loop exit
PB: predicated region body
PF: predicated region fallthrough
CT: control target
= control target key end

     0   :  { %s67_s10 = smov 56   ;;  %s68_s11 = smov 40   ;;  %vm3_vm0 = vcmask 64512   ;;  %vm9_vm1 = vcmask 523712   ;;  %vm15_vm2 = vcmask 458112   ;;  %vm21_vm3 = vcmask 392512   ;;  %s111_s0 = inlined_call_operand.vmem [shape: f32[8,8], index: 0, kind: input, shape index: {}]   ;;  %s112_s1 = inlined_call_operand.vmem [shape: f32[1,64], index: 1, kind: output, shape index: {}]  }
   0x1   :  { %v53_v0 = vld [vmem:[%s111_s0 + $0x7] sm:$0x1]   ;;  %v55_v1 = vld [vmem:[%s111_s0 + $0x5] sm:$0x1]   ;;  %v57_v2 = vld [vmem:[%s111_s0 + $0x3] sm:$0x1]  }
   0x2   :  { %7 = vrot.lane.b32.xlu0 %v53_v0, %s67_s10  ;;  %19 = vrot.lane.b32.xlu1 %v55_v1, %s68_s11  ;;  %s69_s14 = smov 24   ;;  %v54_v3 = vld [vmem:[%s111_s0 + $0x6] sm:$0x1]   ;;  %v56_v4 = vld [vmem:[%s111_s0 + $0x4] sm:$0x1]   ;;  %s70_s21 = smov 48  }
   0x3   :  { %31 = vrot.lane.b32.xlu2 %v57_v2, %s69_s14  ;;  %v58_v5 = vld [vmem:[%s111_s0 + $0x2] sm:$0x1]   ;;  %s71_s22 = smov 32   ;;  %s72_s23 = smov 16   ;;  %v59_v6 = vld [vmem:[%s111_s0 + $0x1] sm:$0x1]  }
   0x4   :  { %s73_s26 = smov 8   ;;  %v2_v7 = vld [vmem:[%s111_s0] sm:$0x1]   ;;  %vm27_vm4 = vcmask 326912   ;;  %vm33_vm5 = vcmask 261312   ;;  %vm39_vm6 = vcmask 195712  }
   0x5   :  { %4 = vst.msk [vmem:[#allocation0] sm:$0x1] %vm3_vm0, %v2_v7   ;;  %vm45_vm7 = vcmask 130112  }
   0xa   :  { %13 = vrot.lane.b32.xlu0 %v54_v3, %s70_s21  ;;  %25 = vrot.lane.b32.xlu1 %v56_v4, %s71_s22 }
   0xb   :  { %37 = vrot.lane.b32.xlu2 %v58_v5, %s72_s23 }
  0x12   :  { %43 = vrot.lane.b32.xlu0 %v59_v6, %s73_s26 }
  0x5d   :  { %v32_v8 = vpop.permute.xlu2 %31  }
  0x65   :  { %v38_v9 = vpop.permute.xlu2 %37  }
  0x74   :  { %v8_v10 = vpop.permute.xlu0 %7   ;;  %v20_v11 = vpop.permute.xlu1 %19  }
  0x75   :  { %10 = vst.msk [vmem:[#allocation0] sm:$0x1] %vm9_vm1, %v8_v10  }
  0x7c   :  { %v14_v12 = vpop.permute.xlu0 %13   ;;  %v26_v13 = vpop.permute.xlu1 %25  }
  0x7d   :  { %16 = vst.msk [vmem:[#allocation0] sm:$0x1] %vm15_vm2, %v14_v12  }
  0x7e   :  { %22 = vst.msk [vmem:[#allocation0] sm:$0x1] %vm21_vm3, %v20_v11  }
  0x7f   :  { %28 = vst.msk [vmem:[#allocation0] sm:$0x1] %vm27_vm4, %v26_v13  }
  0x80   :  { %34 = vst.msk [vmem:[#allocation0] sm:$0x1] %vm33_vm5, %v32_v8  }
  0x81   :  { %40 = vst.msk [vmem:[#allocation0] sm:$0x1] %vm39_vm6, %v38_v9  }
  0x84   :  { %v44_v14 = vpop.permute.xlu0 %43  }
  0x85   :  { %46 = vst.msk [vmem:[#allocation0] sm:$0x1] %vm45_vm7, %v44_v14  }
  0x8c   :  { %v49_v15 = vld [vmem:[#allocation0] sm:$0x1] }
  0x8d   :  { %52 = vst [vmem:[%s112_s1] sm:$0x1] %v49_v15 }

// kernel: basic_block_forward.5
= control target key start
LH: loop header
LB: loop body
LE: loop exit
PB: predicated region body
PF: predicated region fallthrough
CT: control target
= control target key end

     0   :  { %s422_s21 = smov 0   ;;  %s454_s0 = inlined_call_operand.vmem [shape: bf16[16,64], index: 0, kind: input, shape index: {}]   ;;  %s455_s1 = inlined_call_operand.vmem [shape: f32[1,64], index: 1, kind: input, shape index: {}]   ;;  %s456_s2 = inlined_call_operand.vmem [shape: f32[1,64], index: 2, kind: input, shape index: {}]   ;;  %s457_s3 = inlined_call_operand.vmem [shape: bf16[16,64], index: 3, kind: input, shape index: {}]   ;;  %s458_s4 = inlined_call_operand.vmem [shape: f32[1,64], index: 4, kind: input, shape index: {}]   ;;  %s459_s5 = inlined_call_operand.vmem [shape: f32[1,64], index: 5, kind: input, shape index: {}]   ;;  %s460_s6 = inlined_call_operand.vmem [shape: f32[16,64], index: 6, kind: output, shape index: {}]  }
   0x1 LB: > { %s357_s22 = sadd.s32 4294967295, %s385_s21   ;;  %p361_p0 = scmp.ge.s32.totalorder %s385_s21, 1  ;;  %s385_s21 = sphi %s422_s21, %s16_s21  }
   0x2   : > { %p220_p1 = scmp.lt.s32.totalorder %s385_s21, 3 }
   0x4   : > { %p221_p2 = pnand %p361_p0, %p220_p1 }
   0x5   : > { %p252_p3 = scmp.lt.s32.totalorder (!%p221_p2), %s357_s22, 1 }
   0x6   : > { %224 = sbr.rel (%p221_p2) target bundleno = 27 (0x1b), region = 44 }
   0xb   : > { %s462_s22 = smov (!%p252_p3, %s357_s22), 1  ;;  %v375_v0 = vld [vmem:[%s455_s1] ss:$0 sm:$0xff]  ;;  %vm290_vm0 = vcmask 523264  }
   0xc   : > { %s362_s23 = sshll.u32 %s462_s22, 2  ;;  %v377_v1 = vld [vmem:[%s458_s4] ss:$0 sm:$0xff]  ;;  %s364_s14 = sshll.u32 %s462_s22, 3 }
   0xd   : > { %s255_s26 = scalar_lea.vmem %s454_s0, %s362_s23  ;;  %s259_s29 = scalar_lea.vmem %s457_s3, %s362_s23  ;;  %v376_v5 = vld [vmem:[%s456_s2] ss:$0 sm:$0xff] }
   0xe   : > { %v264_v2 = vld [vmem:[%s255_s26] sm:$0xf]  ;;  %s263_s17 = scalar_lea.vmem %s460_s6, %s364_s14 }
   0xf   : > { %v276_v3 = vld [vmem:[%s259_s29] sm:$0xf]  ;;  %v265_v4 = vunpack.c.l.bf16 %v264_v2 }
  0x10   : > { %v277_v6 = vunpack.c.l.bf16 %v276_v3  ;;  %v378_v7 = vld [vmem:[%s459_s5] ss:$0 sm:$0xff] }
  0x11   : > { %v270_v8 = vmul.f32 %v375_v0, %v265_v4 }
  0x12   : > { %v282_v9 = vmul.f32 %v377_v1, %v277_v6 }
  0x13   : > { %v275_v10 = vadd.f32 %v376_v5, %v270_v8 }
  0x14   : > { %v287_v11 = vadd.f32 %v378_v7, %v282_v9 }
  0x16   : > { %v288_v12 = vadd.f32 %v287_v11, %v275_v10 }
  0x18   : > { %v289_v13 = vmax.f32 %v288_v12, 0.0 }
  0x1a   : > { %291 = vst.msk [vmem:[%s263_s17] sm:$0xff] %vm290_vm0, %v289_v13 }
  0x1b PF: > { %s16_s21 = sadd.s32 1, %s385_s21  }
  0x1c   : > { %p13_p4 = scmp.ge.s32.totalorder %s16_s21, 4  }
  0x1e   :  { %15 = sbr.rel (!%p13_p4) target bundleno = 1 (0x1), region = 77 }

// kernel: basic_block_forward.3
= control target key start
LH: loop header
LB: loop body
LE: loop exit
PB: predicated region body
PF: predicated region fallthrough
CT: control target
= control target key end

     0   :  { %s1728_s21 = smov 0   ;;  %s2185_s0 = inlined_call_operand.vmem [shape: bf16[8,9,9,4], index: 0, kind: input, shape index: {}]   ;;  %s2186_s1 = inlined_call_operand.vmem [shape: bf16[36,8], index: 1, kind: input, shape index: {}]   ;;  %s2187_s2 = inlined_call_operand.vmem [shape: bf16[4,8], index: 2, kind: input, shape index: {}]   ;;  %s2188_s3 = inlined_call_operand.vmem [shape: bf16[2,64,8], index: 3, kind: output, shape index: {0}]   ;;  %s2189_s4 = inlined_call_operand.vmem [shape: f32[2,2,8], index: 4, kind: output, shape index: {1}]   ;;  %s2190_s5 = inlined_call_operand.vmem [shape: bf16[2,64,8], index: 5, kind: output, shape index: {2}]   ;;  %s2191_s6 = inlined_call_operand.vmem [shape: f32[2,2,8], index: 6, kind: output, shape index: {3}]  }
   0x1 LB: > { %s1734_s22 = sadd.s32 4294967295, %s1683_s21   ;;  %p1505_p0 = scmp.ge.s32.totalorder %s1683_s21, 1  ;;  %s1683_s21 = sphi %s1728_s21, %s17_s21  }
   0x2   : > { %p221_p1 = scmp.lt.s32.totalorder %s1683_s21, 3 }
   0x4   : > { %p222_p2 = pnand %p1505_p0, %p221_p1 }
   0x5   : > { %s1506_s23 = sshll.u32 (!%p222_p2), %s1734_s22, 2  ;;  %s1685_s28 = smov (!%p222_p2), 4  }
   0x6   : > { %225 = sbr.rel (%p222_p2) target bundleno = 465 (0x1d1), region = 32  ;;  %p266_p3 = scmp.lt.s32.totalorder (!%p222_p2), %s1506_s23, 7 }
   0x7   : > { %s1686_s29 = smov (!%p222_p2), 12   ;;  %s1687_s30 = smov (!%p222_p2), 8  }
   0x8   : > { %s1688_s7 = smov (!%p222_p2), 16   ;;  %s1689_s8 = smov (!%p222_p2), 20  }
   0x9   : > { %s1690_s9 = smov (!%p222_p2), 24   ;;  %s1691_s10 = smov (!%p222_p2), 28  }
   0xa   : > { %s1692_s11 = smov (!%p222_p2), 32   ;;  %p272_p4 = scmp.lt.s32.totalorder (!%p222_p2), %s1734_s22, 1 }
   0xb   : > { %s2195_s23 = smov (!%p266_p3, %s1506_s23), 7  ;;  %vm374_vm0 = vsmask.f32 3328  ;;  %vm375_vm1 = vsmask.f32 7440  ;;  %vm299_vm3 = vcmask 27648  }
   0xc   : > { %s1660_s24 = smul.u32 72, %s2195_s23  ;;  %vm1757_vm2 = vmor %vm374_vm0, %vm375_vm1  ;;  %vm349_vm4 = vcmask 60448   ;;  %vm513_vm5 = vcmask 93248   ;;  %vm563_vm6 = vcmask 126048   ;;  %vm613_vm7 = vcmask 158848   ;;  %s2197_s22 = smov (!%p272_p4, %s1734_s22), 1 }
   0xd   : > { %vm774_vm8 = vcmask 191648   ;;  %vm1105_vm9 = vcmask 1041408   ;;  %vm824_vm10 = vcmask 224448   ;;  %vm874_vm11 = vcmask 257248   ;;  %s1644_s20 = sshll.u32 %s2197_s22, 5 }
   0xe   : > { %s1742_s27 = scalar_lea.vmem %s2185_s0, %s1660_s24  ;;  %vm1035_vm12 = vcmask 290048   ;;  %vm1238_vm13 = vcmask 31744   ;;  %vm1092_vm14 = vcmask 293888   ;;  %s2068_s25 = scalar_lea.vmem %s2188_s3, %s1644_s20  ;;  %vm1146_vm15 = vcmask 60416  }
   0xf   : > { %v1514_v0 = vld [vmem:[%s1742_s27 + $0x48] sm:$0xf]  ;;  %v1523_v1 = vld [vmem:[%s1742_s27 + $0x98] sm:$0xf]  ;;  %v358_v2 = vld [vmem:[%s1742_s27] sm:$0xf] }
  0x10   : > { %325 = vrot.lane.b32.xlu0 %v1514_v0, %s1685_s28  ;;  %541 = vrot.lane.b32.xlu1 %v1523_v1, %s1686_s29  ;;  %v359_v3 = vld [vmem:[%s1742_s27 + $0x4] sm:$0x1]  ;;  %v378_v4 = vshrl.u32 %v358_v2, 16  ;;  %v381_v5 = vshll.u32 %v358_v2, 16  ;;  %v360_v7 = vld [vmem:[%s1742_s27 + $0x8] sm:$0xf] }
  0x11   : > { %v387_v6 = vshll.u32 %v359_v3, 16  ;;  %v368_v8 = vld [vmem:[%s1742_s27 + $0x28] sm:$0xf]  ;;  %v361_v11 = vld [vmem:[%s1742_s27 + $0xc] sm:$0x1]  ;;  %v392_v12 = vshrl.u32 %v360_v7, 16 }
  0x12   : > { %v380_v9 = vrot.slane %v378_v4, 4  ;;  %v383_v10 = vrot.slane %v381_v5, 5  ;;  %v1515_v13 = vld [vmem:[%s1742_s27 + $0x50] sm:$0xf]  ;;  %v395_v15 = vshll.u32 %v360_v7, 16  ;;  %v448_v18 = vshrl.u32 %v368_v8, 16 }
  0x13   : > { %v389_v14 = vrot.slane %v387_v6, 5  ;;  %v394_v17 = vrot.slane %v392_v12, 4  ;;  %v451_v19 = vshll.u32 %v368_v8, 16  ;;  %v1518_v20 = vld [vmem:[%s1742_s27 + $0x68] sm:$0xf]  ;;  %v401_v23 = vshll.u32 %v361_v11, 16 }
  0x14   : > { %v384_v16 = vor.u32 %v383_v10, %v380_v9  ;;  %v397_v22 = vrot.slane %v395_v15, 5  ;;  %333 = vrot.lane.b32.xlu2 %v1518_v20, %s1685_s28  ;;  %v450_v27 = vrot.slane %v448_v18, 4  ;;  %v366_v29 = vld [vmem:[%s1742_s27 + $0x20] sm:$0xf]  ;;  %v367_v30 = vld [vmem:[%s1742_s27 + $0x24] sm:$0x1] }
  0x15   : > { %v453_v28 = vrot.slane %v451_v19, 5  ;;  %v403_v31 = vrot.slane %v401_v23, 5  ;;  %v369_v32 = vld [vmem:[%s1742_s27 + $0x2c] sm:$0x1]  ;;  %v1519_v34 = vld [vmem:[%s1742_s27 + $0x70] sm:$0xf] }
  0x16   : > { %v385_v24 = vrot.slane %v384_v16, 4  ;;  %v398_v25 = vor.u32 %v397_v22, %v394_v17  ;;  %v434_v35 = vshrl.u32 %v366_v29, 16  ;;  %v437_v36 = vshll.u32 %v366_v29, 16  ;;  %v1522_v38 = vld [vmem:[%s1742_s27 + $0x90] sm:$0xf] }
  0x17   : > { %v443_v37 = vshll.u32 %v367_v30, 16  ;;  %v454_v39 = vor.u32 %v453_v28, %v450_v27  ;;  %v457_v40 = vshll.u32 %v369_v32, 16  ;;  %v1538_v46 = vld [vmem:[%s1742_s27 + $0x90] sm:$0xf]  ;;  %v1540_v50 = vld [vmem:[%s1742_s27 + $0x98] sm:$0xf] }
  0x18   : > { %327 = vrot.lane.b32.xlu0 %v1515_v13, %s1685_s28  ;;  %v390_v26 = vsel %vm1757_vm2, %v385_v24, %v389_v14  ;;  %v399_v33 = vrot.slane %v398_v25, 4  ;;  %v436_v41 = vrot.slane %v434_v35, 4  ;;  %v439_v42 = vrot.slane %v437_v36, 5  ;;  %v1530_v57 = vld [vmem:[%s1742_s27 + $0xd8] sm:$0xf] }
  0x19   : > { %489 = vrot.lane.b32.xlu1 %v390_v26, %s1687_s30  ;;  %v445_v45 = vrot.slane %v443_v37, 5  ;;  %v455_v47 = vrot.slane %v454_v39, 4  ;;  %v459_v48 = vrot.slane %v457_v40, 5  ;;  %v639_v52 = vshrl.u32 %v1538_v46, 16  ;;  %v1539_v60 = vld [vmem:[%s1742_s27 + $0x94] sm:$0x1] }
  0x1a   : > { %v404_v43 = vsel %vm1757_vm2, %v399_v33, %v403_v31  ;;  %v440_v44 = vor.u32 %v439_v42, %v436_v41  ;;  %v642_v53 = vshll.u32 %v1538_v46, 16  ;;  %v653_v55 = vshrl.u32 %v1540_v50, 16  ;;  %v1541_v63 = vld [vmem:[%s1742_s27 + $0x9c] sm:$0x1]  ;;  %v1531_v0 = vld [vmem:[%s1742_s27 + $0xe0] sm:$0xf] }
  0x1b   : > { %v460_v54 = vsel %vm1757_vm2, %v455_v47, %v459_v48  ;;  %v656_v56 = vshll.u32 %v1540_v50, 16  ;;  %v641_v58 = vrot.slane %v639_v52, 4  ;;  %v648_v2 = vshll.u32 %v1539_v60, 16  ;;  %v1526_v3 = vld [vmem:[%s1742_s27 + $0xb0] sm:$0xf] }
  0x1c   : > { %335 = vrot.lane.b32.xlu2 %v1519_v34, %s1685_s28  ;;  %v441_v49 = vrot.slane %v440_v44, 4  ;;  %v644_v59 = vrot.slane %v642_v53, 5  ;;  %v655_v61 = vrot.slane %v653_v55, 4  ;;  %v662_v5 = vshll.u32 %v1541_v63, 16  ;;  %v1527_v6 = vld [vmem:[%s1742_s27 + $0xb8] sm:$0xf] }
  0x1d   : > { %v658_v62 = vrot.slane %v656_v56, 5  ;;  %v650_v8 = vrot.slane %v648_v2, 5  ;;  %v1546_v9 = vld [vmem:[%s1742_s27 + $0xb0] sm:$0xf]  ;;  %v1548_v12 = vld [vmem:[%s1742_s27 + $0xb8] sm:$0xf] }
  0x1e   : > { %v446_v51 = vsel %vm1757_vm2, %v441_v49, %v445_v45  ;;  %v645_v1 = vor.u32 %v644_v59, %v641_v58  ;;  %v664_v11 = vrot.slane %v662_v5, 5  ;;  %v695_v14 = vshrl.u32 %v1546_v9, 16  ;;  %v1534_v19 = vld [vmem:[%s1742_s27 + $0xf8] sm:$0xf]  ;;  %v1547_v23 = vld [vmem:[%s1742_s27 + $0xb4] sm:$0x1] }
  0x1f   : > { %v659_v4 = vor.u32 %v658_v62, %v655_v61  ;;  %v698_v15 = vshll.u32 %v1546_v9, 16  ;;  %v709_v17 = vshrl.u32 %v1548_v12, 16  ;;  %v712_v18 = vshll.u32 %v1548_v12, 16  ;;  %v1549_v26 = vld [vmem:[%s1742_s27 + $0xbc] sm:$0x1] }
  0x20   : > { %539 = vrot.lane.b32.xlu0 %v1522_v38, %s1686_s29  ;;  %v646_v7 = vrot.slane %v645_v1, 4  ;;  %v697_v20 = vrot.slane %v695_v14, 4  ;;  %v1535_v27 = vld [vmem:[%s1742_s27 + $0x100] sm:$0xf]  ;;  %v704_v29 = vshll.u32 %v1547_v23, 16  ;;  %v718_v32 = vshll.u32 %v1549_v26, 16 }
  0x21   : > { %491 = vrot.lane.b32.xlu1 %v404_v43, %s1687_s30  ;;  %v660_v10 = vrot.slane %v659_v4, 4  ;;  %v700_v22 = vrot.slane %v698_v15, 5  ;;  %v711_v24 = vrot.slane %v709_v17, 4  ;;  %v714_v25 = vrot.slane %v712_v18, 5  ;;  %v1554_v30 = vld [vmem:[%s1742_s27 + $0x8] sm:$0xf] }
  0x22   : > { %v651_v13 = vsel %vm1757_vm2, %v646_v7, %v650_v8  ;;  %v1555_v33 = vld [vmem:[%s1742_s27 + $0x10] sm:$0xf]  ;;  %v706_v35 = vrot.slane %v704_v29, 5  ;;  %v1570_v36 = vld [vmem:[%s1742_s27 + $0x8] sm:$0xf]  ;;  %v720_v38 = vrot.slane %v718_v32, 5 }
  0x23   : > { %v665_v16 = vsel %vm1757_vm2, %v660_v10, %v664_v11  ;;  %v701_v28 = vor.u32 %v700_v22, %v697_v20  ;;  %v715_v31 = vor.u32 %v714_v25, %v711_v24  ;;  %v1572_v39 = vld [vmem:[%s1742_s27 + $0x10] sm:$0xf]  ;;  %v900_v41 = vshrl.u32 %v1570_v36, 16  ;;  %v1571_v49 = vld [vmem:[%s1742_s27 + $0xc] sm:$0x1] }
  0x24   : > { %497 = vrot.lane.b32.xlu2 %v446_v51, %s1687_s30  ;;  %v903_v42 = vshll.u32 %v1570_v36, 16  ;;  %v914_v44 = vshrl.u32 %v1572_v39, 16  ;;  %v917_v45 = vshll.u32 %v1572_v39, 16  ;;  %v1562_v46 = vld [vmem:[%s1742_s27 + $0x50] sm:$0xf]  ;;  %v909_v56 = vshll.u32 %v1571_v49, 16 }
  0x25   : > { %v702_v34 = vrot.slane %v701_v28, 4  ;;  %v716_v37 = vrot.slane %v715_v31, 4  ;;  %v902_v47 = vrot.slane %v900_v41, 4  ;;  %v1573_v52 = vld [vmem:[%s1742_s27 + $0x14] sm:$0x1]  ;;  %vm1155_vm0 = vcmask 64512  }
  0x26   : > { %v905_v48 = vrot.slane %v903_v42, 5  ;;  %v916_v50 = vrot.slane %v914_v44, 4  ;;  %v919_v51 = vrot.slane %v917_v45, 5  ;;  %v1578_v53 = vld [vmem:[%s1742_s27 + $0x28] sm:$0xf]  ;;  %v923_v60 = vshll.u32 %v1573_v52, 16 }
  0x27   : > { %v707_v40 = vsel %vm1757_vm2, %v702_v34, %v706_v35  ;;  %v721_v43 = vsel %vm1757_vm2, %v716_v37, %v720_v38  ;;  %v1558_v58 = vld [vmem:[%s1742_s27 + $0x28] sm:$0xf]  ;;  %v956_v61 = vshrl.u32 %v1578_v53, 16  ;;  %v959_v62 = vshll.u32 %v1578_v53, 16  ;;  %v1559_v63 = vld [vmem:[%s1742_s27 + $0x30] sm:$0xf] }
  0x28   : > { %499 = vrot.lane.b32.xlu0 %v460_v54, %s1687_s30  ;;  %v1563_v54 = vld [vmem:[%s1742_s27 + $0x58] sm:$0xf]  ;;  %v906_v55 = vor.u32 %v905_v48, %v902_v47  ;;  %v920_v59 = vor.u32 %v919_v51, %v916_v50  ;;  %v925_v5 = vrot.slane %v923_v60, 5  ;;  %v1579_v8 = vld [vmem:[%s1742_s27 + $0x2c] sm:$0x1]  ;;  %vm1177_vm1 = vcmask 57344  }
  0x29   : > { %589 = vrot.lane.b32.xlu1 %v1530_v57, %s1688_s7  ;;  %v1580_v57 = vld [vmem:[%s1742_s27 + $0x30] sm:$0xf]  ;;  %v961_v7 = vrot.slane %v959_v62, 5  ;;  %v364_v23 = vld [vmem:[%s1742_s27 + $0x18] sm:$0xf] }
  0x2a   : > { %v973_v1 = vshll.u32 %v1580_v57, 16  ;;  %v907_v2 = vrot.slane %v906_v55, 4  ;;  %v921_v4 = vrot.slane %v920_v59, 4  ;;  %v362_v11 = vld [vmem:[%s1742_s27 + $0x10] sm:$0xf]  ;;  %v420_v31 = vshrl.u32 %v364_v23, 16 }
  0x2b   : > { %v406_v17 = vshrl.u32 %v362_v11, 16  ;;  %v409_v18 = vshll.u32 %v362_v11, 16  ;;  %v423_v32 = vshll.u32 %v364_v23, 16  ;;  %v370_v41 = vld [vmem:[%s1742_s27 + $0x30] sm:$0xf] }
  0x2c   : > { %591 = vrot.lane.b32.xlu2 %v1531_v0, %s1688_s7  ;;  %v970_v0 = vshrl.u32 %v1580_v57, 16  ;;  %v975_v10 = vrot.slane %v973_v1, 5  ;;  %v926_v14 = vsel %vm1757_vm2, %v921_v4, %v925_v5  ;;  %v422_v38 = vrot.slane %v420_v31, 4  ;;  %v291_v44 = vld [vmem:[%s1742_s27] sm:$0xf] }
  0x2d   : > { %v408_v26 = vrot.slane %v406_v17, 4  ;;  %v425_v39 = vrot.slane %v423_v32, 5  ;;  %300 = vst.msk [vmem:[#allocation2] sm:$0xf] %vm299_vm3, %v291_v44  ;;  %v295_v48 = vld [vmem:[%s1742_s27 + $0x20] sm:$0xf] }
  0x2e   : > { %v972_v9 = vrot.slane %v970_v0, 4  ;;  %304 = vst.msk [vmem:[#allocation2 + $0x10] sm:$0xf] %vm299_vm3, %v295_v48  ;;  %v1517_v49 = vld [vmem:[%s1742_s27 + $0x60] sm:$0xf]  ;;  %v462_v50 = vshrl.u32 %v370_v41, 16 }
  0x2f   : > { %v465_v51 = vshll.u32 %v370_v41, 16  ;;  %v372_v55 = vld [vmem:[%s1742_s27 + $0x38] sm:$0xf]  ;;  %v371_v62 = vld [vmem:[%s1742_s27 + $0x34] sm:$0x1] }
  0x30   : > { %547 = vrot.lane.b32.xlu0 %v1526_v3, %s1686_s29  ;;  %v911_v3 = vrot.slane %v909_v56, 5  ;;  %v976_v20 = vor.u32 %v975_v10, %v972_v9  ;;  %v464_v56 = vrot.slane %v462_v50, 4  ;;  %v476_v60 = vshrl.u32 %v372_v55, 16  ;;  %v296_v0 = vld [vmem:[%s1742_s27 + $0x28] sm:$0xf] }
  0x31   : > { %549 = vrot.lane.b32.xlu1 %v1527_v6, %s1686_s29  ;;  %v958_v6 = vrot.slane %v956_v61, 4  ;;  %v467_v57 = vrot.slane %v465_v51, 5  ;;  %v479_v61 = vshll.u32 %v372_v55, 16  ;;  %305 = vst.msk [vmem:[#allocation2 + $0x14] sm:$0xf] %vm299_vm3, %v296_v0 }
  0x32   : > { %v912_v12 = vsel %vm1757_vm2, %v907_v2, %v911_v3  ;;  %v977_v28 = vrot.slane %v976_v20, 4  ;;  %v1521_v2 = vld [vmem:[%s1742_s27 + $0x80] sm:$0xf]  ;;  %v471_v3 = vshll.u32 %v371_v62, 16  ;;  %v478_v4 = vrot.slane %v476_v60, 4 }
  0x33   : > { %v962_v15 = vor.u32 %v961_v7, %v958_v6  ;;  %v468_v1 = vor.u32 %v467_v57, %v464_v56  ;;  %v481_v5 = vrot.slane %v479_v61, 5  ;;  %v373_v7 = vld [vmem:[%s1742_s27 + $0x3c] sm:$0x1]  ;;  %v1542_v10 = vld [vmem:[%s1742_s27 + $0xa0] sm:$0xf] }
  0x34   : > { %750 = vrot.lane.b32.xlu2 %v651_v13, %s1689_s8  ;;  %v1581_v13 = vld [vmem:[%s1742_s27 + $0x34] sm:$0x1]  ;;  %v473_v9 = vrot.slane %v471_v3, 5  ;;  %v1524_v11 = vld [vmem:[%s1742_s27 + $0xa0] sm:$0xf]  ;;  %v670_v17 = vshll.u32 %v1542_v10, 16 }
  0x35   : > { %v979_v22 = vshll.u32 %v1581_v13, 16  ;;  %v963_v24 = vrot.slane %v962_v15, 4  ;;  %v485_v13 = vshll.u32 %v373_v7, 16  ;;  %v667_v15 = vshrl.u32 %v1542_v10, 16  ;;  %v1533_v31 = vld [vmem:[%s1742_s27 + $0xf0] sm:$0xf] }
  0x36   : > { %v1551_v60 = vld [vmem:[%s1742_s27 + $0xc4] sm:$0x1]  ;;  %v1536_v61 = vld [vmem:[%s1742_s27 + $0x108] sm:$0xf]  ;;  %v1574_v7 = vld [vmem:[%s1742_s27 + $0x18] sm:$0xf] }
  0x37   : > { %v981_v29 = vrot.slane %v979_v22, 5  ;;  %v1544_v22 = vld [vmem:[%s1742_s27 + $0xa8] sm:$0xf]  ;;  %v669_v23 = vrot.slane %v667_v15, 4  ;;  %v732_v0 = vshll.u32 %v1551_v60, 16  ;;  %v931_v15 = vshll.u32 %v1574_v7, 16 }
  0x38   : > { %752 = vrot.lane.b32.xlu0 %v665_v16, %s1689_s8  ;;  %v965_v16 = vshll.u32 %v1579_v8, 16  ;;  %v469_v8 = vrot.slane %v468_v1, 4 }
  0x39   : > { %597 = vrot.lane.b32.xlu1 %v1534_v19, %s1688_s7  ;;  %v1566_v19 = vld [vmem:[%s1742_s27 + $0x70] sm:$0xf]  ;;  %v982_v36 = vsel %vm1757_vm2, %v977_v28, %v981_v29  ;;  %v684_v28 = vshll.u32 %v1544_v22, 16  ;;  %v1532_v29 = vld [vmem:[%s1742_s27 + $0xe8] sm:$0xf] }
  0x3a   : > { %v967_v25 = vrot.slane %v965_v16, 5  ;;  %v474_v16 = vsel %vm1757_vm2, %v469_v8, %v473_v9  ;;  %v734_v8 = vrot.slane %v732_v0, 5  ;;  %v1556_v9 = vld [vmem:[%s1742_s27 + $0x18] sm:$0xf] }
  0x3c   : > { %599 = vrot.lane.b32.xlu2 %v1535_v27, %s1688_s7  ;;  %v411_v27 = vrot.slane %v409_v18, 5  ;;  %v968_v34 = vsel %vm1757_vm2, %v963_v24, %v967_v25  ;;  %v1543_v24 = vld [vmem:[%s1742_s27 + $0xa4] sm:$0x1]  ;;  %v672_v25 = vrot.slane %v670_v17, 5 }
  0x3e   : > { %v412_v35 = vor.u32 %v411_v27, %v408_v26  ;;  %v681_v27 = vshrl.u32 %v1544_v22, 16  ;;  %v673_v32 = vor.u32 %v672_v25, %v669_v23 }
  0x40   : > { %800 = vrot.lane.b32.xlu0 %v1554_v30, %s1690_s9  ;;  %v1567_v30 = vld [vmem:[%s1742_s27 + $0x78] sm:$0xf]  ;;  %v413_v42 = vrot.slane %v412_v35, 4  ;;  %v674_v41 = vrot.slane %v673_v32, 4  ;;  %v1565_v32 = vld [vmem:[%s1742_s27 + $0x68] sm:$0xf] }
  0x41   : > { %802 = vrot.lane.b32.xlu1 %v1555_v33, %s1690_s9  ;;  %v363_v33 = vld [vmem:[%s1742_s27 + $0x14] sm:$0x1] }
  0x42   : > { %v415_v37 = vshll.u32 %v363_v33, 16  ;;  %v683_v33 = vrot.slane %v681_v27, 4 }
  0x44   : > { %758 = vrot.lane.b32.xlu2 %v707_v40, %s1689_s8  ;;  %v365_v40 = vld [vmem:[%s1742_s27 + $0x1c] sm:$0x1]  ;;  %v417_v45 = vrot.slane %v415_v37, 5 }
  0x45   : > { %v429_v47 = vshll.u32 %v365_v40, 16  ;;  %v1550_v40 = vld [vmem:[%s1742_s27 + $0xc0] sm:$0xf] }
  0x46   : > { %v418_v52 = vsel %vm1757_vm2, %v413_v42, %v417_v45  ;;  %v1528_v42 = vld [vmem:[%s1742_s27 + $0xc0] sm:$0xf]  ;;  %v1529_v45 = vld [vmem:[%s1742_s27 + $0xc8] sm:$0xf] }
  0x48   : > { %760 = vrot.lane.b32.xlu0 %v721_v43, %s1689_s8  ;;  %v1516_v43 = vld [vmem:[%s1742_s27 + $0x58] sm:$0xf] }
  0x49   : > { %850 = vrot.lane.b32.xlu1 %v1562_v46, %s1691_s10  ;;  %v426_v46 = vor.u32 %v425_v39, %v422_v38 }
  0x4b   : > { %v427_v53 = vrot.slane %v426_v46, 4  ;;  %v723_v46 = vshrl.u32 %v1550_v40, 16 }
  0x4c   : > { %852 = vrot.lane.b32.xlu2 %v1563_v54, %s1691_s10  ;;  %v431_v54 = vrot.slane %v429_v47, 5  ;;  %v726_v47 = vshll.u32 %v1550_v40, 16  ;;  %v1584_v40 = vld [vmem:[%s1742_s27 + $0x40] sm:$0xf] }
  0x4e   : > { %v432_v59 = vsel %vm1757_vm2, %v427_v53, %v431_v54  ;;  %v725_v54 = vrot.slane %v723_v46, 4  ;;  %v728_v55 = vrot.slane %v726_v47, 5  ;;  %v1056_v46 = vld [vmem:[%s2186_s1 + $0x10] sm:$0x3]  ;;  %v1561_v47 = vld [vmem:[%s1742_s27 + $0x40] sm:$0xf] }
  0x50   : > { %808 = vrot.lane.b32.xlu0 %v1558_v58, %s1690_s9  ;;  %v292_v58 = vld [vmem:[%s1742_s27 + $0x8] sm:$0xf]  ;;  %v729_v62 = vor.u32 %v728_v55, %v725_v54  ;;  %v1582_v55 = vld [vmem:[%s1742_s27 + $0x38] sm:$0xf] }
  0x51   : > { %810 = vrot.lane.b32.xlu1 %v1559_v63, %s1690_s9  ;;  %301 = vst.msk [vmem:[#allocation2 + $0x4] sm:$0xf] %vm299_vm3, %v292_v58  ;;  %v1520_v63 = vld [vmem:[%s1742_s27 + $0x78] sm:$0xf] }
  0x54   : > { %1011 = vrot.lane.b32.xlu2 %v912_v12, %s1692_s11  ;;  %v482_v12 = vor.u32 %v481_v5, %v478_v4  ;;  %v1553_v4 = vld [vmem:[%s1742_s27 + $0xcc] sm:$0x1] }
  0x56   : > { %v483_v18 = vrot.slane %v482_v12, 4 }
  0x58   : > { %1013 = vrot.lane.b32.xlu0 %v926_v14, %s1692_s11  ;;  %v1525_v14 = vld [vmem:[%s1742_s27 + $0xa8] sm:$0xf] }
  0x59   : > { %858 = vrot.lane.b32.xlu1 %v1566_v19, %s1691_s10  ;;  %v487_v19 = vrot.slane %v485_v13, 5  ;;  %v1557_v13 = vld [vmem:[%s1742_s27 + $0x20] sm:$0xf] }
  0x5b   : > { %v488_v26 = vsel %vm1757_vm2, %v483_v18, %v487_v19 }
  0x5c   : > { %860 = vrot.lane.b32.xlu2 %v1567_v30, %s1691_s10  ;;  %v676_v30 = vshll.u32 %v1543_v24, 16  ;;  %v933_v24 = vrot.slane %v931_v15, 5 }
  0x5e   : > { %v678_v39 = vrot.slane %v676_v30, 5  ;;  %v1564_v30 = vld [vmem:[%s1742_s27 + $0x60] sm:$0xf] }
  0x60   : > { %1019 = vrot.lane.b32.xlu0 %v968_v34, %s1692_s11  ;;  %v686_v34 = vrot.slane %v684_v28, 5  ;;  %v679_v48 = vsel %vm1757_vm2, %v674_v41, %v678_v39 }
  0x61   : > { %1021 = vrot.lane.b32.xlu1 %v982_v36, %s1692_s11  ;;  %v1545_v36 = vld [vmem:[%s1742_s27 + $0xac] sm:$0x1] }
  0x62   : > { %v690_v44 = vshll.u32 %v1545_v36, 16 }
  0x64   : > { %329 = vrot.lane.b32.xlu2 %v1516_v43, %s1685_s28  ;;  %v687_v43 = vor.u32 %v686_v34, %v683_v33  ;;  %v692_v50 = vrot.slane %v690_v44, 5 }
  0x68   : > { %331 = vrot.lane.b32.xlu0 %v1517_v49, %s1685_s28  ;;  %v688_v49 = vrot.slane %v687_v43, 4 }
  0x69   : > { %493 = vrot.lane.b32.xlu1 %v418_v52, %s1687_s30  ;;  %v1552_v52 = vld [vmem:[%s1742_s27 + $0xc8] sm:$0xf] }
  0x6a   : > { %v693_v56 = vsel %vm1757_vm2, %v688_v49, %v692_v50  ;;  %v737_v57 = vshrl.u32 %v1552_v52, 16  ;;  %v740_v58 = vshll.u32 %v1552_v52, 16  ;;  %v1001_v49 = vshll.u32 %v1584_v40, 16 }
  0x6b   : > { %v1086_v50 = vunpack.c.l.b16 %v1056_v46 }
  0x6c   : > { %495 = vrot.lane.b32.xlu2 %v432_v59, %s1687_s30  ;;  %v739_v1 = vrot.slane %v737_v57, 4  ;;  %v984_v57 = vshrl.u32 %v1582_v55, 16  ;;  %v1003_v60 = vrot.slane %v1001_v49, 5  ;;  %v1654_v49 = vld [vmem:[%s1742_s27 + $0xfc] sm:$0xf0] }
  0x6d   : > { %v1089_v54 = vpack.c.b16 %v1086_v50, %v1086_v50 }
  0x6e   : > { %v334_v6 = vpop.permute.xlu2 %333  ;;  %v986_v0 = vrot.slane %v984_v57, 4 }
  0x6f   : > { %354 = vst.msk [vmem:[#allocation2 + $0x10] sm:$0xf] %vm349_vm4, %v334_v6  ;;  %v730_v6 = vrot.slane %v729_v62, 4 }
  0x70   : > { %337 = vrot.lane.b32.xlu0 %v1520_v63, %s1685_s28  ;;  %v1537_v63 = vld [vmem:[%s1742_s27 + $0x110] sm:$0xf] }
  0x71   : > { %339 = vrot.lane.b32.xlu1 %v1521_v2, %s1685_s28  ;;  %v742_v2 = vrot.slane %v740_v58, 5  ;;  %v987_v58 = vshll.u32 %v1582_v55, 16  ;;  %v1652_v55 = vld [vmem:[%s1742_s27 + $0xdc] sm:$0xf0]  ;;  %s2077_s28 = scalar_lea.vmem %s2190_s5, %s1644_s20 }
  0x73   : > { %v743_v10 = vor.u32 %v742_v2, %v739_v1  ;;  %v989_v1 = vrot.slane %v987_v58, 5 }
  0x74   : > { %543 = vrot.lane.b32.xlu2 %v1524_v11, %s1686_s29  ;;  %v746_v11 = vshll.u32 %v1553_v4, 16 }
  0x75   : > { %v744_v17 = vrot.slane %v743_v10, 4 }
  0x76   : > { %v336_v20 = vpop.permute.xlu2 %335  ;;  %v748_v18 = vrot.slane %v746_v11, 5  ;;  %v1650_v11 = vld [vmem:[%s2186_s1] sm:$0xff] }
  0x77   : > { %355 = vst.msk [vmem:[#allocation2 + $0x14] sm:$0xf] %vm349_vm4, %v336_v20  ;;  %v1576_v20 = vld [vmem:[%s1742_s27 + $0x20] sm:$0xf] }
  0x78   : > { %545 = vrot.lane.b32.xlu0 %v1525_v14, %s1686_s29  ;;  %v928_v14 = vshrl.u32 %v1574_v7, 16  ;;  %v749_v25 = vsel %vm1757_vm2, %v744_v17, %v748_v18  ;;  %v945_v27 = vshll.u32 %v1576_v20, 16 }
  0x79   : > { %501 = vrot.lane.b32.xlu1 %v474_v16, %s1687_s30  ;;  %v735_v16 = vsel %vm1757_vm2, %v730_v6, %v734_v8  ;;  %v990_v6 = vor.u32 %v989_v1, %v986_v0  ;;  %v1568_v8 = vld [vmem:[%s1742_s27 + $0x80] sm:$0xf] }
  0x7a   : > { %v930_v23 = vrot.slane %v928_v14, 4 }
  0x7c   : > { %503 = vrot.lane.b32.xlu2 %v488_v26, %s1687_s30  ;;  %v942_v26 = vshrl.u32 %v1576_v20, 16 }
  0x7e   : > { %v498_v35 = vpop.permute.xlu2 %497  ;;  %v944_v34 = vrot.slane %v942_v26, 4  ;;  %v294_v26 = vld [vmem:[%s1742_s27 + $0x18] sm:$0xf] }
  0x7f   : > { %518 = vst.msk [vmem:[#allocation2 + $0x10] sm:$0xf] %vm513_vm5, %v498_v35  ;;  %v947_v35 = vrot.slane %v945_v27, 5 }
  0x80   : > { %593 = vrot.lane.b32.xlu0 %v1532_v29, %s1688_s7  ;;  %v1575_v29 = vld [vmem:[%s1742_s27 + $0x1c] sm:$0x1]  ;;  %303 = vst.msk [vmem:[#allocation2 + $0xc] sm:$0xf] %vm299_vm3, %v294_v26 }
  0x81   : > { %595 = vrot.lane.b32.xlu1 %v1533_v31, %s1688_s7  ;;  %v934_v31 = vor.u32 %v933_v24, %v930_v23  ;;  %v937_v33 = vshll.u32 %v1575_v29, 16  ;;  %v948_v43 = vor.u32 %v947_v35, %v944_v34  ;;  %v293_v23 = vld [vmem:[%s1742_s27 + $0x10] sm:$0xf]  ;;  %v1217_v34 = vld [vmem:[%s2187_s2] sm:$0x3] }
  0x82   : > { %v326_v37 = vpop.permute.xlu0 %325  ;;  %v542_v38 = vpop.permute.xlu1 %541  ;;  %302 = vst.msk [vmem:[#allocation2 + $0x8] sm:$0xf] %vm299_vm3, %v293_v23  ;;  %v297_v29 = vld [vmem:[%s1742_s27 + $0x30] sm:$0xf]  ;;  %v1252_v35 = vsel %vm1105_vm9, %v1217_v34, 0 }
  0x83   : > { %350 = vst.msk [vmem:[#allocation2] sm:$0xf] %vm349_vm4, %v326_v37  ;;  %v1577_v37 = vld [vmem:[%s1742_s27 + $0x24] sm:$0x1]  ;;  %v935_v39 = vrot.slane %v934_v31, 4  ;;  %v939_v41 = vrot.slane %v937_v33, 5  ;;  %1659 = vmatpush.bf16.msra.mxu3 %v1252_v35  ;;  %1261 = vmatpush.bf16.msra.mxu1 %v1252_v35 }
  0x84   : > { %551 = vrot.lane.b32.xlu2 %v1528_v42, %s1686_s29  ;;  %v1560_v42 = vld [vmem:[%s1742_s27 + $0x38] sm:$0xf]  ;;  %v951_v44 = vshll.u32 %v1577_v37, 16  ;;  %v949_v52 = vrot.slane %v948_v43, 4  ;;  %306 = vst.msk [vmem:[#allocation2 + $0x18] sm:$0xf] %vm299_vm3, %v297_v29 }
  0x85   : > { %v298_v31 = vld [vmem:[%s1742_s27 + $0x38] sm:$0xf]  ;;  %v1628_v37 = vld [vmem:[%s1742_s27 + $0xe8] sm:$0xf] }
  0x86   : > { %v592_v51 = vpop.permute.xlu2 %591  ;;  %307 = vst.msk [vmem:[#allocation2 + $0x1c] sm:$0xf] %vm299_vm3, %v298_v31 }
  0x88   : > { %553 = vrot.lane.b32.xlu0 %v1529_v45, %s1686_s29  ;;  %s1510_s29 = sshll.u32 %s2197_s22, 1 }
  0x89   : > { %754 = vrot.lane.b32.xlu1 %v679_v48, %s1689_s8  ;;  %v998_v48 = vshrl.u32 %v1584_v40, 16 }
  0x8a   : > { %v328_v53 = vpop.permute.xlu0 %327 }
  0x8b   : > { %351 = vst.msk [vmem:[#allocation2 + $0x4] sm:$0xf] %vm349_vm4, %v328_v53  ;;  %v490_v59 = vpop.permute.xlu1 %489  ;;  %v953_v53 = vrot.slane %v951_v44, 5 }
  0x8c   : > { %514 = vst.msk [vmem:[#allocation2] sm:$0xf] %vm513_vm5, %v490_v59  ;;  %756 = vrot.lane.b32.xlu2 %v693_v56, %s1689_s8  ;;  %v1000_v59 = vrot.slane %v998_v48, 4  ;;  %v1632_v48 = vld [vmem:[%s1742_s27 + $0xf8] sm:$0xf] }
  0x8d   : > { %v954_v2 = vsel %vm1757_vm2, %v949_v52, %v953_v53  ;;  %v1633_v50 = vor.u32 %v1654_v49, %v1632_v48 }
  0x8e   : > { %v751_v3 = vpop.permute.xlu2 %750 }
  0x90   : > { %601 = vrot.lane.b32.xlu0 %v1536_v61, %s1688_s7  ;;  %v1107_v61 = vsel %vm1105_vm9, %v1089_v54, 0  ;;  %v1624_v54 = vld [vmem:[%s1742_s27 + $0xd8] sm:$0xf] }
  0x91   : > { %603 = vrot.lane.b32.xlu1 %v1537_v63, %s1688_s7  ;;  %v1585_v63 = vld [vmem:[%s1742_s27 + $0x44] sm:$0x1]  ;;  %1114 = vmatpush.bf16.msra.mxu0 %v1107_v61 }
  0x92   : > { %v540_v5 = vpop.permute.xlu0 %539  ;;  %1656 = vmatpush.bf16.msra.mxu2 %v1107_v61  ;;  %v1007_v10 = vshll.u32 %v1585_v63, 16  ;;  %v1655_v61 = vld [vmem:[%s1742_s27 + $0x10c] sm:$0xf0] }
  0x93   : > { %564 = vst.msk [vmem:[#allocation2] sm:$0xf] %vm563_vm6, %v540_v5  ;;  %v492_v12 = vpop.permute.xlu1 %491  ;;  %v1651_v5 = vld [vmem:[%s2186_s1 + $0x8] sm:$0xff] }
  0x94   : > { %515 = vst.msk [vmem:[#allocation2 + $0x4] sm:$0xf] %vm513_vm5, %v492_v12  ;;  %804 = vrot.lane.b32.xlu2 %v1556_v9, %s1690_s9  ;;  %v1004_v9 = vor.u32 %v1003_v60, %v1000_v59  ;;  %v1569_v12 = vld [vmem:[%s1742_s27 + $0x88] sm:$0xf]  ;;  %v1009_v17 = vrot.slane %v1007_v10, 5 }
  0x95   : > { %565 = vst.msk [vmem:[#allocation2 + $0x4] sm:$0xf] %vm563_vm6, %v542_v38  ;;  %1115 = vmatpush.bf16.msra.mxu0 %v1651_v5  ;;  %v1636_v60 = vld [vmem:[%s1742_s27 + $0x108] sm:$0xf] }
  0x96   : > { %615 = vst.msk [vmem:[#allocation2 + $0x4] sm:$0xf] %vm613_vm7, %v592_v51  ;;  %v600_v19 = vpop.permute.xlu2 %599  ;;  %v940_v51 = vsel %vm1757_vm2, %v935_v39, %v939_v41  ;;  %1657 = vmatpush.bf16.msra.mxu2 %v1651_v5 }
  0x98   : > { %806 = vrot.lane.b32.xlu0 %v1557_v13, %s1690_s9  ;;  %v991_v13 = vrot.slane %v990_v6, 4 }
  0x99   : > { %762 = vrot.lane.b32.xlu1 %v735_v16, %s1689_s8  ;;  %v1005_v16 = vrot.slane %v1004_v9, 4  ;;  %1116 = vmatpush.bf16.msra.mxu0 %v1650_v11 }
  0x9a   : > { %v500_v22 = vpop.permute.xlu0 %499  ;;  %1658 = vmatpush.bf16.msra.mxu2 %v1650_v11 }
  0x9b   : > { %519 = vst.msk [vmem:[#allocation2 + $0x14] sm:$0xf] %vm513_vm5, %v500_v22  ;;  %v590_v28 = vpop.permute.xlu1 %589  ;;  %v1010_v22 = vsel %vm1757_vm2, %v1005_v16, %v1009_v17 }
  0x9c   : > { %614 = vst.msk [vmem:[#allocation2] sm:$0xf] %vm613_vm7, %v590_v28  ;;  %764 = vrot.lane.b32.xlu2 %v749_v25, %s1689_s8  ;;  %s289_s8 = scalar_lea.vmem %s2191_s6, %s1510_s29 }
  0x9d   : > { %775 = vst.msk [vmem:[#allocation2] sm:$0xf] %vm774_vm8, %v751_v3  ;;  %v1583_v3 = vld [vmem:[%s1742_s27 + $0x3c] sm:$0x1] }
  0x9e   : > { %v759_v36 = vpop.permute.xlu2 %758  ;;  %v993_v7 = vshll.u32 %v1583_v3, 16 }
  0xa0   : > { %854 = vrot.lane.b32.xlu0 %v1564_v30, %s1691_s10  ;;  %v995_v14 = vrot.slane %v993_v7, 5 }
  0xa1   : > { %856 = vrot.lane.b32.xlu1 %v1565_v32, %s1691_s10 }
  0xa2   : > { %v548_v38 = vpop.permute.xlu0 %547 }
  0xa3   : > { %568 = vst.msk [vmem:[#allocation2 + $0x10] sm:$0xf] %vm563_vm6, %v548_v38  ;;  %v550_v45 = vpop.permute.xlu1 %549  ;;  %v1653_v38 = vld [vmem:[%s1742_s27 + $0xec] sm:$0xf0] }
  0xa4   : > { %569 = vst.msk [vmem:[#allocation2 + $0x14] sm:$0xf] %vm563_vm6, %v550_v45  ;;  %812 = vrot.lane.b32.xlu2 %v1560_v42, %s1690_s9  ;;  %v1629_v39 = vor.u32 %v1653_v38, %v1628_v37 }
  0xa5   : > { %619 = vst.msk [vmem:[#allocation2 + $0x14] sm:$0xf] %vm613_vm7, %v600_v19  ;;  %v996_v19 = vsel %vm1757_vm2, %v991_v13, %v995_v14 }
  0xa6   : > { %v853_v56 = vpop.permute.xlu2 %852  ;;  %1639 = vmatmul.msk.bf16.vlgmr.msra.gmra.mxu3 %vm1238_vm13, %v1629_v39 }
  0xa8   : > { %814 = vrot.lane.b32.xlu0 %v1561_v47, %s1690_s9 }
  0xa9   : > { %1015 = vrot.lane.b32.xlu1 %v940_v51, %s1692_s11 }
  0xaa   : > { %v753_v62 = vpop.permute.xlu0 %752 }
  0xab   : > { %776 = vst.msk [vmem:[#allocation2 + $0x4] sm:$0xf] %vm774_vm8, %v753_v62  ;;  %v598_v4 = vpop.permute.xlu1 %597  ;;  %v1637_v62 = vor.u32 %v1655_v61, %v1636_v60 }
  0xac   : > { %618 = vst.msk [vmem:[#allocation2 + $0x10] sm:$0xf] %vm613_vm7, %v598_v4  ;;  %1017 = vrot.lane.b32.xlu2 %v954_v2, %s1692_s11 }
  0xad   : > { %779 = vst.msk [vmem:[#allocation2 + $0x10] sm:$0xf] %vm774_vm8, %v759_v36 }
  0xae   : > { %v1012_v15 = vpop.permute.xlu2 %1011 }
  0xb0   : > { %862 = vrot.lane.b32.xlu0 %v1568_v8, %s1691_s10 }
  0xb1   : > { %864 = vrot.lane.b32.xlu1 %v1569_v12, %s1691_s10 }
  0xb2   : > { %v801_v18 = vpop.permute.xlu0 %800 }
  0xb3   : > { %825 = vst.msk [vmem:[#allocation2] sm:$0xf] %vm824_vm10, %v801_v18  ;;  %v803_v20 = vpop.permute.xlu1 %802 }
  0xb4   : > { %826 = vst.msk [vmem:[#allocation2 + $0x4] sm:$0xf] %vm824_vm10, %v803_v20  ;;  %1023 = vrot.lane.b32.xlu2 %v996_v19, %s1692_s11 }
  0xb5   : > { %876 = vst.msk [vmem:[#allocation2 + $0x4] sm:$0xf] %vm874_vm11, %v853_v56  ;;  %v1625_v56 = vor.u32 %v1652_v55, %v1624_v54 }
  0xb6   : > { %v861_v24 = vpop.permute.xlu2 %860  ;;  %1640 = vmatmul.msk.bf16.gmra.mxu3 %vm1238_vm13, %v1633_v50 }
  0xb7   : > { %1638 = vmatmul.msk.bf16.vlgmr.msra.gmra.mxu1 %vm1238_vm13, %v1625_v56 }
  0xb8   : > { %1025 = vrot.lane.b32.xlu0 %v1010_v22, %s1692_s11  ;;  %s280_s11 = scalar_lea.vmem %s2189_s4, %s1510_s29 }
  0xba   : > { %v761_v25 = vpop.permute.xlu0 %760 }
  0xbb   : > { %780 = vst.msk [vmem:[#allocation2 + $0x14] sm:$0xf] %vm774_vm8, %v761_v25  ;;  %v851_v27 = vpop.permute.xlu1 %850 }
  0xbc   : > { %875 = vst.msk [vmem:[#allocation2] sm:$0xf] %vm874_vm11, %v851_v27 }
  0xbd   : > { %1036 = vst.msk [vmem:[#allocation2] sm:$0xf] %vm1035_vm12, %v1012_v15 }
  0xbe   : > { %v330_v21 = vpop.permute.xlu2 %329 }
  0xbf   : > { %352 = vst.msk [vmem:[#allocation2 + $0x8] sm:$0xf] %vm349_vm4, %v330_v21 }
  0xc2   : > { %v809_v28 = vpop.permute.xlu0 %808 }
  0xc3   : > { %829 = vst.msk [vmem:[#allocation2 + $0x10] sm:$0xf] %vm824_vm10, %v809_v28  ;;  %v811_v30 = vpop.permute.xlu1 %810 }
  0xc4   : > { %830 = vst.msk [vmem:[#allocation2 + $0x14] sm:$0xf] %vm824_vm10, %v811_v30 }
  0xc5   : > { %880 = vst.msk [vmem:[#allocation2 + $0x14] sm:$0xf] %vm874_vm11, %v861_v24 }
  0xc6   : > { %v496_v32 = vpop.permute.xlu2 %495  ;;  %1641 = vmatmul.msk.bf16.gmra.mxu3 %vm1238_vm13, %v1637_v62 }
  0xca   : > { %v1014_v33 = vpop.permute.xlu0 %1013 }
  0xcb   : > { %1037 = vst.msk [vmem:[#allocation2 + $0x4] sm:$0xf] %vm1035_vm12, %v1014_v33  ;;  %v859_v36 = vpop.permute.xlu1 %858 }
  0xcc   : > { %879 = vst.msk [vmem:[#allocation2 + $0x10] sm:$0xf] %vm874_vm11, %v859_v36 }
  0xce   : > { %v544_v40 = vpop.permute.xlu2 %543 }
  0xd2   : > { %v1020_v41 = vpop.permute.xlu0 %1019  ;;  %v1646_v42 = vld [vmem:[#allocation2] sm:$0xff] }
  0xd3   : > { %1040 = vst.msk [vmem:[#allocation2 + $0x10] sm:$0xf] %vm1035_vm12, %v1020_v41  ;;  %v1022_v43 = vpop.permute.xlu1 %1021  ;;  %1610 = vmatmul.msk.bf16.vlgmr.msra.gmra.mxu0 %vm1092_vm14, %v1646_v42 }
  0xd4   : > { %1041 = vst.msk [vmem:[#allocation2 + $0x14] sm:$0xf] %vm1035_vm12, %v1022_v43 }
  0xd6   : > { %v504_v44 = vpop.permute.xlu2 %503 }
  0xda   : > { %v332_v45 = vpop.permute.xlu0 %331 }
  0xdb   : > { %353 = vst.msk [vmem:[#allocation2 + $0xc] sm:$0xf] %vm349_vm4, %v332_v45  ;;  %v494_v46 = vpop.permute.xlu1 %493  ;;  %v1648_v47 = vld [vmem:[#allocation2 + $0x10] sm:$0xff] }
  0xdc   : > { %517 = vst.msk [vmem:[#allocation2 + $0xc] sm:$0xf] %vm513_vm5, %v496_v32  ;;  %1612 = vmatmul.msk.bf16.vlgmr.msra.gmra.mxu2 %vm1092_vm14, %v1648_v47 }
  0xdd   : > { %516 = vst.msk [vmem:[#allocation2 + $0x8] sm:$0xf] %vm513_vm5, %v494_v46 }
  0xde   : > { %566 = vst.msk [vmem:[#allocation2 + $0x8] sm:$0xf] %vm563_vm6, %v544_v40  ;;  %v552_v51 = vpop.permute.xlu2 %551 }
  0xe2   : > { %v338_v52 = vpop.permute.xlu0 %337 }
  0xe3   : > { %356 = vst.msk [vmem:[#allocation2 + $0x18] sm:$0xf] %vm349_vm4, %v338_v52  ;;  %v340_v53 = vpop.permute.xlu1 %339 }
  0xe4   : > { %357 = vst.msk [vmem:[#allocation2 + $0x1c] sm:$0xf] %vm349_vm4, %v340_v53 }
  0xe5   : > { %521 = vst.msk [vmem:[#allocation2 + $0x1c] sm:$0xf] %vm513_vm5, %v504_v44 }
  0xe6   : > { %v757_v58 = vpop.permute.xlu2 %756 }
  0xea   : > { %v546_v57 = vpop.permute.xlu0 %545 }
  0xeb   : > { %567 = vst.msk [vmem:[#allocation2 + $0xc] sm:$0xf] %vm563_vm6, %v546_v57  ;;  %v502_v59 = vpop.permute.xlu1 %501 }
  0xec   : > { %520 = vst.msk [vmem:[#allocation2 + $0x18] sm:$0xf] %vm513_vm5, %v502_v59 }
  0xed   : > { %570 = vst.msk [vmem:[#allocation2 + $0x18] sm:$0xf] %vm563_vm6, %v552_v51 }
  0xee   : > { %v805_v1 = vpop.permute.xlu2 %804 }
  0xf2   : > { %v594_v63 = vpop.permute.xlu0 %593 }
  0xf3   : > { %616 = vst.msk [vmem:[#allocation2 + $0x8] sm:$0xf] %vm613_vm7, %v594_v63  ;;  %v596_v0 = vpop.permute.xlu1 %595 }
  0xf4   : > { %617 = vst.msk [vmem:[#allocation2 + $0xc] sm:$0xf] %vm613_vm7, %v596_v0 }
  0xf5   : > { %778 = vst.msk [vmem:[#allocation2 + $0xc] sm:$0xf] %vm774_vm8, %v757_v58 }
  0xf6   : > { %v765_v4 = vpop.permute.xlu2 %764 }
  0xfa   : > { %v554_v2 = vpop.permute.xlu0 %553 }
  0xfb   : > { %571 = vst.msk [vmem:[#allocation2 + $0x1c] sm:$0xf] %vm563_vm6, %v554_v2  ;;  %v755_v3 = vpop.permute.xlu1 %754 }
  0xfc   : > { %777 = vst.msk [vmem:[#allocation2 + $0x8] sm:$0xf] %vm774_vm8, %v755_v3 }
  0xfd   : > { %827 = vst.msk [vmem:[#allocation2 + $0x8] sm:$0xf] %vm824_vm10, %v805_v1 }
  0xfe   : > { %v813_v7 = vpop.permute.xlu2 %812 }
 0x102   : > { %v602_v5 = vpop.permute.xlu0 %601 }
 0x103   : > { %620 = vst.msk [vmem:[#allocation2 + $0x18] sm:$0xf] %vm613_vm7, %v602_v5  ;;  %v604_v6 = vpop.permute.xlu1 %603 }
 0x104   : > { %621 = vst.msk [vmem:[#allocation2 + $0x1c] sm:$0xf] %vm613_vm7, %v604_v6 }
 0x105   : > { %782 = vst.msk [vmem:[#allocation2 + $0x1c] sm:$0xf] %vm774_vm8, %v765_v4 }
 0x106   : > { %v1018_v11 = vpop.permute.xlu2 %1017 }
 0x10a   : > { %v807_v8 = vpop.permute.xlu0 %806 }
 0x10b   : > { %828 = vst.msk [vmem:[#allocation2 + $0xc] sm:$0xf] %vm824_vm10, %v807_v8  ;;  %v763_v9 = vpop.permute.xlu1 %762 }
 0x10c   : > { %781 = vst.msk [vmem:[#allocation2 + $0x18] sm:$0xf] %vm774_vm8, %v763_v9 }
 0x10d   : > { %831 = vst.msk [vmem:[#allocation2 + $0x18] sm:$0xf] %vm824_vm10, %v813_v7 }
 0x10e   : > { %v1024_v15 = vpop.permute.xlu2 %1023 }
 0x112   : > { %v855_v10 = vpop.permute.xlu0 %854 }
 0x113   : > { %877 = vst.msk [vmem:[#allocation2 + $0x8] sm:$0xf] %vm874_vm11, %v855_v10  ;;  %v857_v12 = vpop.permute.xlu1 %856 }
 0x114   : > { %878 = vst.msk [vmem:[#allocation2 + $0xc] sm:$0xf] %vm874_vm11, %v857_v12 }
 0x115   : > { %1039 = vst.msk [vmem:[#allocation2 + $0xc] sm:$0xf] %vm1035_vm12, %v1018_v11 }
 0x11a   : > { %v815_v13 = vpop.permute.xlu0 %814 }
 0x11b   : > { %832 = vst.msk [vmem:[#allocation2 + $0x1c] sm:$0xf] %vm824_vm10, %v815_v13  ;;  %v1016_v14 = vpop.permute.xlu1 %1015 }
 0x11c   : > { %1038 = vst.msk [vmem:[#allocation2 + $0x8] sm:$0xf] %vm1035_vm12, %v1016_v14 }
 0x122   : > { %v863_v16 = vpop.permute.xlu0 %862 }
 0x123   : > { %881 = vst.msk [vmem:[#allocation2 + $0x18] sm:$0xf] %vm874_vm11, %v863_v16  ;;  %v1647_v17 = vld [vmem:[#allocation2 + $0x8] sm:$0xff]  ;;  %v865_v18 = vpop.permute.xlu1 %864 }
 0x124   : > { %1042 = vst.msk [vmem:[#allocation2 + $0x18] sm:$0xf] %vm1035_vm12, %v1024_v15  ;;  %1611 = vmatmul.msk.bf16.gmra.mxu0 %vm1092_vm14, %v1647_v17 }
 0x125   : > { %882 = vst.msk [vmem:[#allocation2 + $0x1c] sm:$0xf] %vm874_vm11, %v865_v18 }
 0x129   : > { %v1268_v24 = vpop.f32.mrf.mxu3 }
 0x12a   : > { %v1026_v19 = vpop.permute.xlu0 %1025  ;;  %v1285_v25 = vpack.c.bf16 %v1268_v24, %v1268_v24  ;;  %v1323_v39 = vmul.f32 %v1268_v24, %v1268_v24  ;;  %v1302_v42 = vsel %vm1155_vm0, %v1268_v24, 0.0 }
 0x12b   : > { %1043 = vst.msk [vmem:[#allocation2 + $0x1c] sm:$0xf] %vm1035_vm12, %v1026_v19 }
 0x12c   : > { %1293 = vst.msk [vmem:[%s2077_s28 + $0x8] sm:$0xf] %vm1146_vm15, %v1285_v25  ;;  %v1332_v50 = vsel %vm1155_vm0, %v1323_v39, 0.0 }
 0x131   : > { %v1270_v21 = vpop.f32.mrf.mxu3 }
 0x132   : > { %v1649_v20 = vld [vmem:[#allocation2 + $0x18] sm:$0xff]  ;;  %v1286_v28 = vpack.c.bf16 %v1270_v21, %v1270_v21  ;;  %v1324_v43 = vmul.f32 %v1270_v21, %v1270_v21  ;;  %v1304_v51 = vsel %vm1155_vm0, %v1270_v21, 0.0 }
 0x133   : > { %1613 = vmatmul.msk.bf16.gmra.mxu2 %vm1092_vm14, %v1649_v20 }
 0x134   : > { %1294 = vst.msk [vmem:[%s2077_s28 + $0xc] sm:$0xf] %vm1146_vm15, %v1286_v28  ;;  %v1263_v33 = vpop.f32.mrf.mxu1  ;;  %v1334_v56 = vsel %vm1155_vm0, %v1324_v43, 0.0 }
 0x135   : > { %v1283_v34 = vpack.c.bf16 %v1263_v33, %v1263_v33  ;;  %v1321_v37 = vmul.f32 %v1263_v33, %v1263_v33  ;;  %v1299_v40 = vsel %vm1155_vm0, %v1263_v33, 0.0 }
 0x137   : > { %1291 = vst.msk [vmem:[%s2077_s28] sm:$0xf] %vm1146_vm15, %v1283_v34  ;;  %v1329_v45 = vsel %vm1155_vm0, %v1321_v37, 0.0 }
 0x139   : > { %v1273_v31 = vpop.f32.mrf.mxu3 }
 0x13a   : > { %v1287_v32 = vpack.c.bf16 %v1273_v31, %v1273_v31  ;;  %v1325_v52 = vmul.f32 %v1273_v31, %v1273_v31  ;;  %v1306_v57 = vsel %vm1155_vm0, %v1273_v31, 0.0 }
 0x13c   : > { %1295 = vst.msk [vmem:[%s2077_s28 + $0x10] sm:$0xf] %vm1146_vm15, %v1287_v32  ;;  %v1265_v44 = vpop.f32.mrf.mxu1  ;;  %v1336_v62 = vsel %vm1155_vm0, %v1325_v52, 0.0 }
 0x13d   : > { %v1284_v46 = vpack.c.bf16 %v1265_v44, %v1265_v44  ;;  %v1300_v47 = vsel %vm1155_vm0, %v1265_v44, 0.0  ;;  %v1322_v48 = vmul.f32 %v1265_v44, %v1265_v44 }
 0x13e   : > { %v1301_v49 = vadd.f32 %v1300_v47, %v1299_v40 }
 0x13f   : > { %1292 = vst.msk [vmem:[%s2077_s28 + $0x4] sm:$0xf] %vm1146_vm15, %v1284_v46  ;;  %v1330_v53 = vsel %vm1155_vm0, %v1322_v48, 0.0 }
 0x140   : > { %v1303_v54 = vadd.f32 %v1302_v42, %v1301_v49  ;;  %v1331_v55 = vadd.f32 %v1330_v53, %v1329_v45 }
 0x141   : > { %v1275_v38 = vpop.f32.mrf.mxu3 }
 0x142   : > { %v1288_v41 = vpack.c.bf16 %v1275_v38, %v1275_v38  ;;  %v1326_v58 = vmul.f32 %v1275_v38, %v1275_v38  ;;  %v1305_v59 = vadd.f32 %v1304_v51, %v1303_v54  ;;  %v1333_v60 = vadd.f32 %v1332_v50, %v1331_v55 }
 0x143   : > { %v1308_v63 = vsel %vm1155_vm0, %v1275_v38, 0.0 }
 0x144   : > { %1296 = vst.msk [vmem:[%s2077_s28 + $0x14] sm:$0xf] %vm1146_vm15, %v1288_v41  ;;  %v1335_v2 = vadd.f32 %v1334_v56, %v1333_v60  ;;  %v1307_v3 = vadd.f32 %v1306_v57, %v1305_v59  ;;  %v1338_v4 = vsel %vm1155_vm0, %v1326_v58, 0.0 }
 0x146   : > { %v1309_v6 = vadd.f32 %v1308_v63, %v1307_v3  ;;  %v1337_v7 = vadd.f32 %v1336_v62, %v1335_v2 }
 0x148   : > { %v1339_v10 = vadd.f32 %v1338_v4, %v1337_v7 }
 0x149   : > { %v1278_v61 = vpop.f32.mrf.mxu3 }
 0x14a   : > { %v1289_v0 = vpack.c.bf16 %v1278_v61, %v1278_v61  ;;  %v1327_v1 = vmul.f32 %v1278_v61, %v1278_v61  ;;  %v1310_v5 = vsel %vm1155_vm0, %v1278_v61, 0.0 }
 0x14b   : > { %v1311_v9 = vadd.f32 %v1310_v5, %v1309_v6 }
 0x14c   : > { %1297 = vst.msk [vmem:[%s2077_s28 + $0x18] sm:$0xf] %vm1146_vm15, %v1289_v0  ;;  %v1340_v8 = vsel %vm1155_vm0, %v1327_v1, 0.0 }
 0x14d   : > { %v1341_v11 = vadd.f32 %v1340_v8, %v1339_v10 }
 0x150   : > { %v2070_v22 = vpop.f32.mrf.mxu0 }
 0x151   : > { %v1138_v23 = vpack.c.bf16 %v2070_v22, %v2070_v22  ;;  %v1280_v12 = vpop.f32.mrf.mxu3  ;;  %v1179_v38 = vmul.f32 %v2070_v22, %v2070_v22  ;;  %v1156_v41 = vsel %vm1155_vm0, %v2070_v22, 0.0 }
 0x152   : > { %v1290_v13 = vpack.c.bf16 %v1280_v12, %v1280_v12  ;;  %v1312_v14 = vsel %vm1155_vm0, %v1280_v12, 0.0  ;;  %v1328_v15 = vmul.f32 %v1280_v12, %v1280_v12 }
 0x153   : > { %1147 = vst.msk [vmem:[%s2068_s25] sm:$0xf] %vm1146_vm15, %v1138_v23  ;;  %v1313_v16 = vadd.f32 %v1312_v14, %v1311_v9  ;;  %v1187_v45 = vsel %vm1155_vm0, %v1179_v38, 0.0 }
 0x154   : > { %1298 = vst.msk [vmem:[%s2077_s28 + $0x1c] sm:$0xf] %vm1146_vm15, %v1290_v13  ;;  %v1342_v17 = vsel %vm1155_vm0, %v1328_v15, 0.0 }
 0x155   : > { %v1314_v18 = vrot.slane %v1313_v16, 4  ;;  %v1343_v19 = vadd.f32 %v1342_v17, %v1341_v11 }
 0x157   : > { %v1315_v20 = vadd.f32 %v1314_v18, %v1313_v16  ;;  %v1344_v23 = vrot.slane %v1343_v19, 4 }
 0x158   : > { %v2083_v26 = vpop.f32.mrf.mxu0 }
 0x159   : > { %v1139_v27 = vpack.c.bf16 %v2083_v26, %v2083_v26  ;;  %v1316_v24 = vrot.slane %v1315_v20, 2  ;;  %v1345_v25 = vadd.f32 %v1344_v23, %v1343_v19  ;;  %v1157_v39 = vsel %vm1155_vm0, %v2083_v26, 0.0 }
 0x15a   : > { %v1158_v44 = vadd.f32 %v1157_v39, %v1156_v41 }
 0x15b   : > { %1148 = vst.msk [vmem:[%s2068_s25 + $0x4] sm:$0xf] %vm1146_vm15, %v1139_v27  ;;  %v1317_v27 = vadd.f32 %v1316_v24, %v1315_v20  ;;  %v1346_v21 = vrot.slane %v1345_v25, 2 }
 0x15d   : > { %v1318_v28 = vrot.slane %v1317_v27, 1 }
 0x15f   : > { %v2091_v29 = vpop.f32.mrf.mxu2  ;;  %v1319_v31 = vadd.f32 %v1318_v28, %v1317_v27 }
 0x160   : > { %v1142_v30 = vpack.c.bf16 %v2091_v29, %v2091_v29  ;;  %v1163_v54 = vsel %vm1155_vm0, %v2091_v29, 0.0 }
 0x161   : > { %1320 = vst.msk [vmem:[%s289_s8] sm:$0x1] %vm1177_vm1, %v1319_v31 }
 0x162   : > { %1151 = vst.msk [vmem:[%s2068_s25 + $0x10] sm:$0xf] %vm1146_vm15, %v1142_v30  ;;  %v1347_v30 = vadd.f32 %v1346_v21, %v1345_v25 }
 0x164   : > { %v1348_v32 = vrot.slane %v1347_v30, 1 }
 0x166   : > { %v1349_v33 = vadd.f32 %v1348_v32, %v1347_v30 }
 0x167   : > { %v2101_v35 = vpop.f32.mrf.mxu2 }
 0x168   : > { %v1143_v36 = vpack.c.bf16 %v2101_v35, %v2101_v35  ;;  %1350 = vst.msk [vmem:[%s289_s8 + $0x1] sm:$0x1] %vm1177_vm1, %v1349_v33  ;;  %v1184_v62 = vmul.f32 %v2101_v35, %v2101_v35 }
 0x16a   : > { %1152 = vst.msk [vmem:[%s2068_s25 + $0x14] sm:$0xf] %vm1146_vm15, %v1143_v36  ;;  %v1180_v36 = vmul.f32 %v2083_v26, %v2083_v26  ;;  %v1183_v26 = vmul.f32 %v2091_v29, %v2091_v29  ;;  %v1165_v29 = vsel %vm1155_vm0, %v2101_v35, 0.0  ;;  %v1196_v2 = vsel %vm1155_vm0, %v1184_v62, 0.0 }
 0x16c   : > { %v1188_v42 = vsel %vm1155_vm0, %v1180_v36, 0.0  ;;  %v1194_v58 = vsel %vm1155_vm0, %v1183_v26, 0.0 }
 0x16d   : > { %v1189_v47 = vadd.f32 %v1188_v42, %v1187_v45 }
 0x1a1   : > { %v1123_v34 = vpop.f32.mrf.mxu0 }
 0x1a2   : > { %v1140_v37 = vpack.c.bf16 %v1123_v34, %v1123_v34  ;;  %v1181_v40 = vmul.f32 %v1123_v34, %v1123_v34  ;;  %v1159_v43 = vsel %vm1155_vm0, %v1123_v34, 0.0 }
 0x1a3   : > { %v1160_v48 = vadd.f32 %v1159_v43, %v1158_v44 }
 0x1a4   : > { %1149 = vst.msk [vmem:[%s2068_s25 + $0x8] sm:$0xf] %vm1146_vm15, %v1140_v37  ;;  %v1190_v46 = vsel %vm1155_vm0, %v1181_v40, 0.0 }
 0x1a5   : > { %v1191_v52 = vadd.f32 %v1190_v46, %v1189_v47 }
 0x1a9   : > { %v1125_v49 = vpop.f32.mrf.mxu0 }
 0x1aa   : > { %v1141_v50 = vpack.c.bf16 %v1125_v49, %v1125_v49  ;;  %v1161_v22 = vsel %vm1155_vm0, %v1125_v49, 0.0  ;;  %v1182_v51 = vmul.f32 %v1125_v49, %v1125_v49 }
 0x1ab   : > { %v1162_v53 = vadd.f32 %v1161_v22, %v1160_v48 }
 0x1ac   : > { %1150 = vst.msk [vmem:[%s2068_s25 + $0xc] sm:$0xf] %vm1146_vm15, %v1141_v50  ;;  %v1192_v55 = vsel %vm1155_vm0, %v1182_v51, 0.0 }
 0x1ad   : > { %v1164_v56 = vadd.f32 %v1163_v54, %v1162_v53  ;;  %v1193_v57 = vadd.f32 %v1192_v55, %v1191_v52 }
 0x1af   : > { %v1195_v59 = vadd.f32 %v1194_v58, %v1193_v57  ;;  %v1166_v1 = vadd.f32 %v1165_v29, %v1164_v56 }
 0x1b1   : > { %v1197_v5 = vadd.f32 %v1196_v2, %v1195_v59 }
 0x1b6   : > { %v1133_v60 = vpop.f32.mrf.mxu2 }
 0x1b7   : > { %v1144_v61 = vpack.c.bf16 %v1133_v60, %v1133_v60  ;;  %v1185_v63 = vmul.f32 %v1133_v60, %v1133_v60  ;;  %v1167_v0 = vsel %vm1155_vm0, %v1133_v60, 0.0 }
 0x1b8   : > { %v1168_v4 = vadd.f32 %v1167_v0, %v1166_v1 }
 0x1b9   : > { %1153 = vst.msk [vmem:[%s2068_s25 + $0x18] sm:$0xf] %vm1146_vm15, %v1144_v61  ;;  %v1198_v3 = vsel %vm1155_vm0, %v1185_v63, 0.0 }
 0x1ba   : > { %v1199_v10 = vadd.f32 %v1198_v3, %v1197_v5 }
 0x1be   : > { %v1135_v6 = vpop.f32.mrf.mxu2 }
 0x1bf   : > { %v1145_v7 = vpack.c.bf16 %v1135_v6, %v1135_v6  ;;  %v1169_v8 = vsel %vm1155_vm0, %v1135_v6, 0.0  ;;  %v1186_v9 = vmul.f32 %v1135_v6, %v1135_v6 }
 0x1c0   : > { %v1170_v11 = vadd.f32 %v1169_v8, %v1168_v4 }
 0x1c1   : > { %1154 = vst.msk [vmem:[%s2068_s25 + $0x1c] sm:$0xf] %vm1146_vm15, %v1145_v7  ;;  %v1200_v35 = vsel %vm1155_vm0, %v1186_v9, 0.0 }
 0x1c2   : > { %v1171_v12 = vrot.slane %v1170_v11, 4  ;;  %v1201_v13 = vadd.f32 %v1200_v35, %v1199_v10 }
 0x1c4   : > { %v1172_v14 = vadd.f32 %v1171_v12, %v1170_v11  ;;  %v1202_v15 = vrot.slane %v1201_v13, 4 }
 0x1c6   : > { %v1173_v16 = vrot.slane %v1172_v14, 2  ;;  %v1203_v17 = vadd.f32 %v1202_v15, %v1201_v13 }
 0x1c8   : > { %v1174_v18 = vadd.f32 %v1173_v16, %v1172_v14  ;;  %v1204_v19 = vrot.slane %v1203_v17, 2 }
 0x1ca   : > { %v1175_v20 = vrot.slane %v1174_v18, 1  ;;  %v1205_v23 = vadd.f32 %v1204_v19, %v1203_v17 }
 0x1cc   : > { %v1176_v24 = vadd.f32 %v1175_v20, %v1174_v18  ;;  %v1206_v25 = vrot.slane %v1205_v23, 1 }
 0x1ce   : > { %1178 = vst.msk [vmem:[%s280_s11] sm:$0x1] %vm1177_vm1, %v1176_v24  ;;  %v1207_v27 = vadd.f32 %v1206_v25, %v1205_v23 }
 0x1d0   : > { %1208 = vst.msk [vmem:[%s280_s11 + $0x1] sm:$0x1] %vm1177_vm1, %v1207_v27 }
 0x1d1 PF: > { %s17_s21 = sadd.s32 1, %s1683_s21  }
 0x1d2   : > { %p14_p5 = scmp.ge.s32.totalorder %s17_s21, 4  }
 0x1d4   :  { %16 = sbr.rel (!%p14_p5) target bundleno = 1 (0x1), region = 103 }

// kernel: basic_block_forward.4
= control target key start
LH: loop header
LB: loop body
LE: loop exit
PB: predicated region body
PF: predicated region fallthrough
CT: control target
= control target key end

     0   :  { %s1792_s18 = smov 0   ;;  %s2258_s0 = inlined_call_operand.vmem [shape: bf16[2,8,8,8], index: 0, kind: input, shape index: {}]   ;;  %s2259_s1 = inlined_call_operand.vmem [shape: f32[1,8], index: 1, kind: input, shape index: {}]   ;;  %s2260_s2 = inlined_call_operand.vmem [shape: f32[1,8], index: 2, kind: input, shape index: {}]   ;;  %s2261_s3 = inlined_call_operand.vmem [shape: bf16[72,8], index: 3, kind: input, shape index: {}]   ;;  %s2262_s4 = inlined_call_operand.vmem [shape: bf16[2,64,8], index: 4, kind: output, shape index: {0}]   ;;  %s2263_s5 = inlined_call_operand.vmem [shape: f32[2,2,8], index: 5, kind: output, shape index: {1}]  }
   0x1 LB: > { %s1610_s19 = sadd.s32 4294967295, %s1751_s18   ;;  %p1614_p0 = scmp.ge.s32.totalorder %s1751_s18, 1  ;;  %s1751_s18 = sphi %s1792_s18, %s16_s18  }
   0x2   : > { %p190_p1 = scmp.lt.s32.totalorder %s1751_s18, 3 }
   0x4   : > { %p191_p2 = pnand %p1614_p0, %p190_p1 }
   0x5   : > { %p222_p3 = scmp.lt.s32.totalorder (!%p191_p2), %s1610_s19, 1  ;;  %s1754_s28 = smov (!%p191_p2), 16  }
   0x6   : > { %194 = sbr.rel (%p191_p2) target bundleno = 484 (0x1e4), region = 36  ;;  %s1755_s29 = smov (!%p191_p2), 8  }
   0x7   : > { %s1756_s30 = smov (!%p191_p2), 24   ;;  %s1757_s6 = smov (!%p191_p2), 40  }
   0x8   : > { %s1758_s7 = smov (!%p191_p2), 32   ;;  %s1759_s8 = smov (!%p191_p2), 48  }
   0x9   : > { %s1760_s9 = smov (!%p191_p2), 56   ;;  %s1761_s10 = smov (!%p191_p2), 64  }
   0xb   : > { %vm285_vm0 = vcmask 60416   ;;  %vm287_vm1 = vcmask 57344   ;;  %v1753_v0 = vmov 0   ;;  %s2273_s19 = smov (!%p222_p3, %s1610_s19), 1  ;;  %vm662_vm2 = vcmask 1042432  }
   0xc   : > { %286 = vst.msk [vmem:[#allocation2] sm:$0xf] %vm285_vm0, %v1753_v0  ;;  %vm482_vm3 = vsmask.f32 3328  ;;  %vm663_vm4 = vcmask 1046532   ;;  %s1682_s20 = sshll.u32 %s2273_s19, 5 }
   0xd   : > { %288 = vst.msk [vmem:[#allocation2 + $0x4] sm:$0x1] %vm287_vm1, %v1753_v0  ;;  %vm483_vm5 = vsmask.f32 7440  ;;  %s1820_s23 = scalar_lea.vmem %s2258_s0, %s1682_s20  ;;  %v1825_v1 = vld [vmem:[%s2259_s1] ss:$0 sm:$0xff]  ;;  %vm1841_vm6 = vmor %vm662_vm2, %vm663_vm4  ;;  %s2215_s26 = scalar_lea.vmem %s2262_s4, %s1682_s20 }
   0xe   : > { %289 = vst.msk [vmem:[#allocation2 + $0x8] sm:$0xf] %vm285_vm0, %v1753_v0  ;;  %v1830_v2 = vld [vmem:[%s2260_s2] ss:$0 sm:$0xff]  ;;  %v1709_v3 = vld [vmem:[%s1820_s23 + $0x10] sm:$0xff]   ;;  %v1708_v5 = vld [vmem:[%s1820_s23 + $0x8] sm:$0xff]  }
   0xf   : > { %290 = vst.msk [vmem:[#allocation2 + $0xc] sm:$0x1] %vm287_vm1, %v1753_v0  ;;  %v1693_v4 = vld [vmem:[%s1820_s23] sm:$0xff]   ;;  %v1702_v8 = vunpack.c.l.bf16 %v1709_v3  ;;  %v1699_v11 = vunpack.c.h.bf16 %v1708_v5  ;;  %v1703_v16 = vunpack.c.h.bf16 %v1709_v3  ;;  %v1698_v33 = vunpack.c.l.bf16 %v1708_v5  ;;  %vm1873_vm7 = vmor %vm482_vm3, %vm483_vm5  ;;  %s1619_s20 = sshll.u32 %s2273_s19, 1 }
  0x10   : > { %291 = vst.msk [vmem:[#allocation2 + $0x10] sm:$0xf] %vm285_vm0, %v1753_v0  ;;  %v1695_v9 = vunpack.c.h.bf16 %v1693_v4  ;;  %v1694_v10 = vunpack.c.l.bf16 %v1693_v4  ;;  %vm397_vm8 = vsmask.f32 7938  ;;  %vm403_vm9 = vsmask.f32 256 }
  0x11   : > { %292 = vst.msk [vmem:[#allocation2 + $0x14] sm:$0x1] %vm287_vm1, %v1753_v0  ;;  %v262_v20 = vmul.f32 %v1825_v1, %v1702_v8  ;;  %v261_v25 = vmul.f32 %v1825_v1, %v1699_v11  ;;  %v263_v32 = vmul.f32 %v1825_v1, %v1703_v16  ;;  %v260_v51 = vmul.f32 %v1825_v1, %v1698_v33  ;;  %vm1894_vm10 = vmand %vm285_vm0, %vm397_vm8 }
  0x12   : > { %293 = vst.msk [vmem:[#allocation2 + $0x18] sm:$0xf] %vm285_vm0, %v1753_v0  ;;  %v259_v21 = vmul.f32 %v1825_v1, %v1695_v9  ;;  %v258_v24 = vmul.f32 %v1825_v1, %v1694_v10  ;;  %vm1900_vm11 = vmand %vm287_vm1, %vm403_vm9  ;;  %vm621_vm12 = vcmask 126016   ;;  %vm721_vm13 = vcmask 191616  }
  0x13   : > { %v630_v6 = vld [vmem:[#allocation2] sm:$0xe]  ;;  %294 = vst.msk [vmem:[#allocation2 + $0x1c] sm:$0x1] %vm287_vm1, %v1753_v0  ;;  %v273_v28 = vadd.f32 %v1830_v2, %v262_v20  ;;  %v272_v31 = vadd.f32 %v1830_v2, %v261_v25  ;;  %v274_v41 = vadd.f32 %v1830_v2, %v263_v32  ;;  %vm770_vm14 = vcmask 257216  }
  0x14   : > { %v466_v7 = vld [vmem:[#allocation2] sm:$0xf]  ;;  %v631_v12 = vld [vmem:[#allocation2 + $0x4] sm:$0x1]  ;;  %v1620_v14 = vrot.slane %v630_v6, 9  ;;  %v270_v29 = vadd.f32 %v1830_v2, %v259_v21  ;;  %v269_v30 = vadd.f32 %v1830_v2, %v258_v24  ;;  %vm931_vm15 = vcmask 322816  }
  0x15   : > { %295 = vst.msk [vmem:[#allocation2 + $0x20] sm:$0xf] %vm285_vm0, %v1753_v0  ;;  %v486_v15 = vshrl.u32 %v466_v7, 16  ;;  %v667_v17 = vrot.slane %v631_v12, 5  ;;  %v467_v18 = vld [vmem:[#allocation2 + $0x4] sm:$0x1] }
  0x16   : > { %296 = vst.msk [vmem:[#allocation2 + $0x24] sm:$0x1] %vm287_vm1, %v1753_v0  ;;  %v489_v19 = vshll.u32 %v466_v7, 16  ;;  %v495_v23 = vshll.u32 %v467_v18, 16  ;;  %v281_v36 = vmax.f32 %v273_v28, 0.0  ;;  %v278_v37 = vmax.f32 %v270_v29, 0.0 }
  0x17   : > { %297 = vst.msk [vmem:[#allocation2 + $0x28] sm:$0xf] %vm285_vm0, %v1753_v0  ;;  %v488_v22 = vrot.slane %v486_v15, 4  ;;  %v668_v26 = vsel %vm1841_vm6, %v1620_v14, %v667_v17  ;;  %v277_v39 = vmax.f32 %v269_v30, 0.0  ;;  %v280_v40 = vmax.f32 %v272_v31, 0.0 }
  0x18   : > { %298 = vst.msk [vmem:[#allocation2 + $0x2c] sm:$0x1] %vm287_vm1, %v1753_v0  ;;  %v491_v27 = vrot.slane %v489_v19, 5  ;;  %697 = vrot.lane.b32.xlu1 %v668_v26, %s1754_s28  ;;  %v497_v35 = vrot.slane %v495_v23, 5  ;;  %v311_v43 = vpack.c.bf16 %v281_v36, %v281_v36  ;;  %v308_v44 = vpack.c.bf16 %v278_v37, %v278_v37  ;;  %v408_v4 = vld [vmem:[#allocation2 + $0x10] sm:$0xf] }
  0x19   : > { %299 = vst.msk [vmem:[#allocation2 + $0x30] sm:$0xf] %vm285_vm0, %v1753_v0  ;;  %v307_v45 = vpack.c.bf16 %v277_v39, %v277_v39  ;;  %v310_v46 = vpack.c.bf16 %v280_v40, %v280_v40  ;;  %v282_v47 = vmax.f32 %v274_v41, 0.0  ;;  %v399_v5 = vld [vmem:[#allocation2 + $0x8] sm:$0xf]  ;;  %v271_v14 = vadd.f32 %v1830_v2, %v260_v51 }
  0x1a   : > { %300 = vst.msk [vmem:[#allocation2 + $0x34] sm:$0x1] %vm287_vm1, %v1753_v0  ;;  %v492_v34 = vor.u32 %v491_v27, %v488_v22  ;;  %v348_v49 = vshrl.u32 %v311_v43, 16  ;;  %v351_v50 = vshll.u32 %v311_v43, 16  ;;  %v324_v52 = vshrl.u32 %v308_v44, 16 }
  0x1b   : > { %301 = vst.msk [vmem:[#allocation2 + $0x38] sm:$0xf] %vm285_vm0, %v1753_v0  ;;  %v327_v53 = vshll.u32 %v308_v44, 16  ;;  %v316_v54 = vshrl.u32 %v307_v45, 16  ;;  %v319_v55 = vshll.u32 %v307_v45, 16  ;;  %v340_v57 = vshrl.u32 %v310_v46, 16 }
  0x1c   : > { %302 = vst.msk [vmem:[#allocation2 + $0x3c] sm:$0x1] %vm287_vm1, %v1753_v0  ;;  %v493_v42 = vrot.slane %v492_v34, 4  ;;  %v350_v56 = vrot.slane %v348_v49, 7  ;;  %v343_v58 = vshll.u32 %v310_v46, 16  ;;  %v312_v59 = vpack.c.bf16 %v282_v47, %v282_v47 }
  0x1d   : > { %303 = vst.msk [vmem:[#allocation2 + $0x40] sm:$0xf] %vm285_vm0, %v1753_v0  ;;  %v326_v62 = vrot.slane %v324_v52, 7  ;;  %v318_v63 = vrot.slane %v316_v54, 7  ;;  %v342_v6 = vrot.slane %v340_v57, 7  ;;  %v279_v31 = vmax.f32 %v271_v14, 0.0 }
  0x1e   : > { %304 = vst.msk [vmem:[#allocation2 + $0x44] sm:$0x1] %vm287_vm1, %v1753_v0  ;;  %v498_v48 = vsel %vm1873_vm7, %v493_v42, %v497_v35  ;;  %v426_v61 = vld [vmem:[#allocation2 + $0x28] sm:$0xf]  ;;  %v353_v3 = vor.u32 %v351_v50, %v350_v56  ;;  %v356_v7 = vshrl.u32 %v312_v59, 16  ;;  %v359_v23 = vshll.u32 %v312_v59, 16 }
  0x1f   : > { %305 = vst.msk [vmem:[#allocation2 + $0x48] sm:$0xf] %vm285_vm0, %v1753_v0  ;;  %597 = vrot.lane.b32.xlu0 %v498_v48, %s1755_s29  ;;  %v329_v8 = vor.u32 %v327_v53, %v326_v62  ;;  %v322_v9 = vrot.slane %v318_v63, 4  ;;  %v420_v11 = vld [vmem:[#allocation2 + $0x20] sm:$0xf]  ;;  %v345_v16 = vor.u32 %v343_v58, %v342_v6  ;;  %v346_v17 = vrot.slane %v342_v6, 4 }
  0x20   : > { %306 = vst.msk [vmem:[#allocation2 + $0x4c] sm:$0x1] %vm287_vm1, %v1753_v0  ;;  %v321_v0 = vor.u32 %v319_v55, %v318_v63  ;;  %v423_v12 = vld [vmem:[#allocation2 + $0x24] sm:$0x1]  ;;  %v427_v15 = vsel %vm1894_vm10, %v353_v3, %v426_v61  ;;  %v1907_v18 = vrot.slane %v356_v7, 7  ;;  %v330_v20 = vrot.slane %v326_v62, 4 }
  0x21   : > { %v405_v19 = vld [vmem:[#allocation2 + $0xc] sm:$0x1]  ;;  %428 = vst [vmem:[#allocation2 + $0x28] sm:$0xf] %v427_v15  ;;  %v409_v21 = vsel %vm1894_vm10, %v329_v8, %v408_v4  ;;  %v411_v24 = vld [vmem:[#allocation2 + $0x14] sm:$0x1]  ;;  %v421_v26 = vsel %vm1894_vm10, %v345_v16, %v420_v11  ;;  %v424_v27 = vsel %vm1900_vm11, %v346_v17, %v423_v12  ;;  %v309_v35 = vpack.c.bf16 %v279_v31, %v279_v31 }
  0x22   : > { %v400_v22 = vsel %vm1894_vm10, %v321_v0, %v399_v5  ;;  %v354_v25 = vrot.slane %v350_v56, 4  ;;  %410 = vst [vmem:[#allocation2 + $0x10] sm:$0xf] %v409_v21  ;;  %v432_v28 = vld [vmem:[#allocation2 + $0x30] sm:$0xf]  ;;  %v361_v29 = vor.u32 %v359_v23, %v1907_v18  ;;  %v406_v32 = vsel %vm1900_vm11, %v322_v9, %v405_v19  ;;  %v1932_v61 = vld [vmem:[%s1820_s23 + $0x18] sm:$0xff]  }
  0x23   : > { %401 = vst [vmem:[#allocation2 + $0x8] sm:$0xf] %v400_v22  ;;  %v429_v30 = vld [vmem:[#allocation2 + $0x2c] sm:$0x1]  ;;  %v412_v34 = vsel %vm1900_vm11, %v330_v20, %v411_v24  ;;  %v332_v37 = vshrl.u32 %v309_v35, 16  ;;  %v335_v41 = vshll.u32 %v309_v35, 16 }
  0x24   : > { %422 = vst [vmem:[#allocation2 + $0x20] sm:$0xf] %v421_v26  ;;  %v433_v33 = vsel %vm1894_vm10, %v361_v29, %v432_v28  ;;  %v430_v36 = vsel %vm1900_vm11, %v354_v25, %v429_v30  ;;  %v414_v51 = vld [vmem:[#allocation2 + $0x18] sm:$0xf]  ;;  %v417_v9 = vld [vmem:[#allocation2 + $0x1c] sm:$0x1] }
  0x25   : > { %425 = vst [vmem:[#allocation2 + $0x24] sm:$0x1] %v424_v27  ;;  %v334_v47 = vrot.slane %v332_v37, 7  ;;  %v1706_v27 = vunpack.c.l.bf16 %v1932_v61  ;;  %vm1028_vm2 = vcmask 388416   ;;  %vm1078_vm3 = vcmask 454016  }
  0x26   : > { %434 = vst [vmem:[#allocation2 + $0x30] sm:$0xf] %v433_v33  ;;  %vm1422_vm4 = vcmask 1043456   ;;  %vm1239_vm5 = vcmask 519616   ;;  %vm1471_vm8 = vcmask 64512  }
  0x27   : > { %407 = vst [vmem:[#allocation2 + $0xc] sm:$0x1] %v406_v32  ;;  %v337_v56 = vor.u32 %v335_v41, %v334_v47  ;;  %v338_v16 = vrot.slane %v334_v47, 4 }
  0x28   : > { %v734_v39 = vld [vmem:[#allocation2 + $0x28] sm:$0xf]  ;;  %413 = vst [vmem:[#allocation2 + $0x14] sm:$0x1] %v412_v34 }
  0x29   : > { %754 = vrot.lane.b32.xlu2 %v734_v39, %s1756_s30  ;;  %v731_v40 = vld [vmem:[#allocation2 + $0x10] sm:$0xf]  ;;  %431 = vst [vmem:[#allocation2 + $0x2c] sm:$0x1] %v430_v36  ;;  %v1928_v44 = vld [vmem:[#allocation2 + $0x28] sm:$0xe]  ;;  %v415_v17 = vsel %vm1894_vm10, %v337_v56, %v414_v51  ;;  %v418_v37 = vsel %vm1900_vm11, %v338_v16, %v417_v9 }
  0x2a   : > { %748 = vrot.lane.b32.xlu1 %v731_v40, %s1756_s30  ;;  %v730_v42 = vld [vmem:[#allocation2 + $0x8] sm:$0xf]  ;;  %v942_v46 = vld [vmem:[#allocation2 + $0x10] sm:$0xe]  ;;  %v1625_v4 = vrot.slane %v1928_v44, 9  ;;  %v362_v39 = vrot.slane %v1907_v18, 4 }
  0x2b   : > { %v632_v43 = vld [vmem:[#allocation2 + $0x8] sm:$0xe]  ;;  %746 = vrot.lane.b32.xlu0 %v730_v42, %s1756_s30  ;;  %v638_v45 = vld [vmem:[#allocation2 + $0x20] sm:$0xe]  ;;  %v1629_v58 = vrot.slane %v942_v46, 9 }
  0x2c   : > { %v639_v48 = vld [vmem:[#allocation2 + $0x24] sm:$0x1]  ;;  %v1624_v49 = vrot.slane %v638_v45, 9  ;;  %v474_v50 = vld [vmem:[#allocation2 + $0x20] sm:$0xf]  ;;  %v1621_v53 = vrot.slane %v632_v43, 9 }
  0x2d   : > { %v683_v52 = vrot.slane %v639_v48, 5  ;;  %v940_v54 = vld [vmem:[#allocation2 + $0x8] sm:$0xe]  ;;  %v542_v55 = vshrl.u32 %v474_v50, 16  ;;  %v545_v59 = vshll.u32 %v474_v50, 16 }
  0x2e   : > { %v633_v57 = vld [vmem:[#allocation2 + $0xc] sm:$0x1]  ;;  %v735_v6 = vld [vmem:[#allocation2 + $0x30] sm:$0xf]  ;;  %v1628_v7 = vrot.slane %v940_v54, 9 }
  0x2f   : > { %v684_v62 = vsel %vm1841_vm6, %v1624_v49, %v683_v52  ;;  %v671_v63 = vrot.slane %v633_v57, 5  ;;  %v943_v3 = vld [vmem:[#allocation2 + $0x14] sm:$0x1]  ;;  %v941_v5 = vld [vmem:[#allocation2 + $0xc] sm:$0x1]  ;;  %v544_v0 = vrot.slane %v542_v55, 4  ;;  %v264_v55 = vmul.f32 %v1825_v1, %v1706_v27 }
  0x30   : > { %v475_v8 = vld [vmem:[#allocation2 + $0x24] sm:$0x1]  ;;  %v641_v12 = vld [vmem:[#allocation2 + $0x2c] sm:$0x1]  ;;  %v547_v14 = vrot.slane %v545_v59, 5  ;;  %v978_v19 = vrot.slane %v943_v3, 5 }
  0x31   : > { %705 = vrot.lane.b32.xlu2 %v684_v62, %s1754_s28  ;;  %v672_v11 = vsel %vm1841_vm6, %v1621_v53, %v671_v63  ;;  %v779_v15 = vld [vmem:[#allocation2 + $0x8] sm:$0xf]  ;;  %v974_v20 = vrot.slane %v941_v5, 5  ;;  %v780_v24 = vld [vmem:[#allocation2 + $0xc] sm:$0x1]  ;;  %v687_v28 = vrot.slane %v641_v12, 5 }
  0x32   : > { %699 = vrot.lane.b32.xlu1 %v672_v11, %s1754_s28  ;;  %v796_v21 = vshrl.u32 %v779_v15, 16  ;;  %v799_v22 = vshll.u32 %v779_v15, 16  ;;  %v468_v23 = vld [vmem:[#allocation2 + $0x8] sm:$0xf]  ;;  %416 = vst [vmem:[#allocation2 + $0x18] sm:$0xf] %v415_v17  ;;  %v548_v33 = vor.u32 %v547_v14, %v544_v0  ;;  %v979_v40 = vsel %vm1841_vm6, %v1629_v58, %v978_v19 }
  0x33   : > { %756 = vrot.lane.b32.xlu0 %v735_v6, %s1756_s30  ;;  %v500_v25 = vshrl.u32 %v468_v23, 16  ;;  %v503_v26 = vshll.u32 %v468_v23, 16  ;;  %v551_v29 = vshll.u32 %v475_v8, 16  ;;  %v470_v32 = vld [vmem:[#allocation2 + $0x10] sm:$0xf]  ;;  %v805_v42 = vshll.u32 %v780_v24, 16 }
  0x34   : > { %v798_v30 = vrot.slane %v796_v21, 4  ;;  %v801_v31 = vrot.slane %v799_v22, 5  ;;  %v469_v34 = vld [vmem:[#allocation2 + $0xc] sm:$0x1]  ;;  %419 = vst [vmem:[#allocation2 + $0x1c] sm:$0x1] %v418_v37  ;;  %v975_v44 = vsel %vm1841_vm6, %v1628_v7, %v974_v20  ;;  %v688_v48 = vsel %vm1841_vm6, %v1625_v4, %v687_v28 }
  0x35   : > { %v502_v35 = vrot.slane %v500_v25, 4  ;;  %v505_v36 = vrot.slane %v503_v26, 5  ;;  %v476_v43 = vld [vmem:[#allocation2 + $0x28] sm:$0xf]  ;;  %v514_v45 = vshrl.u32 %v470_v32, 16  ;;  %v517_v46 = vshll.u32 %v470_v32, 16 }
  0x36   : > { %v802_v41 = vor.u32 %v801_v31, %v798_v30  ;;  %v556_v47 = vshrl.u32 %v476_v43, 16  ;;  %v509_v50 = vshll.u32 %v469_v34, 16  ;;  %v559_v51 = vshll.u32 %v476_v43, 16  ;;  %v471_v53 = vld [vmem:[#allocation2 + $0x14] sm:$0x1] }
  0x37   : > { %v506_v49 = vor.u32 %v505_v36, %v502_v35  ;;  %v549_v18 = vrot.slane %v548_v33, 4  ;;  %v553_v52 = vrot.slane %v551_v29, 5  ;;  %v477_v54 = vld [vmem:[#allocation2 + $0x2c] sm:$0x1]  ;;  %v807_v57 = vrot.slane %v805_v42, 5 }
  0x38   : > { %v803_v56 = vrot.slane %v802_v41, 4  ;;  %v558_v59 = vrot.slane %v556_v47, 4  ;;  %v561_v62 = vrot.slane %v559_v51, 5  ;;  %v516_v4 = vrot.slane %v514_v45, 4  ;;  %v435_v6 = vld [vmem:[#allocation2 + $0x34] sm:$0x1] }
  0x39   : > { %1006 = vrot.lane.b32.xlu2 %v979_v40, %s1757_s6  ;;  %v472_v58 = vld [vmem:[#allocation2 + $0x18] sm:$0xf]  ;;  %v519_v5 = vrot.slane %v517_v46, 5  ;;  %v507_v7 = vrot.slane %v506_v49, 4  ;;  %v511_v8 = vrot.slane %v509_v50, 5  ;;  %v523_v12 = vshll.u32 %v471_v53, 16 }
  0x3a   : > { %1004 = vrot.lane.b32.xlu1 %v975_v44, %s1757_s6  ;;  %v528_v63 = vshrl.u32 %v472_v58, 16  ;;  %v531_v3 = vshll.u32 %v472_v58, 16  ;;  %v436_v14 = vsel %vm1900_vm11, %v362_v39, %v435_v6  ;;  %v554_v15 = vsel %vm1873_vm7, %v549_v18, %v553_v52  ;;  %v781_v24 = vld [vmem:[#allocation2 + $0x10] sm:$0xf]  ;;  %v782_v31 = vld [vmem:[#allocation2 + $0x14] sm:$0x1] }
  0x3b   : > { %707 = vrot.lane.b32.xlu0 %v688_v48, %s1754_s28  ;;  %v473_v0 = vld [vmem:[#allocation2 + $0x1c] sm:$0x1]  ;;  %v562_v16 = vor.u32 %v561_v62, %v558_v59  ;;  %v565_v17 = vshll.u32 %v477_v54, 16  ;;  %437 = vst [vmem:[#allocation2 + $0x34] sm:$0x1] %v436_v14  ;;  %v275_v19 = vadd.f32 %v1830_v2, %v264_v55  ;;  %v808_v20 = vsel %vm1873_vm7, %v803_v56, %v807_v57 }
  0x3c   : > { %v530_v9 = vrot.slane %v528_v63, 4  ;;  %v533_v11 = vrot.slane %v531_v3, 5  ;;  %v537_v22 = vshll.u32 %v473_v0, 16  ;;  %v520_v23 = vor.u32 %v519_v5, %v516_v4  ;;  %v787_v39 = vld [vmem:[#allocation2 + $0x28] sm:$0xf] }
  0x3d   : > { %v512_v25 = vsel %vm1873_vm7, %v507_v7, %v511_v8  ;;  %v810_v26 = vshrl.u32 %v781_v24, 16  ;;  %v525_v27 = vrot.slane %v523_v12, 5  ;;  %v813_v28 = vshll.u32 %v781_v24, 16  ;;  %v789_v41 = vld [vmem:[#allocation2 + $0x30] sm:$0xf] }
  0x3e   : > { %v534_v21 = vor.u32 %v533_v11, %v530_v9  ;;  %v563_v29 = vrot.slane %v562_v16, 4  ;;  %v567_v30 = vrot.slane %v565_v17, 5  ;;  %v283_v33 = vmax.f32 %v275_v19, 0.0  ;;  %v636_v50 = vld [vmem:[#allocation2 + $0x18] sm:$0xe] }
  0x3f   : > { %v812_v32 = vrot.slane %v810_v26, 4  ;;  %v539_v35 = vrot.slane %v537_v22, 5  ;;  %v521_v36 = vrot.slane %v520_v23, 4  ;;  %v815_v37 = vrot.slane %v813_v28, 5  ;;  %v634_v51 = vld [vmem:[#allocation2 + $0x10] sm:$0xe] }
  0x40   : > { %v535_v34 = vrot.slane %v534_v21, 4  ;;  %v313_v40 = vpack.c.bf16 %v283_v33, %v283_v33  ;;  %v819_v43 = vshll.u32 %v782_v31, 16  ;;  %v568_v44 = vsel %vm1873_vm7, %v563_v29, %v567_v30  ;;  %v635_v18 = vld [vmem:[#allocation2 + $0x14] sm:$0x1]  ;;  %v637_v52 = vld [vmem:[#allocation2 + $0x1c] sm:$0x1] }
  0x41   : > { %605 = vrot.lane.b32.xlu2 %v554_v15, %s1755_s29  ;;  %v816_v42 = vor.u32 %v815_v37, %v812_v32  ;;  %v852_v47 = vshrl.u32 %v787_v39, 16  ;;  %v526_v49 = vsel %vm1873_vm7, %v521_v36, %v525_v27  ;;  %v866_v53 = vshrl.u32 %v789_v41, 16  ;;  %v438_v59 = vld [vmem:[#allocation2 + $0x38] sm:$0xf]  ;;  %v441_v62 = vld [vmem:[#allocation2 + $0x3c] sm:$0x1] }
  0x42   : > { %907 = vrot.lane.b32.xlu1 %v808_v20, %s1758_s7  ;;  %v364_v45 = vshrl.u32 %v313_v40, 16  ;;  %v367_v46 = vshll.u32 %v313_v40, 16  ;;  %v540_v48 = vsel %vm1873_vm7, %v535_v34, %v539_v35  ;;  %v869_v54 = vshll.u32 %v789_v41, 16  ;;  %v788_v9 = vld [vmem:[#allocation2 + $0x2c] sm:$0x1] }
  0x43   : > { %599 = vrot.lane.b32.xlu0 %v512_v25, %s1755_s29  ;;  %v855_v56 = vshll.u32 %v787_v39, 16  ;;  %v817_v57 = vrot.slane %v816_v42, 4  ;;  %v821_v58 = vrot.slane %v819_v43, 5  ;;  %v854_v4 = vrot.slane %v852_v47, 4  ;;  %v790_v16 = vld [vmem:[#allocation2 + $0x34] sm:$0x1] }
  0x44   : > { %v366_v55 = vrot.slane %v364_v45, 7  ;;  %v1623_v6 = vrot.slane %v636_v50, 9  ;;  %v679_v7 = vrot.slane %v637_v52, 5  ;;  %v1622_v8 = vrot.slane %v634_v51, 9  ;;  %v478_v17 = vld [vmem:[#allocation2 + $0x30] sm:$0xf] }
  0x45   : > { %v857_v5 = vrot.slane %v855_v56, 5  ;;  %v675_v0 = vrot.slane %v635_v18, 5  ;;  %v868_v11 = vrot.slane %v866_v53, 4  ;;  %v871_v12 = vrot.slane %v869_v54, 5  ;;  %v479_v39 = vld [vmem:[#allocation2 + $0x34] sm:$0x1] }
  0x46   : > { %v369_v63 = vor.u32 %v367_v46, %v366_v55  ;;  %v370_v3 = vrot.slane %v366_v55, 4  ;;  %v822_v19 = vsel %vm1873_vm7, %v817_v57, %v821_v58  ;;  %v861_v21 = vshll.u32 %v788_v9, 16  ;;  %v1038_v41 = vld [vmem:[#allocation2 + $0x10] sm:$0xf]  ;;  %v1089_v52 = vld [vmem:[#allocation2 + $0x18] sm:$0xf] }
  0x47   : > { %v858_v20 = vor.u32 %v857_v5, %v854_v4  ;;  %v680_v22 = vsel %vm1841_vm6, %v1623_v6, %v679_v7  ;;  %v676_v23 = vsel %vm1841_vm6, %v1622_v8, %v675_v0  ;;  %v872_v24 = vor.u32 %v871_v12, %v868_v11  ;;  %v1087_v53 = vld [vmem:[#allocation2 + $0x10] sm:$0xf]  ;;  %v1039_v54 = vld [vmem:[#allocation2 + $0x18] sm:$0xf]  ;;  %v1090_v6 = vld [vmem:[#allocation2 + $0x1c] sm:$0x1] }
  0x48   : > { %v439_v14 = vsel %vm1894_vm10, %v369_v63, %v438_v59  ;;  %v442_v15 = vsel %vm1900_vm11, %v370_v3, %v441_v62  ;;  %v875_v25 = vshll.u32 %v790_v16, 16  ;;  %v570_v26 = vshrl.u32 %v478_v17, 16  ;;  %v948_v59 = vld [vmem:[#allocation2 + $0x28] sm:$0xe]  ;;  %v949_v62 = vld [vmem:[#allocation2 + $0x2c] sm:$0x1] }
  0x49   : > { %607 = vrot.lane.b32.xlu2 %v568_v44, %s1755_s29  ;;  %440 = vst [vmem:[#allocation2 + $0x38] sm:$0xf] %v439_v14  ;;  %v573_v27 = vshll.u32 %v478_v17, 16  ;;  %v859_v28 = vrot.slane %v858_v20, 4  ;;  %v863_v29 = vrot.slane %v861_v21, 5  ;;  %v873_v30 = vrot.slane %v872_v24, 4 }
  0x4a   : > { %603 = vrot.lane.b32.xlu1 %v540_v48, %s1755_s29  ;;  %443 = vst [vmem:[#allocation2 + $0x3c] sm:$0x1] %v442_v15  ;;  %v877_v31 = vrot.slane %v875_v25, 5  ;;  %v572_v33 = vrot.slane %v570_v26, 4  ;;  %v579_v47 = vshll.u32 %v479_v39, 16  ;;  %v1118_v56 = vshrl.u32 %v1089_v52, 16 }
  0x4b   : > { %601 = vrot.lane.b32.xlu0 %v526_v49, %s1755_s29  ;;  %v575_v34 = vrot.slane %v573_v27, 5  ;;  %v864_v40 = vsel %vm1873_vm7, %v859_v28, %v863_v29  ;;  %v1121_v57 = vshll.u32 %v1089_v52, 16  ;;  %v1104_v63 = vshrl.u32 %v1087_v53, 16  ;;  %v783_v11 = vld [vmem:[#allocation2 + $0x18] sm:$0xf] }
  0x4c   : > { %v878_v45 = vsel %vm1873_vm7, %v873_v30, %v877_v31  ;;  %v581_v18 = vrot.slane %v579_v47, 5  ;;  %v1107_v3 = vshll.u32 %v1087_v53, 16  ;;  %v1632_v4 = vrot.slane %v948_v59, 9  ;;  %v1088_v12 = vld [vmem:[#allocation2 + $0x14] sm:$0x1] }
  0x4d   : > { %v576_v46 = vor.u32 %v575_v34, %v572_v33  ;;  %v990_v5 = vrot.slane %v949_v62, 5  ;;  %v1120_v7 = vrot.slane %v1118_v56, 4  ;;  %v1123_v8 = vrot.slane %v1121_v57, 5  ;;  %v732_v15 = vld [vmem:[#allocation2 + $0x18] sm:$0xf] }
  0x4e   : > { %v1106_v0 = vrot.slane %v1104_v63, 4  ;;  %v1109_v9 = vrot.slane %v1107_v3, 5  ;;  %v1127_v14 = vshll.u32 %v1090_v6, 16  ;;  %v827_v20 = vshll.u32 %v783_v11, 16  ;;  %v950_v21 = vld [vmem:[#allocation2 + $0x30] sm:$0xe] }
  0x4f   : > { %v577_v51 = vrot.slane %v576_v46, 4  ;;  %v991_v16 = vsel %vm1841_vm6, %v1632_v4, %v990_v5  ;;  %v1124_v17 = vor.u32 %v1123_v8, %v1120_v7  ;;  %v1113_v25 = vshll.u32 %v1088_v12, 16  ;;  %v785_v33 = vld [vmem:[#allocation2 + $0x20] sm:$0xf] }
  0x50   : > { %v480_v32 = vld [vmem:[#allocation2 + $0x38] sm:$0xf]  ;;  %v1110_v24 = vor.u32 %v1109_v9, %v1106_v0  ;;  %v1633_v26 = vrot.slane %v950_v21, 9  ;;  %v1707_v28 = vunpack.c.h.bf16 %v1932_v61  ;;  %v1129_v30 = vrot.slane %v1127_v14, 5  ;;  %v444_v9 = vld [vmem:[#allocation2 + $0x40] sm:$0xf] }
  0x51   : > { %909 = vrot.lane.b32.xlu2 %v822_v19, %s1758_s7  ;;  %v481_v35 = vld [vmem:[#allocation2 + $0x3c] sm:$0x1]  ;;  %v584_v36 = vshrl.u32 %v480_v32, 16  ;;  %v587_v37 = vshll.u32 %v480_v32, 16  ;;  %v582_v58 = vsel %vm1873_vm7, %v577_v51, %v581_v18  ;;  %v824_v19 = vshrl.u32 %v783_v11, 16 }
  0x52   : > { %703 = vrot.lane.b32.xlu1 %v680_v22, %s1754_s28  ;;  %v593_v44 = vshll.u32 %v481_v35, 16  ;;  %v951_v22 = vld [vmem:[#allocation2 + $0x34] sm:$0x1]  ;;  %v1125_v29 = vrot.slane %v1124_v17, 4  ;;  %v829_v32 = vrot.slane %v827_v20, 5  ;;  %v1111_v34 = vrot.slane %v1110_v24, 4 }
  0x53   : > { %701 = vrot.lane.b32.xlu0 %v676_v23, %s1754_s28  ;;  %v586_v42 = vrot.slane %v584_v36, 4  ;;  %v589_v43 = vrot.slane %v587_v37, 5  ;;  %v733_v23 = vld [vmem:[#allocation2 + $0x20] sm:$0xf]  ;;  %v994_v27 = vrot.slane %v951_v22, 5  ;;  %v826_v31 = vrot.slane %v824_v19, 4 }
  0x54   : > { %v595_v50 = vrot.slane %v593_v44, 5  ;;  %v1115_v35 = vrot.slane %v1113_v25, 5  ;;  %v784_v36 = vld [vmem:[#allocation2 + $0x1c] sm:$0x1]  ;;  %v265_v37 = vmul.f32 %v1825_v1, %v1707_v28  ;;  %v1130_v61 = vsel %vm1873_vm7, %v1125_v29, %v1129_v30  ;;  %v642_v44 = vld [vmem:[#allocation2 + $0x30] sm:$0xe] }
  0x55   : > { %v590_v48 = vor.u32 %v589_v43, %v586_v42  ;;  %v995_v39 = vsel %vm1841_vm6, %v1633_v26, %v994_v27  ;;  %v830_v42 = vor.u32 %v829_v32, %v826_v31  ;;  %v833_v43 = vshll.u32 %v784_v36, 16  ;;  %v454_v11 = vld [vmem:[#allocation2 + $0x20] sm:$0xf]  ;;  %v1248_v17 = vld [vmem:[#allocation2 + $0x10] sm:$0xe] }
  0x56   : > { %v276_v46 = vadd.f32 %v1830_v2, %v265_v37  ;;  %v1116_v47 = vsel %vm1873_vm7, %v1111_v34, %v1115_v35  ;;  %v786_v2 = vld [vmem:[#allocation2 + $0x24] sm:$0x1]  ;;  %462 = vst.msk [vmem:[#allocation3 + $0x10] sm:$0xf] %vm285_vm0, %v454_v11  ;;  %v1249_v19 = vld [vmem:[#allocation2 + $0x14] sm:$0x1] }
  0x57   : > { %v591_v49 = vrot.slane %v590_v48, 4  ;;  %v644_v48 = vld [vmem:[#allocation2 + $0x38] sm:$0xe]  ;;  %v831_v53 = vrot.slane %v830_v42, 4  ;;  %v847_v63 = vshll.u32 %v786_v2, 16  ;;  %v1636_v24 = vrot.slane %v1248_v17, 9 }
  0x58   : > { %v284_v1 = vmax.f32 %v276_v46, 0.0  ;;  %v1627_v57 = vrot.slane %v644_v48, 9  ;;  %v1042_v20 = vld [vmem:[#allocation2 + $0x30] sm:$0xf]  ;;  %v1250_v21 = vld [vmem:[#allocation2 + $0x18] sm:$0xe] }
  0x59   : > { %915 = vrot.lane.b32.xlu2 %v864_v40, %s1758_s7  ;;  %v596_v55 = vsel %vm1873_vm7, %v591_v49, %v595_v50  ;;  %v838_v40 = vshrl.u32 %v785_v33, 16  ;;  %v645_v49 = vld [vmem:[#allocation2 + $0x3c] sm:$0x1]  ;;  %v1626_v50 = vrot.slane %v642_v44, 9  ;;  %v849_v0 = vrot.slane %v847_v63, 5 }
  0x5a   : > { %1054 = vrot.lane.b32.xlu1 %v1038_v41, %s1759_s8  ;;  %v841_v41 = vshll.u32 %v785_v33, 16  ;;  %v314_v56 = vpack.c.bf16 %v284_v1, %v284_v1  ;;  %v1251_v22 = vld [vmem:[#allocation2 + $0x1c] sm:$0x1]  ;;  %v1282_v25 = vrot.slane %v1249_v19, 5  ;;  %v791_v26 = vld [vmem:[#allocation2 + $0x38] sm:$0xf] }
  0x5b   : > { %917 = vrot.lane.b32.xlu0 %v878_v45, %s1758_s7  ;;  %v643_v45 = vld [vmem:[#allocation2 + $0x34] sm:$0x1]  ;;  %v840_v18 = vrot.slane %v838_v40, 4  ;;  %v1637_v27 = vrot.slane %v1250_v21, 9  ;;  %v1286_v28 = vrot.slane %v1251_v22, 5  ;;  %v880_v34 = vshrl.u32 %v791_v26, 16 }
  0x5c   : > { %v691_v51 = vrot.slane %v643_v45, 5  ;;  %v843_v52 = vrot.slane %v841_v41, 5  ;;  %v372_v4 = vshrl.u32 %v314_v56, 16  ;;  %v375_v5 = vshll.u32 %v314_v56, 16  ;;  %v1095_v29 = vld [vmem:[#allocation2 + $0x30] sm:$0xf] }
  0x5d   : > { %v946_v30 = vld [vmem:[#allocation2 + $0x20] sm:$0xe]  ;;  %v947_v31 = vld [vmem:[#allocation2 + $0x24] sm:$0x1]  ;;  %v944_v33 = vld [vmem:[#allocation2 + $0x18] sm:$0xe]  ;;  %v1283_v37 = vsel %vm1841_vm6, %v1636_v24, %v1282_v25  ;;  %v1287_v42 = vsel %vm1841_vm6, %v1637_v27, %v1286_v28 }
  0x5e   : > { %v692_v59 = vsel %vm1841_vm6, %v1626_v50, %v691_v51  ;;  %v844_v62 = vor.u32 %v843_v52, %v840_v18  ;;  %v374_v7 = vrot.slane %v372_v4, 7  ;;  %v447_v32 = vld [vmem:[#allocation2 + $0x44] sm:$0x1]  ;;  %v1097_v35 = vld [vmem:[#allocation2 + $0x38] sm:$0xf]  ;;  %v1160_v40 = vshrl.u32 %v1095_v29, 16 }
  0x5f   : > { %v1163_v41 = vshll.u32 %v1095_v29, 16  ;;  %v1177_v44 = vshll.u32 %v1097_v35, 16  ;;  %v1631_v45 = vrot.slane %v946_v30, 9  ;;  %v986_v46 = vrot.slane %v947_v31, 5  ;;  %v792_v10 = vld [vmem:[#allocation2 + $0x3c] sm:$0x1] }
  0x60   : > { %v845_v8 = vrot.slane %v844_v62, 4  ;;  %v377_v12 = vor.u32 %v375_v5, %v374_v7  ;;  %v1630_v48 = vrot.slane %v944_v33, 9  ;;  %v1162_v50 = vrot.slane %v1160_v40, 4  ;;  %v1096_v52 = vld [vmem:[#allocation2 + $0x34] sm:$0x1] }
  0x61   : > { %1056 = vrot.lane.b32.xlu2 %v1039_v54, %s1759_s8  ;;  %v835_v54 = vrot.slane %v833_v43, 5  ;;  %v1174_v43 = vshrl.u32 %v1097_v35, 16  ;;  %v1165_v51 = vrot.slane %v1163_v41, 5  ;;  %v1179_v56 = vrot.slane %v1177_v44, 5  ;;  %v451_v24 = vld [vmem:[#allocation2 + $0x8] sm:$0xf] }
  0x62   : > { %611 = vrot.lane.b32.xlu1 %v596_v55, %s1755_s29  ;;  %v450_v55 = vld [vmem:[#allocation2] sm:$0xf]  ;;  %v445_v14 = vsel %vm1894_vm10, %v377_v12, %v444_v9  ;;  %459 = vst.msk [vmem:[#allocation3 + $0x4] sm:$0xf] %vm285_vm0, %v451_v24  ;;  %v1093_v33 = vld [vmem:[#allocation2 + $0x28] sm:$0xf] }
  0x63   : > { %609 = vrot.lane.b32.xlu0 %v582_v58, %s1755_s29  ;;  %v695_v58 = vrot.slane %v645_v49, 5  ;;  %458 = vst.msk [vmem:[#allocation3] sm:$0xf] %vm285_vm0, %v450_v55  ;;  %v836_v3 = vsel %vm1873_vm7, %v831_v53, %v835_v54  ;;  %v882_v49 = vrot.slane %v880_v34, 4  ;;  %v455_v53 = vld [vmem:[#allocation2 + $0x28] sm:$0xf]  ;;  %v1166_v63 = vor.u32 %v1165_v51, %v1162_v50  ;;  %s235_s29 = scalar_lea.vmem %s2263_s5, %s1619_s20 }
  0x64   : > { %446 = vst [vmem:[#allocation2 + $0x40] sm:$0xf] %v445_v14  ;;  %v1176_v55 = vrot.slane %v1174_v43, 4  ;;  %v1091_v40 = vld [vmem:[#allocation2 + $0x20] sm:$0xf]  ;;  %v1146_v44 = vshrl.u32 %v1093_v33, 16 }
  0x65   : > { %v696_v6 = vsel %vm1841_vm6, %v1627_v57, %v695_v58  ;;  %463 = vst.msk [vmem:[#allocation3 + $0x14] sm:$0xf] %vm285_vm0, %v455_v53  ;;  %v1098_v58 = vld [vmem:[#allocation2 + $0x3c] sm:$0x1]  ;;  %v1167_v12 = vrot.slane %v1166_v63, 4 }
  0x66   : > { %v1180_v9 = vor.u32 %v1179_v56, %v1176_v55  ;;  %v1183_v11 = vshll.u32 %v1098_v58, 16  ;;  %v453_v41 = vld [vmem:[#allocation2 + $0x18] sm:$0xf]  ;;  %v1092_v63 = vld [vmem:[#allocation2 + $0x24] sm:$0x1] }
  0x67   : > { %461 = vst.msk [vmem:[#allocation3 + $0xc] sm:$0xf] %vm285_vm0, %v453_v41  ;;  %v1102_v41 = vld [vmem:[#allocation2 + $0x4c] sm:$0x1] }
  0x68   : > { %v1181_v22 = vrot.slane %v1180_v9, 4 }
  0x69   : > { %750 = vrot.lane.b32.xlu2 %v732_v15, %s1756_s30  ;;  %v850_v15 = vsel %vm1873_vm7, %v845_v8, %v849_v0  ;;  %v889_v8 = vshll.u32 %v792_v10, 16  ;;  %v1259_v10 = vld [vmem:[#allocation2 + $0x3c] sm:$0x1] }
  0x6a   : > { %1012 = vrot.lane.b32.xlu1 %v991_v16, %s1757_s6  ;;  %v1043_v16 = vld [vmem:[#allocation2 + $0x38] sm:$0xf]  ;;  %v1302_v53 = vrot.slane %v1259_v10, 5 }
  0x6b   : > { %752 = vrot.lane.b32.xlu0 %v733_v23, %s1756_s30  ;;  %v378_v23 = vrot.slane %v374_v7, 4  ;;  %v793_v54 = vld [vmem:[#allocation2 + $0x40] sm:$0xf] }
  0x6c   : > { %v894_v4 = vshrl.u32 %v793_v54, 16  ;;  %v897_v5 = vshll.u32 %v793_v54, 16  ;;  %v1044_v10 = vld [vmem:[#allocation2 + $0x40] sm:$0xf] }
  0x6d   : > { %v448_v36 = vsel %vm1900_vm11, %v378_v23, %v447_v32  ;;  %v1185_v23 = vrot.slane %v1183_v11, 5  ;;  %v1141_v11 = vshll.u32 %v1092_v63, 16 }
  0x6e   : > { %449 = vst [vmem:[#allocation2 + $0x44] sm:$0x1] %v448_v36  ;;  %v1041_v36 = vld [vmem:[#allocation2 + $0x28] sm:$0xf] }
  0x6f   : > { %v1186_v29 = vsel %vm1873_vm7, %v1181_v22, %v1185_v23  ;;  %v1143_v22 = vrot.slane %v1141_v11, 5  ;;  %v1101_v23 = vld [vmem:[#allocation2 + $0x48] sm:$0xf] }
  0x71   : > { %1014 = vrot.lane.b32.xlu2 %v995_v39, %s1757_s6  ;;  %v883_v39 = vshll.u32 %v791_v26, 16 }
  0x72   : > { %1217 = vrot.lane.b32.xlu1 %v1130_v61, %s1760_s9  ;;  %v736_v61 = vld [vmem:[#allocation2 + $0x38] sm:$0xf] }
  0x73   : > { %1215 = vrot.lane.b32.xlu0 %v1116_v47, %s1760_s9  ;;  %v945_v47 = vld [vmem:[#allocation2 + $0x1c] sm:$0x1]  ;;  %v885_v1 = vrot.slane %v883_v39, 5 }
  0x74   : > { %v982_v2 = vrot.slane %v945_v47, 5  ;;  %v953_v39 = vld [vmem:[#allocation2 + $0x3c] sm:$0x1]  ;;  %v1256_v47 = vld [vmem:[#allocation2 + $0x30] sm:$0xe] }
  0x75   : > { %v886_v7 = vor.u32 %v885_v1, %v882_v49  ;;  %v794_v21 = vld [vmem:[#allocation2 + $0x44] sm:$0x1]  ;;  %v1132_v49 = vshrl.u32 %v1091_v40, 16  ;;  %v1135_v1 = vshll.u32 %v1091_v40, 16  ;;  %v998_v51 = vrot.slane %v953_v39, 5 }
  0x76   : > { %v983_v0 = vsel %vm1841_vm6, %v1630_v48, %v982_v2  ;;  %v903_v27 = vshll.u32 %v794_v21, 16  ;;  %v1257_v48 = vld [vmem:[#allocation2 + $0x34] sm:$0x1]  ;;  %v1148_v2 = vrot.slane %v1146_v44, 4 }
  0x77   : > { %v887_v19 = vrot.slane %v886_v7, 4  ;;  %v1134_v58 = vrot.slane %v1132_v49, 4  ;;  %v954_v7 = vld [vmem:[#allocation2 + $0x40] sm:$0xe] }
  0x78   : > { %v905_v31 = vrot.slane %v903_v27, 5 }
  0x79   : > { %709 = vrot.lane.b32.xlu2 %v692_v59, %s1754_s28  ;;  %v737_v59 = vld [vmem:[#allocation2 + $0x40] sm:$0xf] }
  0x7a   : > { %911 = vrot.lane.b32.xlu1 %v836_v3, %s1758_s7  ;;  %v1169_v3 = vshll.u32 %v1096_v52, 16  ;;  %v1298_v52 = vrot.slane %v1257_v48, 5  ;;  %v1211_v48 = vshll.u32 %v1102_v41, 16 }
  0x7b   : > { %711 = vrot.lane.b32.xlu0 %v696_v6, %s1754_s28  ;;  %v987_v6 = vsel %vm1841_vm6, %v1631_v45, %v986_v46  ;;  %v1149_v45 = vshll.u32 %v1093_v33, 16  ;;  %v452_v46 = vld [vmem:[#allocation2 + $0x10] sm:$0xf]  ;;  %v1253_v33 = vld [vmem:[#allocation2 + $0x24] sm:$0x1] }
  0x7c   : > { %v1171_v14 = vrot.slane %v1169_v3, 5  ;;  %460 = vst.msk [vmem:[#allocation3 + $0x8] sm:$0xf] %vm285_vm0, %v452_v46  ;;  %v1290_v39 = vrot.slane %v1253_v33, 5  ;;  %v1689_v33 = vld [vmem:[%s2261_s3 + $0x8] sm:$0xff] }
  0x7d   : > { %v1151_v55 = vrot.slane %v1149_v45, 5 }
  0x7e   : > { %v1172_v25 = vsel %vm1873_vm7, %v1167_v12, %v1171_v14  ;;  %v1635_v12 = vrot.slane %v954_v7, 9  ;;  %v1263_v7 = vld [vmem:[#allocation2 + $0x4c] sm:$0x1] }
  0x81   : > { %913 = vrot.lane.b32.xlu2 %v850_v15, %s1758_s7  ;;  %v896_v15 = vrot.slane %v894_v4, 4 }
  0x82   : > { %1064 = vrot.lane.b32.xlu1 %v1043_v16, %s1759_s8  ;;  %v899_v16 = vrot.slane %v897_v5, 5  ;;  %v1152_v5 = vor.u32 %v1151_v55, %v1148_v2 }
  0x83   : > { %1062 = vrot.lane.b32.xlu0 %v1042_v20, %s1759_s8  ;;  %v2041_v60 = vpop.permute.xlu2 %754  ;;  %v891_v20 = vrot.slane %v889_v8, 5  ;;  %v955_v8 = vld [vmem:[#allocation2 + $0x44] sm:$0x1] }
  0x84   : > { %v900_v26 = vor.u32 %v899_v16, %v896_v15  ;;  %v1002_v14 = vrot.slane %v955_v8, 5  ;;  %v1153_v15 = vrot.slane %v1152_v5, 4 }
  0x85   : > { %v892_v28 = vsel %vm1873_vm7, %v887_v19, %v891_v20 }
  0x86   : > { %v901_v30 = vrot.slane %v900_v26, 4  ;;  %v1252_v26 = vld [vmem:[#allocation2 + $0x20] sm:$0xe]  ;;  %v1003_v27 = vsel %vm1841_vm6, %v1635_v12, %v1002_v14  ;;  %v1310_v14 = vrot.slane %v1263_v7, 5 }
  0x88   : > { %v906_v43 = vsel %vm1873_vm7, %v901_v30, %v905_v31  ;;  %v1205_v30 = vshll.u32 %v1101_v23, 16  ;;  %v457_v31 = vld [vmem:[#allocation2 + $0x38] sm:$0xf] }
  0x89   : > { %1312 = vrot.lane.b32.xlu2 %v1283_v37, %s1761_s10  ;;  %v952_v37 = vld [vmem:[#allocation2 + $0x38] sm:$0xe]  ;;  %465 = vst.msk [vmem:[#allocation3 + $0x1c] sm:$0xf] %vm285_vm0, %v457_v31 }
  0x8a   : > { %758 = vrot.lane.b32.xlu1 %v736_v61, %s1756_s30  ;;  %v698_v62 = vpop.permute.xlu1 %697  ;;  %v1040_v61 = vld [vmem:[#allocation2 + $0x20] sm:$0xf]  ;;  %v1634_v50 = vrot.slane %v952_v37, 9  ;;  %v1638_v37 = vrot.slane %v1252_v26, 9 }
  0x8b   : > { %1314 = vrot.lane.b32.xlu0 %v1287_v42, %s1761_s10  ;;  %v706_v18 = vpop.permute.xlu2 %705  ;;  %v1258_v42 = vld [vmem:[#allocation2 + $0x38] sm:$0xe] }
  0x8c   : > { %v999_v4 = vsel %vm1841_vm6, %v1634_v50, %v998_v51  ;;  %v1291_v49 = vsel %vm1841_vm6, %v1638_v37, %v1290_v39  ;;  %v1254_v50 = vld [vmem:[#allocation2 + $0x28] sm:$0xe]  ;;  %v1255_v51 = vld [vmem:[#allocation2 + $0x2c] sm:$0x1] }
  0x91   : > { %v598_v57 = vpop.permute.xlu0 %597  ;;  %760 = vrot.lane.b32.xlu2 %v737_v59, %s1756_s30  ;;  %v1137_v59 = vrot.slane %v1135_v1, 5 }
  0x92   : > { %622 = vst.msk [vmem:[#allocation3] sm:$0xf] %vm621_vm12, %v598_v57  ;;  %1010 = vrot.lane.b32.xlu1 %v987_v6, %s1757_s6  ;;  %v1094_v57 = vld [vmem:[#allocation2 + $0x2c] sm:$0x1] }
  0x93   : > { %722 = vst.msk [vmem:[#allocation3] sm:$0xf] %vm721_vm13, %v698_v62  ;;  %1008 = vrot.lane.b32.xlu0 %v983_v0, %s1757_s6  ;;  %v2062_v17 = vpop.permute.xlu2 %1006  ;;  %v1155_v6 = vshll.u32 %v1094_v57, 16  ;;  %v1138_v9 = vor.u32 %v1137_v59, %v1134_v58  ;;  %v456_v59 = vld [vmem:[#allocation2 + $0x30] sm:$0xf] }
  0x94   : > { %464 = vst.msk [vmem:[#allocation3 + $0x18] sm:$0xf] %vm285_vm0, %v456_v59 }
  0x95   : > { %v1157_v16 = vrot.slane %v1155_v6, 5  ;;  %v1139_v21 = vrot.slane %v1138_v9, 4  ;;  %v1262_v6 = vld [vmem:[#allocation2 + $0x48] sm:$0xe] }
  0x96   : > { %v1643_v12 = vrot.slane %v1262_v6, 9 }
  0x99   : > { %1223 = vrot.lane.b32.xlu2 %v1172_v25, %s1760_s9  ;;  %v1099_v25 = vld [vmem:[#allocation2 + $0x40] sm:$0xf] }
  0x9a   : > { %919 = vrot.lane.b32.xlu1 %v892_v28, %s1758_s7  ;;  %v1158_v28 = vsel %vm1873_vm7, %v1153_v15, %v1157_v16  ;;  %v1311_v16 = vsel %vm1841_vm6, %v1643_v12, %v1310_v14 }
  0x9b   : > { %1225 = vrot.lane.b32.xlu0 %v1186_v29, %s1760_s9  ;;  %v606_v32 = vpop.permute.xlu2 %605  ;;  %v1202_v29 = vshrl.u32 %v1101_v23, 16 }
  0x9c   : > { %626 = vst.msk [vmem:[#allocation3 + $0x10] sm:$0xf] %vm621_vm12, %v606_v32  ;;  %v2075_v34 = vpop.permute.xlu1 %748  ;;  %v1144_v32 = vsel %vm1873_vm7, %v1139_v21, %v1143_v22  ;;  %v1361_v22 = vld [vmem:[%s2261_s3 + $0x20] sm:$0xf] }
  0x9d   : > { %726 = vst.msk [vmem:[#allocation3 + $0x10] sm:$0xf] %vm721_vm13, %v706_v18  ;;  %v747_v35 = vpop.permute.xlu0 %746  ;;  %v1640_v18 = vrot.slane %v1256_v47, 9  ;;  %v1100_v47 = vld [vmem:[#allocation2 + $0x44] sm:$0x1]  ;;  %v1399_v23 = vunpack.c.l.b16 %v1361_v22 }
  0x9e   : > { %771 = vst.msk [vmem:[#allocation3] sm:$0xf] %vm770_vm14, %v747_v35  ;;  %v1188_v35 = vshrl.u32 %v1099_v25, 16 }
  0x9f   : > { %775 = vst.msk [vmem:[#allocation3 + $0x10] sm:$0xf] %vm770_vm14, %v2041_v60  ;;  %v1641_v60 = vrot.slane %v1258_v42, 9  ;;  %v1299_v3 = vsel %vm1841_vm6, %v1640_v18, %v1298_v52  ;;  %v1207_v42 = vrot.slane %v1205_v30, 5  ;;  %v1045_v18 = vld [vmem:[#allocation2 + $0x48] sm:$0xf]  ;;  %v1404_v13 = vpack.c.b16 %v1399_v23, %v1399_v23 }
  0xa0   : > { %v1190_v44 = vrot.slane %v1188_v35, 4  ;;  %v1688_v35 = vld [vmem:[%s2261_s3] sm:$0xff] }
  0xa1   : > { %921 = vrot.lane.b32.xlu2 %v906_v43, %s1758_s7  ;;  %v1303_v0 = vsel %vm1841_vm6, %v1641_v60, %v1302_v53  ;;  %v1197_v60 = vshll.u32 %v1100_v47, 16  ;;  %v1639_v53 = vrot.slane %v1254_v50, 9 }
  0xa2   : > { %1060 = vrot.lane.b32.xlu1 %v1041_v36, %s1759_s8  ;;  %v1191_v36 = vshll.u32 %v1099_v25, 16  ;;  %v1424_v25 = vsel %vm1422_vm4, %v1404_v13, 0 }
  0xa3   : > { %1058 = vrot.lane.b32.xlu0 %v1040_v61, %s1759_s8  ;;  %v608_v54 = vpop.permute.xlu2 %607  ;;  %v1204_v61 = vrot.slane %v1202_v29, 4  ;;  %v1199_v58 = vrot.slane %v1197_v60, 5  ;;  %1429 = vmatpush.bf16.msra.mxu0 %v1424_v25  ;;  %v1690_v29 = vld [vmem:[%s2261_s3 + $0x10] sm:$0xff] }
  0xa4   : > { %v2088_v56 = vpop.permute.xlu1 %699  ;;  %627 = vst.msk [vmem:[#allocation3 + $0x14] sm:$0xf] %vm621_vm12, %v608_v54  ;;  %v1193_v45 = vrot.slane %v1191_v36, 5  ;;  %v1294_v54 = vrot.slane %v1255_v51, 5  ;;  %1712 = vmatpush.bf16.msra.mxu2 %v1424_v25  ;;  %1711 = vmatpush.bf16.msra.mxu1 %v1424_v25 }
  0xa5   : > { %v757_v62 = vpop.permute.xlu0 %756  ;;  %v1208_v1 = vor.u32 %v1207_v42, %v1204_v61  ;;  %1713 = vmatpush.bf16.msra.mxu3 %v1424_v25 }
  0xa6   : > { %v1194_v52 = vor.u32 %v1193_v45, %v1190_v44 }
  0xa7   : > { %v1209_v2 = vrot.slane %v1208_v1, 4 }
  0xa8   : > { %v1195_v57 = vrot.slane %v1194_v52, 4 }
  0xa9   : > { %1320 = vrot.lane.b32.xlu2 %v1299_v3, %s1761_s10  ;;  %v1260_v3 = vld [vmem:[#allocation2 + $0x40] sm:$0xe] }
  0xaa   : > { %1016 = vrot.lane.b32.xlu1 %v999_v4, %s1757_s6  ;;  %v1261_v4 = vld [vmem:[#allocation2 + $0x44] sm:$0x1]  ;;  %v1200_v5 = vsel %vm1873_vm7, %v1195_v57, %v1199_v58  ;;  %v1642_v8 = vrot.slane %v1260_v3, 9 }
  0xab   : > { %1322 = vrot.lane.b32.xlu0 %v1303_v0, %s1761_s10  ;;  %v910_v19 = vpop.permute.xlu2 %909  ;;  %v1306_v0 = vrot.slane %v1261_v4, 5 }
  0xac   : > { %v1005_v20 = vpop.permute.xlu1 %1004 }
  0xad   : > { %v708_v24 = vpop.permute.xlu0 %707  ;;  %v1307_v38 = vsel %vm1841_vm6, %v1642_v8, %v1306_v0 }
  0xae   : > { %727 = vst.msk [vmem:[#allocation3 + $0x14] sm:$0xf] %vm721_vm13, %v708_v24 }
  0xaf   : > { %776 = vst.msk [vmem:[#allocation3 + $0x14] sm:$0xf] %vm770_vm14, %v757_v62 }
  0xb1   : > { %1018 = vrot.lane.b32.xlu2 %v1003_v27, %s1757_s6 }
  0xb2   : > { %1221 = vrot.lane.b32.xlu1 %v1158_v28, %s1760_s9  ;;  %v1691_v28 = vld [vmem:[%s2261_s3 + $0x18] sm:$0xff] }
  0xb3   : > { %1219 = vrot.lane.b32.xlu0 %v1144_v32, %s1760_s9  ;;  %v916_v40 = vpop.permute.xlu2 %915  ;;  %1430 = vmatpush.bf16.msra.mxu0 %v1691_v28 }
  0xb4   : > { %v908_v43 = vpop.permute.xlu1 %907  ;;  %936 = vst.msk [vmem:[#allocation3 + $0x10] sm:$0xf] %vm931_vm15, %v916_v40  ;;  %1715 = vmatpush.bf16.msra.mxu2 %v1691_v28  ;;  %1714 = vmatpush.bf16.msra.mxu1 %v1691_v28 }
  0xb5   : > { %932 = vst.msk [vmem:[#allocation3] sm:$0xf] %vm931_vm15, %v908_v43  ;;  %v600_v46 = vpop.permute.xlu0 %599  ;;  %1716 = vmatpush.bf16.msra.mxu3 %v1691_v28 }
  0xb6   : > { %623 = vst.msk [vmem:[#allocation3 + $0x4] sm:$0xf] %vm621_vm12, %v600_v46 }
  0xb7   : > { %723 = vst.msk [vmem:[#allocation3 + $0x4] sm:$0xf] %vm721_vm13, %v2088_v56  ;;  %1431 = vmatpush.bf16.msra.mxu0 %v1690_v29 }
  0xb8   : > { %772 = vst.msk [vmem:[#allocation3 + $0x4] sm:$0xf] %vm770_vm14, %v2075_v34  ;;  %v1213_v34 = vrot.slane %v1211_v48, 5  ;;  %1718 = vmatpush.bf16.msra.mxu2 %v1690_v29  ;;  %1717 = vmatpush.bf16.msra.mxu1 %v1690_v29 }
  0xb9   : > { %933 = vst.msk [vmem:[#allocation3 + $0x4] sm:$0xf] %vm931_vm15, %v910_v19  ;;  %1066 = vrot.lane.b32.xlu2 %v1044_v10, %s1759_s8  ;;  %1719 = vmatpush.bf16.msra.mxu3 %v1690_v29 }
  0xba   : > { %1316 = vrot.lane.b32.xlu1 %v1291_v49, %s1761_s10  ;;  %1030 = vst.msk [vmem:[#allocation3 + $0x4] sm:$0xf] %vm1028_vm2, %v2062_v17  ;;  %v1295_v17 = vsel %vm1841_vm6, %v1639_v53, %v1294_v54  ;;  %v1214_v63 = vsel %vm1873_vm7, %v1209_v2, %v1213_v34  ;;  %vm1336_vm6 = vcmask 585216   ;;  %vm1409_vm7 = vcmask 588800  }
  0xbb   : > { %1068 = vrot.lane.b32.xlu0 %v1045_v18, %s1759_s8  ;;  %v1057_v55 = vpop.permute.xlu2 %1056  ;;  %1029 = vst.msk [vmem:[#allocation3] sm:$0xf] %vm1028_vm2, %v1005_v20  ;;  %1432 = vmatpush.bf16.msra.mxu0 %v1689_v33 }
  0xbc   : > { %v604_v56 = vpop.permute.xlu1 %603  ;;  %1080 = vst.msk [vmem:[#allocation3 + $0x4] sm:$0xf] %vm1078_vm3, %v1057_v55  ;;  %1721 = vmatpush.bf16.msra.mxu2 %v1689_v33  ;;  %1720 = vmatpush.bf16.msra.mxu1 %v1689_v33 }
  0xbd   : > { %625 = vst.msk [vmem:[#allocation3 + $0xc] sm:$0xf] %vm621_vm12, %v604_v56  ;;  %v602_v62 = vpop.permute.xlu0 %601  ;;  %1722 = vmatpush.bf16.msra.mxu3 %v1689_v33 }
  0xbe   : > { %624 = vst.msk [vmem:[#allocation3 + $0x8] sm:$0xf] %vm621_vm12, %v602_v62 }
  0xbf   : > { %1433 = vmatpush.bf16.msra.mxu0 %v1688_v35 }
  0xc0   : > { %1724 = vmatpush.bf16.msra.mxu2 %v1688_v35  ;;  %1723 = vmatpush.bf16.msra.mxu1 %v1688_v35 }
  0xc1   : > { %1318 = vrot.lane.b32.xlu2 %v1295_v17, %s1761_s10  ;;  %1725 = vmatpush.bf16.msra.mxu3 %v1688_v35 }
  0xc2   : > { %1229 = vrot.lane.b32.xlu1 %v1214_v63, %s1760_s9 }
  0xc3   : > { %1227 = vrot.lane.b32.xlu0 %v1200_v5, %s1760_s9  ;;  %v751_v9 = vpop.permute.xlu2 %750 }
  0xc4   : > { %v704_v11 = vpop.permute.xlu1 %703 }
  0xc5   : > { %725 = vst.msk [vmem:[#allocation3 + $0xc] sm:$0xf] %vm721_vm13, %v704_v11  ;;  %v702_v15 = vpop.permute.xlu0 %701 }
  0xc6   : > { %724 = vst.msk [vmem:[#allocation3 + $0x8] sm:$0xf] %vm721_vm13, %v702_v15 }
  0xc7   : > { %773 = vst.msk [vmem:[#allocation3 + $0x8] sm:$0xf] %vm770_vm14, %v751_v9 }
  0xc9   : > { %1324 = vrot.lane.b32.xlu2 %v1307_v38, %s1761_s10 }
  0xcb   : > { %1326 = vrot.lane.b32.xlu0 %v1311_v16, %s1761_s10  ;;  %v1015_v19 = vpop.permute.xlu2 %1014 }
  0xcc   : > { %v1055_v20 = vpop.permute.xlu1 %1054 }
  0xcd   : > { %1079 = vst.msk [vmem:[#allocation3] sm:$0xf] %vm1078_vm3, %v1055_v20  ;;  %v918_v21 = vpop.permute.xlu0 %917 }
  0xce   : > { %937 = vst.msk [vmem:[#allocation3 + $0x14] sm:$0xf] %vm931_vm15, %v918_v21 }
  0xcf   : > { %1034 = vst.msk [vmem:[#allocation3 + $0x14] sm:$0xf] %vm1028_vm2, %v1015_v19 }
  0xd3   : > { %v710_v24 = vpop.permute.xlu2 %709 }
  0xd4   : > { %v612_v26 = vpop.permute.xlu1 %611 }
  0xd5   : > { %629 = vst.msk [vmem:[#allocation3 + $0x1c] sm:$0xf] %vm621_vm12, %v612_v26  ;;  %v610_v27 = vpop.permute.xlu0 %609 }
  0xd6   : > { %628 = vst.msk [vmem:[#allocation3 + $0x18] sm:$0xf] %vm621_vm12, %v610_v27 }
  0xd7   : > { %728 = vst.msk [vmem:[#allocation3 + $0x18] sm:$0xf] %vm721_vm13, %v710_v24 }
  0xdb   : > { %v914_v30 = vpop.permute.xlu2 %913 }
  0xdc   : > { %v1013_v31 = vpop.permute.xlu1 %1012 }
  0xdd   : > { %1033 = vst.msk [vmem:[#allocation3 + $0x10] sm:$0xf] %vm1028_vm2, %v1013_v31  ;;  %v753_v32 = vpop.permute.xlu0 %752 }
  0xde   : > { %774 = vst.msk [vmem:[#allocation3 + $0xc] sm:$0xf] %vm770_vm14, %v753_v32 }
  0xdf   : > { %935 = vst.msk [vmem:[#allocation3 + $0xc] sm:$0xf] %vm931_vm15, %v914_v30 }
  0xe3   : > { %v1313_v36 = vpop.permute.xlu2 %1312 }
  0xe4   : > { %v1218_v37 = vpop.permute.xlu1 %1217 }
  0xe5   : > { %1241 = vst.msk [vmem:[#allocation3 + $0x4] sm:$0xf] %vm1239_vm5, %v1218_v37  ;;  %v1216_v39 = vpop.permute.xlu0 %1215 }
  0xe6   : > { %1240 = vst.msk [vmem:[#allocation3] sm:$0xf] %vm1239_vm5, %v1216_v39 }
  0xe7   : > { %1337 = vst.msk [vmem:[#allocation3] sm:$0xf] %vm1336_vm6, %v1313_v36 }
  0xeb   : > { %v761_v40 = vpop.permute.xlu2 %760 }
  0xec   : > { %v912_v41 = vpop.permute.xlu1 %911 }
  0xed   : > { %934 = vst.msk [vmem:[#allocation3 + $0x8] sm:$0xf] %vm931_vm15, %v912_v41  ;;  %v712_v61 = vpop.permute.xlu0 %711 }
  0xee   : > { %729 = vst.msk [vmem:[#allocation3 + $0x1c] sm:$0xf] %vm721_vm13, %v712_v61 }
  0xef   : > { %778 = vst.msk [vmem:[#allocation3 + $0x1c] sm:$0xf] %vm770_vm14, %v761_v40 }
  0xf3   : > { %v1224_v42 = vpop.permute.xlu2 %1223 }
  0xf4   : > { %v1065_v43 = vpop.permute.xlu1 %1064 }
  0xf5   : > { %1084 = vst.msk [vmem:[#allocation3 + $0x14] sm:$0xf] %vm1078_vm3, %v1065_v43  ;;  %v1063_v44 = vpop.permute.xlu0 %1062 }
  0xf6   : > { %1083 = vst.msk [vmem:[#allocation3 + $0x10] sm:$0xf] %vm1078_vm3, %v1063_v44 }
  0xf7   : > { %1244 = vst.msk [vmem:[#allocation3 + $0x10] sm:$0xf] %vm1239_vm5, %v1224_v42 }
  0xfb   : > { %v922_v45 = vpop.permute.xlu2 %921 }
  0xfc   : > { %v759_v46 = vpop.permute.xlu1 %758  ;;  %939 = vst.msk [vmem:[#allocation3 + $0x1c] sm:$0xf] %vm931_vm15, %v922_v45 }
  0xfd   : > { %777 = vst.msk [vmem:[#allocation3 + $0x18] sm:$0xf] %vm770_vm14, %v759_v46  ;;  %v1315_v47 = vpop.permute.xlu0 %1314 }
  0xfe   : > { %1338 = vst.msk [vmem:[#allocation3 + $0x4] sm:$0xf] %vm1336_vm6, %v1315_v47 }
 0x103   : > { %v1321_v48 = vpop.permute.xlu2 %1320 }
 0x104   : > { %v1011_v10 = vpop.permute.xlu1 %1010  ;;  %1341 = vst.msk [vmem:[#allocation3 + $0x10] sm:$0xf] %vm1336_vm6, %v1321_v48 }
 0x105   : > { %1032 = vst.msk [vmem:[#allocation3 + $0xc] sm:$0xf] %vm1028_vm2, %v1011_v10  ;;  %v1009_v49 = vpop.permute.xlu0 %1008  ;;  %v1684_v1 = vld [vmem:[#allocation3] sm:$0xff] }
 0x106   : > { %1031 = vst.msk [vmem:[#allocation3 + $0x8] sm:$0xf] %vm1028_vm2, %v1009_v49  ;;  %1676 = vmatmul.msk.bf16.vlgmr.msra.gmra.mxu0 %vm1409_vm7, %v1684_v1 }
 0x10b   : > { %v1019_v50 = vpop.permute.xlu2 %1018 }
 0x10c   : > { %v920_v51 = vpop.permute.xlu1 %919  ;;  %1036 = vst.msk [vmem:[#allocation3 + $0x1c] sm:$0xf] %vm1028_vm2, %v1019_v50 }
 0x10d   : > { %938 = vst.msk [vmem:[#allocation3 + $0x18] sm:$0xf] %vm931_vm15, %v920_v51  ;;  %v1226_v18 = vpop.permute.xlu0 %1225 }
 0x10e   : > { %1245 = vst.msk [vmem:[#allocation3 + $0x14] sm:$0xf] %vm1239_vm5, %v1226_v18 }
 0x113   : > { %v1067_v53 = vpop.permute.xlu2 %1066 }
 0x114   : > { %v1061_v52 = vpop.permute.xlu1 %1060 }
 0x115   : > { %1082 = vst.msk [vmem:[#allocation3 + $0xc] sm:$0xf] %vm1078_vm3, %v1061_v52  ;;  %v1059_v60 = vpop.permute.xlu0 %1058 }
 0x116   : > { %1081 = vst.msk [vmem:[#allocation3 + $0x8] sm:$0xf] %vm1078_vm3, %v1059_v60 }
 0x11b   : > { %v1319_v55 = vpop.permute.xlu2 %1318 }
 0x11c   : > { %v1017_v54 = vpop.permute.xlu1 %1016 }
 0x11d   : > { %1035 = vst.msk [vmem:[#allocation3 + $0x18] sm:$0xf] %vm1028_vm2, %v1017_v54  ;;  %v1323_v2 = vpop.permute.xlu0 %1322 }
 0x11e   : > { %1342 = vst.msk [vmem:[#allocation3 + $0x14] sm:$0xf] %vm1336_vm6, %v1323_v2 }
 0x11f   : > { %1085 = vst.msk [vmem:[#allocation3 + $0x18] sm:$0xf] %vm1078_vm3, %v1067_v53 }
 0x123   : > { %v1325_v63 = vpop.permute.xlu2 %1324 }
 0x124   : > { %v1222_v34 = vpop.permute.xlu1 %1221 }
 0x125   : > { %1243 = vst.msk [vmem:[#allocation3 + $0xc] sm:$0xf] %vm1239_vm5, %v1222_v34  ;;  %v1220_v56 = vpop.permute.xlu0 %1219  ;;  %v1686_v57 = vld [vmem:[#allocation3 + $0x10] sm:$0xff] }
 0x126   : > { %1242 = vst.msk [vmem:[#allocation3 + $0x8] sm:$0xf] %vm1239_vm5, %v1220_v56  ;;  %1678 = vmatmul.msk.bf16.vlgmr.msra.gmra.mxu2 %vm1409_vm7, %v1686_v57 }
 0x127   : > { %1340 = vst.msk [vmem:[#allocation3 + $0xc] sm:$0xf] %vm1336_vm6, %v1319_v55 }
 0x12c   : > { %v1317_v58 = vpop.permute.xlu1 %1316 }
 0x12d   : > { %1339 = vst.msk [vmem:[#allocation3 + $0x8] sm:$0xf] %vm1336_vm6, %v1317_v58  ;;  %v1069_v59 = vpop.permute.xlu0 %1068 }
 0x12e   : > { %1086 = vst.msk [vmem:[#allocation3 + $0x1c] sm:$0xf] %vm1078_vm3, %v1069_v59 }
 0x134   : > { %v1685_v62 = vld [vmem:[#allocation3 + $0x8] sm:$0xff]  ;;  %v1230_v17 = vpop.permute.xlu1 %1229 }
 0x135   : > { %v1228_v3 = vpop.permute.xlu0 %1227  ;;  %1247 = vst.msk [vmem:[#allocation3 + $0x1c] sm:$0xf] %vm1239_vm5, %v1230_v17  ;;  %1677 = vmatmul.msk.bf16.vlgmr.msra.gmra.mxu1 %vm1409_vm7, %v1685_v62 }
 0x136   : > { %1246 = vst.msk [vmem:[#allocation3 + $0x18] sm:$0xf] %vm1239_vm5, %v1228_v3 }
 0x137   : > { %1343 = vst.msk [vmem:[#allocation3 + $0x18] sm:$0xf] %vm1336_vm6, %v1325_v63 }
 0x13d   : > { %v1327_v4 = vpop.permute.xlu0 %1326 }
 0x13e   : > { %1344 = vst.msk [vmem:[#allocation3 + $0x1c] sm:$0xf] %vm1336_vm6, %v1327_v4 }
 0x145   : > { %v1687_v5 = vld [vmem:[#allocation3 + $0x18] sm:$0xff] }
 0x146   : > { %1679 = vmatmul.msk.bf16.vlgmr.msra.gmra.mxu3 %vm1409_vm7, %v1687_v5 }
 0x183   : > { %v1435_v6 = vpop.f32.mrf.mxu0 }
 0x184   : > { %v1455_v7 = vpack.c.bf16 %v1435_v6, %v1435_v6  ;;  %v1494_v21 = vmul.f32 %v1435_v6, %v1435_v6  ;;  %v1472_v13 = vsel %vm1471_vm8, %v1435_v6, 0.0 }
 0x186   : > { %1463 = vst.msk [vmem:[%s2215_s26] sm:$0xf] %vm285_vm0, %v1455_v7  ;;  %v1502_v28 = vsel %vm1471_vm8, %v1494_v21, 0.0 }
 0x18b   : > { %v1437_v8 = vpop.f32.mrf.mxu0 }
 0x18c   : > { %v1456_v0 = vpack.c.bf16 %v1437_v8, %v1437_v8  ;;  %v1495_v20 = vmul.f32 %v1437_v8, %v1437_v8  ;;  %v1473_v22 = vsel %vm1471_vm8, %v1437_v8, 0.0 }
 0x18d   : > { %v1474_v27 = vadd.f32 %v1473_v22, %v1472_v13 }
 0x18e   : > { %1464 = vst.msk [vmem:[%s2215_s26 + $0x4] sm:$0xf] %vm285_vm0, %v1456_v0  ;;  %v1503_v24 = vsel %vm1471_vm8, %v1495_v20, 0.0 }
 0x18f   : > { %v1504_v31 = vadd.f32 %v1503_v24, %v1502_v28 }
 0x1a9   : > { %v1445_v9 = vpop.f32.mrf.mxu2 }
 0x1aa   : > { %v1459_v11 = vpack.c.bf16 %v1445_v9, %v1445_v9  ;;  %v1498_v37 = vmul.f32 %v1445_v9, %v1445_v9  ;;  %v1479_v41 = vsel %vm1471_vm8, %v1445_v9, 0.0 }
 0x1ac   : > { %1467 = vst.msk [vmem:[%s2215_s26 + $0x10] sm:$0xf] %vm285_vm0, %v1459_v11  ;;  %v1509_v43 = vsel %vm1471_vm8, %v1498_v37, 0.0 }
 0x1b1   : > { %v1447_v12 = vpop.f32.mrf.mxu2 }
 0x1b2   : > { %v1460_v14 = vpack.c.bf16 %v1447_v12, %v1447_v12  ;;  %v1440_v15 = vpop.f32.mrf.mxu1  ;;  %v1499_v44 = vmul.f32 %v1447_v12, %v1447_v12  ;;  %v1481_v47 = vsel %vm1471_vm8, %v1447_v12, 0.0 }
 0x1b3   : > { %v1457_v38 = vpack.c.bf16 %v1440_v15, %v1440_v15  ;;  %v1496_v23 = vmul.f32 %v1440_v15, %v1440_v15  ;;  %v1475_v25 = vsel %vm1471_vm8, %v1440_v15, 0.0 }
 0x1b4   : > { %1468 = vst.msk [vmem:[%s2215_s26 + $0x14] sm:$0xf] %vm285_vm0, %v1460_v14  ;;  %v1476_v32 = vadd.f32 %v1475_v25, %v1474_v27  ;;  %v1511_v49 = vsel %vm1471_vm8, %v1499_v44, 0.0 }
 0x1b5   : > { %1465 = vst.msk [vmem:[%s2215_s26 + $0x8] sm:$0xf] %vm285_vm0, %v1457_v38  ;;  %v1505_v29 = vsel %vm1471_vm8, %v1496_v23, 0.0 }
 0x1b6   : > { %v1506_v35 = vadd.f32 %v1505_v29, %v1504_v31 }
 0x1ba   : > { %v1442_v16 = vpop.f32.mrf.mxu1 }
 0x1bb   : > { %v1458_v19 = vpack.c.bf16 %v1442_v16, %v1442_v16  ;;  %v1497_v26 = vmul.f32 %v1442_v16, %v1442_v16  ;;  %v1477_v30 = vsel %vm1471_vm8, %v1442_v16, 0.0 }
 0x1bc   : > { %v1478_v36 = vadd.f32 %v1477_v30, %v1476_v32 }
 0x1bd   : > { %1466 = vst.msk [vmem:[%s2215_s26 + $0xc] sm:$0xf] %vm285_vm0, %v1458_v19  ;;  %v1507_v33 = vsel %vm1471_vm8, %v1497_v26, 0.0 }
 0x1be   : > { %v1508_v39 = vadd.f32 %v1507_v33, %v1506_v35  ;;  %v1480_v42 = vadd.f32 %v1479_v41, %v1478_v36 }
 0x1c0   : > { %v1510_v46 = vadd.f32 %v1509_v43, %v1508_v39  ;;  %v1482_v10 = vadd.f32 %v1481_v47, %v1480_v42 }
 0x1c2   : > { %v1512_v51 = vadd.f32 %v1511_v49, %v1510_v46 }
 0x1c9   : > { %v1450_v40 = vpop.f32.mrf.mxu3 }
 0x1ca   : > { %v1461_v61 = vpack.c.bf16 %v1450_v40, %v1450_v40  ;;  %v1500_v45 = vmul.f32 %v1450_v40, %v1450_v40  ;;  %v1483_v48 = vsel %vm1471_vm8, %v1450_v40, 0.0 }
 0x1cb   : > { %v1484_v50 = vadd.f32 %v1483_v48, %v1482_v10 }
 0x1cc   : > { %1469 = vst.msk [vmem:[%s2215_s26 + $0x18] sm:$0xf] %vm285_vm0, %v1461_v61  ;;  %v1513_v1 = vsel %vm1471_vm8, %v1500_v45, 0.0 }
 0x1cd   : > { %v1514_v54 = vadd.f32 %v1513_v1, %v1512_v51 }
 0x1d1   : > { %v1452_v18 = vpop.f32.mrf.mxu3 }
 0x1d2   : > { %v1462_v52 = vpack.c.bf16 %v1452_v18, %v1452_v18  ;;  %v1485_v60 = vsel %vm1471_vm8, %v1452_v18, 0.0  ;;  %v1501_v53 = vmul.f32 %v1452_v18, %v1452_v18 }
 0x1d3   : > { %v1486_v2 = vadd.f32 %v1485_v60, %v1484_v50 }
 0x1d4   : > { %1470 = vst.msk [vmem:[%s2215_s26 + $0x1c] sm:$0xf] %vm285_vm0, %v1462_v52  ;;  %v1515_v34 = vsel %vm1471_vm8, %v1501_v53, 0.0 }
 0x1d5   : > { %v1487_v55 = vrot.slane %v1486_v2, 4  ;;  %v1516_v56 = vadd.f32 %v1515_v34, %v1514_v54 }
 0x1d7   : > { %v1488_v57 = vadd.f32 %v1487_v55, %v1486_v2  ;;  %v1517_v58 = vrot.slane %v1516_v56, 4 }
 0x1d9   : > { %v1489_v59 = vrot.slane %v1488_v57, 2  ;;  %v1518_v62 = vadd.f32 %v1517_v58, %v1516_v56 }
 0x1db   : > { %v1490_v17 = vadd.f32 %v1489_v59, %v1488_v57  ;;  %v1519_v63 = vrot.slane %v1518_v62, 2 }
 0x1dd   : > { %v1491_v3 = vrot.slane %v1490_v17, 1  ;;  %v1520_v4 = vadd.f32 %v1519_v63, %v1518_v62 }
 0x1df   : > { %v1492_v5 = vadd.f32 %v1491_v3, %v1490_v17  ;;  %v1521_v6 = vrot.slane %v1520_v4, 1 }
 0x1e1   : > { %1493 = vst.msk [vmem:[%s235_s29] sm:$0x1] %vm287_vm1, %v1492_v5  ;;  %v1522_v7 = vadd.f32 %v1521_v6, %v1520_v4 }
 0x1e3   : > { %1523 = vst.msk [vmem:[%s235_s29 + $0x1] sm:$0x1] %vm287_vm1, %v1522_v7 }
 0x1e4 PF: > { %s16_s18 = sadd.s32 1, %s1751_s18  }
 0x1e5   : > { %p13_p4 = scmp.ge.s32.totalorder %s16_s18, 4  }
 0x1e7   :  { %15 = sbr.rel (!%p13_p4) target bundleno = 1 (0x1), region = 80 }

</bundles_post_ra>
